<compile_context>
chip_gen: v7x
topology: tpu7x:2x2x1
jax: 0.10.0
libtpu: 0.0.40
codegen_flags: <defaults>
</compile_context>

<pallas_src>
import functools

import jax
import jax.numpy as jnp
from jax.experimental import pallas as pl
from jax.experimental.pallas import tpu as pltpu


def _vq_kernel(z_ref, et_ref, e_ref, esq_ref, *out_refs,
               n_e, n_rows, tile_n, with_d):
    """One row-tile of vector quantization.

    z_ref   : (tile_n, e_dim)   input rows
    et_ref  : (e_dim, n_e)      codebook transposed (lane-dense cross-matmul operand)
    e_ref   : (n_e, e_dim)      codebook (row layout for the one-hot gather matmul)
    esq_ref : (1, n_e)          per-code squared norms
    out refs (in order):
      [d_ref  : (tile_n, n_e)   distances, only when with_d]
      zq_ref  : (tile_n, e_dim) quantized rows
      idx_ref : (tile_n, 1)     argmin indices (int32)
      mse_ref : (1, 8, 128)     per-tile partial sum of (zq - z)^2 (scalar broadcast)
    """
    if with_d:
        d_ref, zq_ref, idx_ref, mse_ref = out_refs
    else:
        zq_ref, idx_ref, mse_ref = out_refs

    z = z_ref[...]                                               # (tile_n, e_dim) f32
    z_sq = jnp.sum(z * z, axis=1, keepdims=True)                 # (tile_n, 1)

    # z @ E^T as a plain matmul against the host-transposed codebook (no in-kernel
    # relayout).  The -2 scale is folded via a VPU multiply-add: the kernel is
    # memory-bound so this (tile_n, n_e) elementwise op is free filler.
    cross = jnp.dot(z, et_ref[...], preferred_element_type=jnp.float32)  # (tile_n, n_e)
    d = z_sq + esq_ref[...] - 2.0 * cross                        # ||z - e||^2

    if with_d:
        d_ref[...] = d

    # First-occurrence argmin along the codebook axis (iota + min trick; robust lowering).
    d_min = jnp.min(d, axis=1, keepdims=True)                    # (tile_n, 1)
    ids = jax.lax.broadcasted_iota(jnp.int32, d.shape, 1)        # (tile_n, n_e)
    idx = jnp.min(jnp.where(d <= d_min, ids, n_e), axis=1, keepdims=True)
    idx = jnp.minimum(idx, n_e - 1)                              # guard degenerate rows
    idx_ref[...] = idx

    # Exact gather of codebook rows via one-hot matmul on the MXU (0/1 weights).
    one_hot = (ids == idx).astype(jnp.float32)                   # (tile_n, n_e)
    zq = jnp.dot(one_hot, e_ref[...], preferred_element_type=jnp.float32)
    zq_ref[...] = zq

    # Fused commitment-loss partial: sum of (zq - z)^2 over this tile, masking rows
    # that exist only because of padding.  zq and z are already in VMEM here, so this
    # avoids re-reading both from HBM in the wrapper.
    row = (jax.lax.broadcasted_iota(jnp.int32, (tile_n, 1), 0)
           + pl.program_id(0) * tile_n)
    valid = row < n_rows                                         # (tile_n, 1)
    diff = zq - z
    part = jnp.sum(jnp.where(valid, diff * diff, 0.0))
    mse_ref[...] = jnp.full((1, 8, 128), part, jnp.float32)


def _vmem_limit_bytes(tile_n, e_dim, n_e):
    f32 = 4
    io_blocks = tile_n * n_e + 2 * tile_n * e_dim + tile_n + 8 * 128   # d, z, zq, idx, mse
    const_blocks = 2 * n_e * e_dim + n_e                                # E^T, E, ||e||^2
    est = 2 * f32 * (io_blocks + const_blocks)       # double-buffered pipeline blocks
    est += 16 * (1 << 20)                            # in-kernel temporaries (cross, one-hot)
    # Generation-aware cap: ~0.85 x physical VMEM (v5e/v6e 128 MiB, v7x 64 MiB per TC),
    # leaving headroom for Mosaic internal scratch.
    try:
        phys = int(pltpu.get_tpu_info().vmem_capacity_bytes)
    except Exception:
        phys = 64 * (1 << 20)                        # conservative fallback (v7x per-core)
    cap = int(phys * 0.85)
    return int(min(cap, max(est, 32 * (1 << 20))))


def vector_quantizer_forward(z_nchw, codebook, beta, *, legacy=True, tile_n=1024,
                             return_d=True):
    """Forward pass of movqgan VectorQuantizer.

    z_nchw:   (B, C, H, W) float32 with C == e_dim
    codebook: (n_e, e_dim) float32 embedding weight
    Returns (z_q (B,C,H,W), loss scalar, (d (N, n_e) or None, min_encoding_indices (N,)))
    where N = B*H*W.
    """
    B, C, H, W = z_nchw.shape
    n_e, e_dim = codebook.shape
    assert C == e_dim, "channel dim must equal codebook e_dim"

    # b c h w -> b h w c -> (N, e_dim)
    z_bhwc = jnp.transpose(z_nchw, (0, 2, 3, 1))
    z_flat = z_bhwc.reshape(-1, e_dim)
    n_rows = z_flat.shape[0]

    # Row tile: default 1024 (mem-bound tiling sweet spot), multiple of 8 sublanes, and
    # clamped so there are >= 2 grid steps (v7x megacore keeps both TensorCores busy).
    tile_n = max(8, min(int(tile_n), n_rows))
    if n_rows >= 16:
        tile_n = min(tile_n, pl.cdiv(n_rows, 2))
    tile_n = max(8, (tile_n // 8) * 8)
    num_tiles = pl.cdiv(n_rows, tile_n)
    n_pad = num_tiles * tile_n
    z_flat_p = (jnp.pad(z_flat, ((0, n_pad - n_rows), (0, 0)))
                if n_pad != n_rows else z_flat)

    # Host-side precompute: transposed codebook (lane-dense cross-matmul operand) and
    # per-code squared norms.  Both codebook layouts stay VMEM-resident across the grid
    # via constant index_maps; footprint here is tiny (< 128 KiB).
    e_t = jnp.transpose(codebook)                                # (e_dim, n_e)
    e_sq = jnp.sum(codebook * codebook, axis=1)[None, :]         # (1, n_e)

    kernel = functools.partial(_vq_kernel, n_e=n_e, n_rows=n_rows,
                               tile_n=tile_n, with_d=return_d)

    out_shape = []
    out_specs = []
    if return_d:
        out_shape.append(jax.ShapeDtypeStruct((n_pad, n_e), jnp.float32))
        out_specs.append(pl.BlockSpec((tile_n, n_e), lambda i: (i, 0)))
    out_shape += [
        jax.ShapeDtypeStruct((n_pad, e_dim), jnp.float32),       # quantized rows
        jax.ShapeDtypeStruct((n_pad, 1), jnp.int32),             # argmin indices
        jax.ShapeDtypeStruct((num_tiles, 8, 128), jnp.float32),  # per-tile mse partials
    ]
    out_specs += [
        pl.BlockSpec((tile_n, e_dim), lambda i: (i, 0)),
        pl.BlockSpec((tile_n, 1), lambda i: (i, 0)),
        pl.BlockSpec((1, 8, 128), lambda i: (i, 0, 0)),
    ]

    outs = pl.pallas_call(
        kernel,
        out_shape=tuple(out_shape),
        grid=(num_tiles,),
        in_specs=[
            pl.BlockSpec((tile_n, e_dim), lambda i: (i, 0)),     # z rows (tiled)
            pl.BlockSpec((e_dim, n_e), lambda i: (0, 0)),        # codebook^T (resident)
            pl.BlockSpec((n_e, e_dim), lambda i: (0, 0)),        # codebook (resident)
            pl.BlockSpec((1, n_e), lambda i: (0, 0)),            # ||e||^2 (resident)
        ],
        out_specs=tuple(out_specs),
        compiler_params=pltpu.CompilerParams(
            dimension_semantics=("parallel",),                   # independent row tiles
            vmem_limit_bytes=_vmem_limit_bytes(tile_n, e_dim, n_e),
        ),
    )(z_flat_p, e_t, codebook, e_sq)

    if return_d:
        d_p, zq_p, idx_p, mse_part = outs
        d = d_p[:n_rows]
    else:
        zq_p, idx_p, mse_part = outs
        d = None

    zq_flat = zq_p[:n_rows]
    min_encoding_indices = idx_p[:n_rows, 0]

    # Loss from fused in-kernel partial sums; .detach() only changes gradients, so both
    # terms have the same forward value (mse).
    mse = jnp.sum(mse_part[:, 0, 0]) / jnp.float32(n_rows * e_dim)
    loss = (mse + beta * mse) if legacy else (beta * mse + mse)

    # Straight-through estimator: forward value of z + (z_q - z).detach() is z_q, so we
    # return z_q directly and skip the extra HBM elementwise pass.
    # TODO(synk): gradient routing of the straight-through / detach terms is autograd
    # behaviour; wrap in jax.custom_vjp for training (forward value identical).
    z_q = zq_flat.reshape(B, H, W, C)
    z_q = jnp.transpose(z_q, (0, 3, 1, 2))                       # b h w c -> b c h w
    return z_q, loss, (d, min_encoding_indices)


def _reference_forward(z_nchw, codebook, beta, legacy=True):
    """Pure-JAX reference mirroring the PyTorch forward."""
    B, C, H, W = z_nchw.shape
    z = jnp.transpose(z_nchw, (0, 2, 3, 1))
    zf = z.reshape(-1, C)
    d = (jnp.sum(zf ** 2, axis=1, keepdims=True)
         + jnp.sum(codebook ** 2, axis=1)[None, :]
         - 2.0 * jnp.dot(zf, codebook.T, precision=jax.lax.Precision.HIGHEST))
    idx = jnp.argmin(d, axis=1)
    zq = jnp.take(codebook, idx, axis=0).reshape(z.shape)
    mse = jnp.mean((zq - z) ** 2)
    loss = (mse + beta * mse) if legacy else (beta * mse + mse)
    zq_st = z + jax.lax.stop_gradient(zq - z)
    return jnp.transpose(zq_st, (0, 3, 1, 2)), loss, d, idx


if __name__ == "__main__":
    B, C, H, W = 2, 32, 16, 16          # C == e_dim
    n_e = 256
    beta = 0.25

    key = jax.random.PRNGKey(0)
    kz, ke = jax.random.split(key)
    z = jax.random.normal(kz, (B, C, H, W), jnp.float32)
    # nn.Embedding(n_e, e_dim).weight.data.uniform_(-1/n_e, 1/n_e)
    codebook = jax.random.uniform(ke, (n_e, C), jnp.float32,
                                  minval=-1.0 / n_e, maxval=1.0 / n_e)

    z_q, loss, (d, idx) = vector_quantizer_forward(z, codebook, beta)
    z_q = jax.block_until_ready(z_q)

    zq_ref, loss_ref, d_ref, idx_ref = _reference_forward(z, codebook, beta)

    N = B * H * W
    assert z_q.shape == (B, C, H, W)
    assert d.shape == (N, n_e) and idx.shape == (N,)

    # Distances match to f32-matmul accuracy.
    err_d = float(jnp.max(jnp.abs(d - d_ref)))
    assert jnp.allclose(d, d_ref, rtol=1e-5, atol=1e-3), err_d

    # Quantized rows are exactly the codebook rows at the kernel-selected indices.
    zqk_flat = jnp.transpose(z_q, (0, 2, 3, 1)).reshape(-1, C)
    assert jnp.allclose(zqk_flat, jnp.take(codebook, idx, axis=0), atol=1e-6)

    # Indices may only differ from the reference on floating-point near-ties.
    d_at_k = jnp.take_along_axis(d_ref, idx[:, None], axis=1)[:, 0]
    d_at_r = jnp.take_along_axis(d_ref, idx_ref[:, None], axis=1)[:, 0]
    gap = jnp.abs(d_at_k - d_at_r)
    assert bool(jnp.all((idx == idx_ref) | (gap < 1e-3))), float(jnp.max(gap))

    # z_q matches the reference on every row whose index matches.
    zqr_flat = jnp.transpose(zq_ref, (0, 2, 3, 1)).reshape(-1, C)
    row_err = jnp.where((idx == idx_ref)[:, None], jnp.abs(zqk_flat - zqr_flat), 0.0)
    assert float(jnp.max(row_err)) < 1e-5

    # Fused in-kernel loss matches the reference loss.
    assert abs(float(loss) - float(loss_ref)) < 1e-4

    # return_d=False fast path (skips the dominant (N, n_e) HBM write) agrees.
    z_q2, loss2, (d2, idx2) = vector_quantizer_forward(z, codebook, beta, return_d=False)
    z_q2 = jax.block_until_ready(z_q2)
    assert d2 is None
    assert bool(jnp.all(idx2 == idx))
    assert abs(float(loss2) - float(loss)) < 1e-6
    assert jnp.allclose(z_q2, z_q, atol=1e-6)

    print("KERNEL_OK")
</pallas_src>

<mosaic_0001>
module attributes {stable_mosaic.version = 11 : i64} {
  func.func @_vq_kernel(%arg0: i32, %arg1: memref<256x32xf32, #tpu.memory_space<vmem>>, %arg2: memref<32x256xf32, #tpu.memory_space<vmem>>, %arg3: memref<256x32xf32, #tpu.memory_space<vmem>>, %arg4: memref<1x256xf32, #tpu.memory_space<vmem>>, %arg5: memref<256x256xf32, #tpu.memory_space<vmem>>, %arg6: memref<256x32xf32, #tpu.memory_space<vmem>>, %arg7: memref<256x1xi32, #tpu.memory_space<vmem>>, %arg8: memref<1x8x128xf32, #tpu.memory_space<vmem>>) attributes {dimension_semantics = [#tpu.dimension_semantics<parallel>], iteration_bounds = array<i64: 2>, scalar_prefetch = 0 : i64, scratch_operands = 0 : i64, tpu.core_type = #tpu.core_type<tc>, window_params = [{transform_indices = @transform_0, window_bounds = array<i64: 256, 32>}, {pipeline_mode = #tpu.pipeline_mode<synchronous>, transform_indices = @transform_1, window_bounds = array<i64: 32, 256>}, {pipeline_mode = #tpu.pipeline_mode<synchronous>, transform_indices = @transform_2, window_bounds = array<i64: 256, 32>}, {pipeline_mode = #tpu.pipeline_mode<synchronous>, transform_indices = @transform_3, window_bounds = array<i64: 1, 256>}, {transform_indices = @transform_4, window_bounds = array<i64: 256, 256>}, {transform_indices = @transform_5, window_bounds = array<i64: 256, 32>}, {transform_indices = @transform_6, window_bounds = array<i64: 256, 1>}, {transform_indices = @transform_7, window_bounds = array<i64: 1, 8, 128>}]} {
    %c0 = arith.constant 0 : index
    %c0_0 = arith.constant 0 : index
    %0 = vector.load %arg1[%c0, %c0_0] : memref<256x32xf32, #tpu.memory_space<vmem>>, vector<256x32xf32>
    %1 = arith.mulf %0, %0 : vector<256x32xf32>
    %cst = arith.constant dense<0.000000e+00> : vector<256xf32>
    %2 = vector.multi_reduction <add>, %1, %cst [1] : vector<256x32xf32> to vector<256xf32>
    %3 = vector.shape_cast %2 : vector<256xf32> to vector<256x1xf32>
    %c0_1 = arith.constant 0 : index
    %c0_2 = arith.constant 0 : index
    %4 = vector.load %arg2[%c0_1, %c0_2] : memref<32x256xf32, #tpu.memory_space<vmem>>, vector<32x256xf32>
    %cst_3 = arith.constant dense<0.000000e+00> : vector<256x256xf32>
    %5 = tpu.matmul %0, %4, %cst_3 {dimension_numbers = #tpu.dot_dimension_numbers<[1], [0], [0], [1], [0, 0, 1, 1], [], []>} : vector<256x32xf32>, vector<32x256xf32>, vector<256x256xf32> -> vector<256x256xf32>
    %c0_4 = arith.constant 0 : index
    %c0_5 = arith.constant 0 : index
    %6 = vector.load %arg4[%c0_4, %c0_5] : memref<1x256xf32, #tpu.memory_space<vmem>>, vector<1x256xf32>
    %7 = vector.broadcast %3 : vector<256x1xf32> to vector<256x256xf32>
    %8 = vector.broadcast %6 : vector<1x256xf32> to vector<256x256xf32>
    %9 = arith.addf %7, %8 : vector<256x256xf32>
    %cst_6 = arith.constant 2.000000e+00 : f32
    %10 = vector.broadcast %cst_6 : f32 to vector<256x256xf32>
    %11 = arith.mulf %10, %5 : vector<256x256xf32>
    %12 = arith.subf %9, %11 : vector<256x256xf32>
    %c0_7 = arith.constant 0 : index
    %c0_8 = arith.constant 0 : index
    %13 = vector.load %arg5[%c0_7, %c0_8] : memref<256x256xf32, #tpu.memory_space<vmem>>, vector<256x256xf32>
    tpu.vector_store %arg5[%c0_7, %c0_8], %12 {strides = array<i32>} : memref<256x256xf32, #tpu.memory_space<vmem>>, vector<256x256xf32>,
    %cst_9 = arith.constant dense<0x7F800000> : vector<256xf32>
    %14 = vector.multi_reduction <minimumf>, %12, %cst_9 [1] : vector<256x256xf32> to vector<256xf32>
    %15 = vector.shape_cast %14 : vector<256xf32> to vector<256x1xf32>
    %16 = tpu.iota {dimensions = array<i32: 1>} : vector<256x256xi32>
    %17 = vector.broadcast %15 : vector<256x1xf32> to vector<256x256xf32>
    %18 = arith.cmpf ole, %12, %17 : vector<256x256xf32>
    %c256_i32 = arith.constant 256 : i32
    %19 = vector.broadcast %c256_i32 : i32 to vector<256x256xi32>
    %20 = arith.select %18, %16, %19 : vector<256x256xi1>, vector<256x256xi32>
    %cst_10 = arith.constant dense<2147483647> : vector<256xi32>
    %21 = vector.multi_reduction <minsi>, %20, %cst_10 [1] : vector<256x256xi32> to vector<256xi32>
    %22 = vector.shape_cast %21 : vector<256xi32> to vector<256x1xi32>
    %c255_i32 = arith.constant 255 : i32
    %23 = vector.broadcast %c255_i32 : i32 to vector<256x1xi32>
    %24 = arith.minsi %22, %23 : vector<256x1xi32>
    %c0_11 = arith.constant 0 : index
    %c0_12 = arith.constant 0 : index
    %25 = vector.load %arg7[%c0_11, %c0_12] : memref<256x1xi32, #tpu.memory_space<vmem>>, vector<256x1xi32>
    tpu.vector_store %arg7[%c0_11, %c0_12], %24 {strides = array<i32>} : memref<256x1xi32, #tpu.memory_space<vmem>>, vector<256x1xi32>,
    %26 = vector.broadcast %24 : vector<256x1xi32> to vector<256x256xi32>
    %27 = arith.cmpi eq, %16, %26 : vector<256x256xi32>
    %28 = arith.extui %27 : vector<256x256xi1> to vector<256x256xi32>
    %29 = arith.sitofp %28 : vector<256x256xi32> to vector<256x256xf32>
    %c0_13 = arith.constant 0 : index
    %c0_14 = arith.constant 0 : index
    %30 = vector.load %arg3[%c0_13, %c0_14] : memref<256x32xf32, #tpu.memory_space<vmem>>, vector<256x32xf32>
    %cst_15 = arith.constant dense<0.000000e+00> : vector<256x32xf32>
    %31 = tpu.matmul %29, %30, %cst_15 {dimension_numbers = #tpu.dot_dimension_numbers<[1], [0], [0], [1], [0, 0, 1, 1], [], []>} : vector<256x256xf32>, vector<256x32xf32>, vector<256x32xf32> -> vector<256x32xf32>
    %c0_16 = arith.constant 0 : index
    %c0_17 = arith.constant 0 : index
    %32 = vector.load %arg6[%c0_16, %c0_17] : memref<256x32xf32, #tpu.memory_space<vmem>>, vector<256x32xf32>
    tpu.vector_store %arg6[%c0_16, %c0_17], %31 {strides = array<i32>} : memref<256x32xf32, #tpu.memory_space<vmem>>, vector<256x32xf32>,
    %33 = tpu.iota {dimensions = array<i32: 0>} : vector<256x1xi32>
    %c256_i32_18 = arith.constant 256 : i32
    %34 = arith.muli %arg0, %c256_i32_18 : i32
    %35 = vector.broadcast %34 : i32 to vector<256x1xi32>
    %36 = arith.addi %33, %35 : vector<256x1xi32>
    %c512_i32 = arith.constant 512 : i32
    %37 = vector.broadcast %c512_i32 : i32 to vector<256x1xi32>
    %38 = arith.cmpi slt, %36, %37 : vector<256x1xi32>
    %39 = arith.subf %31, %0 : vector<256x32xf32>
    %40 = arith.mulf %39, %39 : vector<256x32xf32>
    %cst_19 = arith.constant 0.000000e+00 : f32
    %41 = vector.shape_cast %38 : vector<256x1xi1> to vector<256x1xi1>
    %42 = vector.broadcast %41 : vector<256x1xi1> to vector<256x32xi1>
    %43 = vector.broadcast %cst_19 : f32 to vector<256x32xf32>
    %44 = arith.select %42, %40, %43 : vector<256x32xi1>, vector<256x32xf32>
    %45 = vector.shape_cast %44 : vector<256x32xf32> to vector<1x256x32xf32>
    %cst_20 = arith.constant dense<0.000000e+00> : vector<1xf32>
    %46 = vector.multi_reduction <add>, %45, %cst_20 [1, 2] : vector<1x256x32xf32> to vector<1xf32>
    %47 = vector.shape_cast %46 : vector<1xf32> to vector<1x1x1xf32>
    %48 = vector.extract %47[0, 0, 0] : f32 from vector<1x1x1xf32>
    %49 = vector.broadcast %48 : f32 to vector<1x8x128xf32>
    %c0_21 = arith.constant 0 : index
    %c0_22 = arith.constant 0 : index
    %c0_23 = arith.constant 0 : index
    %50 = vector.load %arg8[%c0_21, %c0_22, %c0_23] : memref<1x8x128xf32, #tpu.memory_space<vmem>>, vector<1x8x128xf32>
    tpu.vector_store %arg8[%c0_21, %c0_22, %c0_23], %49 {strides = array<i32>} : memref<1x8x128xf32, #tpu.memory_space<vmem>>, vector<1x8x128xf32>,
    return
  }
  func.func @transform_0(%arg0: i32) -> (i32, i32) {
    %c0_i32 = arith.constant 0 : i32
    %c0_i32_0 = arith.constant 0 : i32
    return %arg0, %c0_i32 : i32, i32
  }
  func.func @transform_1(%arg0: i32) -> (i32, i32) {
    %c0_i32 = arith.constant 0 : i32
    %c0_i32_0 = arith.constant 0 : i32
    %c0_i32_1 = arith.constant 0 : i32
    return %c0_i32, %c0_i32_0 : i32, i32
  }
  func.func @transform_2(%arg0: i32) -> (i32, i32) {
    %c0_i32 = arith.constant 0 : i32
    %c0_i32_0 = arith.constant 0 : i32
    %c0_i32_1 = arith.constant 0 : i32
    return %c0_i32, %c0_i32_0 : i32, i32
  }
  func.func @transform_3(%arg0: i32) -> (i32, i32) {
    %c0_i32 = arith.constant 0 : i32
    %c0_i32_0 = arith.constant 0 : i32
    %c0_i32_1 = arith.constant 0 : i32
    return %c0_i32, %c0_i32_0 : i32, i32
  }
  func.func @transform_4(%arg0: i32) -> (i32, i32) {
    %c0_i32 = arith.constant 0 : i32
    %c0_i32_0 = arith.constant 0 : i32
    return %arg0, %c0_i32 : i32, i32
  }
  func.func @transform_5(%arg0: i32) -> (i32, i32) {
    %c0_i32 = arith.constant 0 : i32
    %c0_i32_0 = arith.constant 0 : i32
    return %arg0, %c0_i32 : i32, i32
  }
  func.func @transform_6(%arg0: i32) -> (i32, i32) {
    %c0_i32 = arith.constant 0 : i32
    %c0_i32_0 = arith.constant 0 : i32
    return %arg0, %c0_i32 : i32, i32
  }
  func.func @transform_7(%arg0: i32) -> (i32, i32, i32) {
    %c0_i32 = arith.constant 0 : i32
    %c0_i32_0 = arith.constant 0 : i32
    %c0_i32_1 = arith.constant 0 : i32
    return %arg0, %c0_i32, %c0_i32_0 : i32, i32, i32
  }
}

</mosaic_0001>

<bundles_post_ra>
// kernel: tpu_custom_call.1
= control target key start
LH: loop header
LB: loop body
LE: loop exit
PB: predicated region body
PF: predicated region fallthrough
CT: control target
= control target key end

     0   :  { %13 = vsyncpa [#allocation3], 0  ;;  %s5367_s0 = inlined_call_operand.vmem [shape: f32[512,32], index: 0, kind: input, shape index: {}]   ;;  %s5368_s1 = inlined_call_operand.vmem [shape: f32[32,256], index: 1, kind: input, shape index: {}]   ;;  %s5369_s2 = inlined_call_operand.vmem [shape: f32[256,32], index: 2, kind: input, shape index: {}]   ;;  %s5370_s3 = inlined_call_operand.vmem [shape: f32[1,256], index: 3, kind: input, shape index: {}]   ;;  %s5371_s4 = inlined_call_operand.hbm [shape: f32[512,256], index: 4, kind: output, shape index: {0}]   ;;  %s5372_s5 = inlined_call_operand.vmem [shape: f32[512,32], index: 5, kind: output, shape index: {1}]   ;;  %s5373_s6 = inlined_call_operand.vmem [shape: s32[512,1], index: 6, kind: output, shape index: {2}]   ;;  %s5374_s7 = inlined_call_operand.hbm [shape: f32[2,8,128], index: 7, kind: output, shape index: {3}]  }
   0x1   :  { %15 = vsyncpa [#allocation3 + $0x1], 0 }
   0x2   :  { %16 = vsyncpa [#allocation5], 0 }
   0x3   :  { %18 = vsyncpa [#allocation5 + $0x1], 0  ;;  %s3449_s24 = smov 0   ;;  %s3451_s25 = smov 0  }
   0x4   :  { %s3453_s26 = smov 0   ;;  %s3455_s27 = smov 0  }
   0x5 LB: > { %s3470_s28 = sadd.s32 4294967295, %s3400_s27   ;;  %s2952_s29 = sadd.s32 4294967294, %s3400_s27   ;;  %s3400_s27 = sphi %s3455_s27, %s5464_s27   ;;  %s3396_s26 = sphi %s3453_s26, %s5463_s26   ;;  %s3392_s25 = sphi %s3451_s25, %s5462_s25   ;;  %s3388_s24 = sphi %s3449_s24, %s5461_s24  }
   0x6   : > { %s3474_s30 = sadd.s32 1, %s3400_s27   ;;  %s120_s8 = sadd.s32 1, %s3396_s26 }
   0x7   : > { %s117_s9 = ssub.s32 %s3400_s27, %s3474_s30  ;;  %p130_p0 = scmp.ne.s32.totalorder %s3396_s26, %s3392_s25 }
   0x8   : > { %p118_p1 = scmp.eq.s32.totalorder %s117_s9, 0  ;;  %p131_p2 = scmp.eq.s32.totalorder %s3470_s28, 1 }
   0x9   : > { %p136_p3 = scmp.ne.s32.totalorder %s3392_s25, %s3388_s24  ;;  %p137_p4 = scmp.eq.s32.totalorder %s2952_s29, 1 }
   0xa   : > { %s3485_s10 = scalar_select %p118_p1, %s3396_s26, %s120_s8  }
   0xb   : > { %p3487_p5 = por %p131_p2, %p130_p0  ;;  %p3491_p6 = por %p137_p4, %p136_p3 }
   0xc   : > { %p2955_p7 = scmp.ge.s32.totalorder %s3400_s27, 1  ;;  %p251_p8 = scmp.lt.s32.totalorder %s3400_s27, 3 }
   0xe   : > { %p252_p9 = pnand %p2955_p7, %p251_p8 }
  0x10   : > { %255 = sbr.rel (%p252_p9) target bundleno = 1332 (0x534), region = 36 }
  0x17   : > { %v479_v0 = vld [vmem:[%s5368_s1 + $0x8] sm:$0xff]  ;;  %v481_v1 = vld [vmem:[%s5368_s1 + $0x18] sm:$0xff]  ;;  %v478_v2 = vld [vmem:[%s5368_s1] sm:$0xff]  ;;  %s2958_s19 = sshll.u32 %s3470_s28, 5  ;;  %v3402_v7 = vmov 0.0   ;;  %vm381_vm0 = vcmask 261120  }
  0x18   : > { %v3135_v3 = vpack.c.bf16 %v481_v1, %v479_v0  ;;  %v480_v4 = vld [vmem:[%s5368_s1 + $0x10] sm:$0xff]  ;;  %v483_v5 = vld [vmem:[%s5368_s1 + $0x28] sm:$0xff]  ;;  %v485_v6 = vld [vmem:[%s5368_s1 + $0x38] sm:$0xff]  ;;  %646 = vmatprep.mubr.f32.mxu0 %v3402_v7  ;;  %p299_p10 = scmp.lt.s32.totalorder %s2958_s19, 63  ;;  %s3767_s22 = sand.u32 1, %s3392_s25  }
  0x19   : > { %v3137_v8 = vpack.c.bf16 %v480_v4, %v478_v2  ;;  %v3139_v9 = vpack.c.bf16 %v485_v6, %v483_v5  ;;  %v482_v10 = vld [vmem:[%s5368_s1 + $0x20] sm:$0xff]  ;;  %v484_v11 = vld [vmem:[%s5368_s1 + $0x30] sm:$0xff]  ;;  %s2956_s23 = sshll.u32 %s3767_s22, 9  ;;  %s3134_s8 = sshll.u32 %s3470_s28, 13 }
  0x1a   : > { %3136 = vmatprep.subr.bf16.mxu0 %v3135_v3  ;;  %s5466_s19 = smov (!%p299_p10, %s2958_s19), 63  ;;  %v3141_v12 = vpack.c.bf16 %v484_v11, %v482_v10  ;;  %s3778_s29 = scalar_lea.vmem [#allocation2], %s2956_s23 }
  0x1b   : > { %3138 = vmatpush1.bf16.msra.mxu0 %v3137_v8  ;;  %s3523_s16 = sshll.u32 %s5466_s19, 3  ;;  %s5290_s14 = scalar_lea.hbm %s5371_s4, %s3134_s8 }
  0x1c   : > { %3140 = vmatprep.subr.bf16.mxu0 %v3139_v9  ;;  %s3529_s20 = scalar_lea.vmem %s5367_s0, %s3523_s16  ;;  %s4782_s18 = scalar_lea.vmem %s5373_s6, %s3523_s16 }
  0x1d   : > { %v317_v13 = vld [vmem:[%s3529_s20] sm:$0xff]  ;;  %v3533_v14 = vld [vmem:[%s3529_s20 + $0x38] sm:$0xff]  ;;  %v318_v18 = vld [vmem:[%s3529_s20 + $0x8] sm:$0xff]  ;;  %s5017_s23 = scalar_lea.vmem %s5372_s5, %s3523_s16  ;;  %s3124_s16 = sshll.u32 %s3470_s28, 8 }
  0x1e   : > { %v3536_v15 = vld [vmem:[%s3529_s20 + $0x40] sm:$0xff]  ;;  %v356_v16 = vmul.f32 %v3533_v14, %v3533_v14  ;;  %v3546_v19 = vld [vmem:[%s3529_s20 + $0x48] sm:$0xff]  ;;  %v3549_v20 = vld [vmem:[%s3529_s20 + $0x50] sm:$0xff]  ;;  %v349_v33 = vmul.f32 %v317_v13, %v317_v13  ;;  %v350_v39 = vmul.f32 %v318_v18, %v318_v18  ;;  %s2787_s15 = sshll.u32 %s3778_s29, 4  ;;  %s5293_s15 = int_to_ptr.vmem [resolvable:$true] %s2787_s15 }
  0x1f   : > { %3142 = vmatpush1.bf16.msra.mxu0 %v3141_v12  ;;  %v357_v17 = vmul.f32 %v3536_v15, %v3536_v15  ;;  %v3553_v22 = vld [vmem:[%s3529_s20 + $0x58] sm:$0xff]  ;;  %v358_v23 = vmul.f32 %v3546_v19, %v3546_v19  ;;  %v359_v24 = vmul.f32 %v3549_v20, %v3549_v20  ;;  %v319_v28 = vld [vmem:[%s3529_s20 + $0x10] sm:$0xff]  ;;  %v3567_v29 = vld [vmem:[%s3529_s20 + $0x60] sm:$0xff]  ;;  %s3306_s17 = scalar_lea.vmem %s5293_s15, 8192 }
  0x20   : > { %v403_v21 = vsel %vm381_vm0, %v356_v16, 0.0  ;;  %v360_v26 = vmul.f32 %v3553_v22, %v3553_v22  ;;  %v361_v31 = vmul.f32 %v3567_v29, %v3567_v29  ;;  %v320_v34 = vld [vmem:[%s3529_s20 + $0x18] sm:$0xff]  ;;  %v3577_v35 = vld [vmem:[%s3529_s20 + $0x68] sm:$0xff]  ;;  %v382_v38 = vsel %vm381_vm0, %v349_v33, 0.0  ;;  %v321_v40 = vld [vmem:[%s3529_s20 + $0x20] sm:$0xff]  ;;  %p3307_p11 = scmp.ne.s32.totalorder %s5293_s15, %s3306_s17 }
  0x21   : > { %404 = vadd.xlane.f32.xlu0 %v403_v21  ;;  %v406_v25 = vsel %vm381_vm0, %v357_v17, 0.0  ;;  %v409_v27 = vsel %vm381_vm0, %v358_v23, 0.0  ;;  %v412_v30 = vsel %vm381_vm0, %v359_v24, 0.0  ;;  %v362_v37 = vmul.f32 %v3577_v35, %v3577_v35  ;;  %v3587_v41 = vld [vmem:[%s3529_s20 + $0x70] sm:$0xff]  ;;  %v322_v46 = vld [vmem:[%s3529_s20 + $0x28] sm:$0xff]  ;;  %v3597_v47 = vld [vmem:[%s3529_s20 + $0x78] sm:$0xff] }
  0x22   : > { %2964 = vmatmul.mubr.msk.f32.vlgmr.msra.gmra.mrb[0].mxu0 %vm381_vm0, %v317_v13  ;;  %410 = vadd.xlane.f32.xlu1 %v409_v27  ;;  %v415_v32 = vsel %vm381_vm0, %v360_v26, 0.0  ;;  %v418_v36 = vsel %vm381_vm0, %v361_v31, 0.0  ;;  %v363_v43 = vmul.f32 %v3587_v41, %v3587_v41  ;;  %v385_v44 = vsel %vm381_vm0, %v350_v39, 0.0  ;;  %v323_v52 = vld [vmem:[%s3529_s20 + $0x30] sm:$0xff]  ;;  %v3607_v53 = vld [vmem:[%s3529_s20 + $0x80] sm:$0xff]  ;;  %v3616_v58 = vld [vmem:[%s3529_s20 + $0x88] sm:$0xff]  ;;  %p3308_p12 = pnand %p3307_p11, %p3487_p5 }
  0x23   : > { %652 = vmatprep.mubr.f32.mxu0 %v3402_v7  ;;  %v421_v42 = vsel %vm381_vm0, %v362_v37, 0.0  ;;  %v351_v45 = vmul.f32 %v319_v28, %v319_v28  ;;  %v364_v49 = vmul.f32 %v3597_v47, %v3597_v47  ;;  %v352_v51 = vmul.f32 %v320_v34, %v320_v34  ;;  %v3626_v63 = vld [vmem:[%s3529_s20 + $0x90] sm:$0xff]  ;;  %v3636_v4 = vld [vmem:[%s3529_s20 + $0x98] sm:$0xff]  ;;  %v3639_v5 = vld [vmem:[%s3529_s20 + $0xa0] sm:$0xff] }
  0x24   : > { %v424_v48 = vsel %vm381_vm0, %v363_v43, 0.0  ;;  %v365_v55 = vmul.f32 %v3607_v53, %v3607_v53  ;;  %v353_v57 = vmul.f32 %v321_v40, %v321_v40  ;;  %v366_v60 = vmul.f32 %v3616_v58, %v3616_v58  ;;  %v3651_v11 = vld [vmem:[%s3529_s20 + $0xa8] sm:$0xff]  ;;  %v3654_v12 = vld [vmem:[%s3529_s20 + $0xb0] sm:$0xff]  ;;  %v3666_v17 = vld [vmem:[%s3529_s20 + $0xb8] sm:$0xff]  ;;  %p3309_p13 = pneg %p3308_p12 }
  0x25   : > { %407 = vadd.xlane.f32.xlu0 %v406_v25  ;;  %v388_v50 = vsel %vm381_vm0, %v351_v45, 0.0  ;;  %v427_v54 = vsel %vm381_vm0, %v364_v49, 0.0  ;;  %v391_v56 = vsel %vm381_vm0, %v352_v51, 0.0  ;;  %v354_v62 = vmul.f32 %v322_v46, %v322_v46  ;;  %v343_v25 = vld [vmem:[%s3529_s20 + $0xd0] sm:$0xff]  ;;  %v346_v37 = vld [vmem:[%s3529_s20 + $0xe8] sm:$0xff] }
  0x26   : > { %2965 = vmatmul.mubr.msk.f32.gmra.mrb[2].mxu0 %vm381_vm0, %v318_v18  ;;  %413 = vadd.xlane.f32.xlu1 %v412_v30  ;;  %v430_v59 = vsel %vm381_vm0, %v365_v55, 0.0  ;;  %v394_v61 = vsel %vm381_vm0, %v353_v57, 0.0  ;;  %v433_v0 = vsel %vm381_vm0, %v366_v60, 0.0  ;;  %v367_v1 = vmul.f32 %v3626_v63, %v3626_v63  ;;  %v3669_v18 = vld [vmem:[%s3529_s20 + $0xc0] sm:$0xff] }
  0x27   : > { %658 = vmatprep.mubr.f32.mxu0 %v3402_v7  ;;  %v397_v2 = vsel %vm381_vm0, %v354_v62, 0.0  ;;  %v355_v3 = vmul.f32 %v323_v52, %v323_v52  ;;  %v368_v8 = vmul.f32 %v3636_v4, %v3636_v4  ;;  %v369_v10 = vmul.f32 %v3639_v5, %v3639_v5 }
  0x28   : > { %v436_v6 = vsel %vm381_vm0, %v367_v1, 0.0  ;;  %v371_v16 = vmul.f32 %v3654_v12, %v3654_v12  ;;  %v372_v21 = vmul.f32 %v3666_v17, %v3666_v17  ;;  %v373_v24 = vmul.f32 %v3669_v18, %v3669_v18 }
  0x29   : > { %416 = vadd.xlane.f32.xlu0 %v415_v32  ;;  %v400_v9 = vsel %vm381_vm0, %v355_v3, 0.0  ;;  %v439_v13 = vsel %vm381_vm0, %v368_v8, 0.0  ;;  %v375_v30 = vmul.f32 %v343_v25, %v343_v25  ;;  %v378_v39 = vmul.f32 %v346_v37, %v346_v37 }
  0x2a   : > { %2966 = vmatmul.mubr.msk.f32.gmra.mrb[4].mxu0 %vm381_vm0, %v319_v28  ;;  %419 = vadd.xlane.f32.xlu1 %v418_v36  ;;  %v448_v23 = vsel %vm381_vm0, %v371_v16, 0.0  ;;  %v451_v26 = vsel %vm381_vm0, %v372_v21, 0.0  ;;  %v454_v28 = vsel %vm381_vm0, %v373_v24, 0.0  ;;  %v5375_v49 = vlaneseq }
  0x2b   : > { %664 = vmatprep.mubr.f32.mxu0 %v3402_v7  ;;  %v460_v32 = vsel %vm381_vm0, %v375_v30, 0.0 }
  0x2c   : > { %v3755_v51 = vshrl.u32 %v5375_v49, 7 }
  0x2d   : > { %383 = vadd.xlane.f32.xlu0 %v382_v38 }
  0x2e   : > { %2967 = vmatmul.mubr.msk.f32.gmra.mrb[6].mxu0 %vm381_vm0, %v320_v34  ;;  %422 = vadd.xlane.f32.xlu1 %v421_v42  ;;  %v345_v34 = vld [vmem:[%s3529_s20 + $0xe0] sm:$0xff]  ;;  %5406 = vst [vmem:[#allocation8_spill] sm:$0xff] %v3755_v51 }
  0x2f   : > { %670 = vmatprep.mubr.f32.mxu0 %v3402_v7  ;;  %v377_v36 = vmul.f32 %v345_v34, %v345_v34 }
  0x31   : > { %386 = vadd.xlane.f32.xlu0 %v385_v44  ;;  %v466_v38 = vsel %vm381_vm0, %v377_v36, 0.0 }
  0x32   : > { %2968 = vmatmul.mubr.msk.f32.gmra.mrb[8].mxu0 %vm381_vm0, %v321_v40  ;;  %425 = vadd.xlane.f32.xlu1 %v424_v48  ;;  %v469_v40 = vsel %vm381_vm0, %v378_v39, 0.0 }
  0x33   : > { %676 = vmatprep.mubr.f32.mxu0 %v3402_v7 }
  0x35   : > { %389 = vadd.xlane.f32.xlu0 %v388_v50 }
  0x36   : > { %2969 = vmatmul.mubr.msk.f32.gmra.mrb[10].mxu0 %vm381_vm0, %v322_v46  ;;  %428 = vadd.xlane.f32.xlu1 %v427_v54  ;;  %v847_v54 = vsub.s32 1, %v3755_v51 }
  0x37   : > { %682 = vmatprep.mubr.f32.mxu0 %v3402_v7 }
  0x39   : > { %392 = vadd.xlane.f32.xlu0 %v391_v56 }
  0x3a   : > { %2970 = vmatmul.mubr.msk.f32.gmra.mrb[12].mxu0 %vm381_vm0, %v323_v52  ;;  %431 = vadd.xlane.f32.xlu1 %v430_v59 }
  0x3b   : > { %688 = vmatprep.mubr.f32.mxu0 %v3402_v7 }
  0x3d   : > { %395 = vadd.xlane.f32.xlu0 %v394_v61 }
  0x3e   : > { %2971 = vmatmul.mubr.msk.f32.gmra.mrb[14].mxu0 %vm381_vm0, %v3533_v14  ;;  %434 = vadd.xlane.f32.xlu1 %v433_v0  ;;  %v370_v14 = vmul.f32 %v3651_v11, %v3651_v11 }
  0x3f   : > { %694 = vmatprep.mubr.f32.mxu0 %v3402_v7 }
  0x41   : > { %398 = vadd.xlane.f32.xlu0 %v397_v2 }
  0x42   : > { %2972 = vmatmul.mubr.msk.f32.gmra.mrb[16].mxu0 %vm381_vm0, %v3536_v15  ;;  %437 = vadd.xlane.f32.xlu1 %v436_v6  ;;  %v442_v15 = vsel %vm381_vm0, %v369_v10, 0.0 }
  0x43   : > { %700 = vmatprep.mubr.f32.mxu0 %v3402_v7 }
  0x45   : > { %401 = vadd.xlane.f32.xlu0 %v400_v9 }
  0x46   : > { %2973 = vmatmul.mubr.msk.f32.gmra.mrb[18].mxu0 %vm381_vm0, %v3546_v19  ;;  %440 = vadd.xlane.f32.xlu1 %v439_v13  ;;  %v445_v19 = vsel %vm381_vm0, %v370_v14, 0.0 }
  0x47   : > { %706 = vmatprep.mubr.f32.mxu0 %v3402_v7 }
  0x49   : > { %443 = vadd.xlane.f32.xlu0 %v442_v15 }
  0x4a   : > { %2974 = vmatmul.mubr.msk.f32.gmra.mrb[20].mxu0 %vm381_vm0, %v3549_v20  ;;  %v342_v20 = vld [vmem:[%s3529_s20 + $0xc8] sm:$0xff]  ;;  %446 = vadd.xlane.f32.xlu1 %v445_v19 }
  0x4b   : > { %712 = vmatprep.mubr.f32.mxu0 %v3402_v7  ;;  %v374_v27 = vmul.f32 %v342_v20, %v342_v20 }
  0x4d   : > { %449 = vadd.xlane.f32.xlu0 %v448_v23  ;;  %v457_v31 = vsel %vm381_vm0, %v374_v27, 0.0 }
  0x4e   : > { %2975 = vmatmul.mubr.msk.f32.gmra.mrb[22].mxu0 %vm381_vm0, %v3553_v22  ;;  %452 = vadd.xlane.f32.xlu1 %v451_v26  ;;  %v344_v22 = vld [vmem:[%s3529_s20 + $0xd8] sm:$0xff] }
  0x4f   : > { %718 = vmatprep.mubr.f32.mxu0 %v3402_v7  ;;  %v376_v33 = vmul.f32 %v344_v22, %v344_v22 }
  0x51   : > { %455 = vadd.xlane.f32.xlu0 %v454_v28 }
  0x52   : > { %2976 = vmatmul.mubr.msk.f32.gmra.mrb[24].mxu0 %vm381_vm0, %v3567_v29  ;;  %458 = vadd.xlane.f32.xlu1 %v457_v31  ;;  %v463_v29 = vsel %vm381_vm0, %v376_v33, 0.0 }
  0x53   : > { %724 = vmatprep.mubr.f32.mxu0 %v3402_v7 }
  0x55   : > { %461 = vadd.xlane.f32.xlu0 %v460_v32 }
  0x56   : > { %2977 = vmatmul.mubr.msk.f32.gmra.mrb[26].mxu0 %vm381_vm0, %v3577_v35  ;;  %v347_v35 = vld [vmem:[%s3529_s20 + $0xf0] sm:$0xff] }
  0x57   : > { %730 = vmatprep.mubr.f32.mxu0 %v3402_v7  ;;  %v379_v42 = vmul.f32 %v347_v35, %v347_v35 }
  0x59   : > { %464 = vadd.xlane.f32.xlu0 %v463_v29  ;;  %v472_v43 = vsel %vm381_vm0, %v379_v42, 0.0 }
  0x5a   : > { %2978 = vmatmul.mubr.msk.f32.gmra.mrb[28].mxu0 %vm381_vm0, %v3587_v41  ;;  %v348_v41 = vld [vmem:[%s3529_s20 + $0xf8] sm:$0xff] }
  0x5b   : > { %736 = vmatprep.mubr.f32.mxu0 %v3402_v7  ;;  %v380_v44 = vmul.f32 %v348_v41, %v348_v41 }
  0x5d   : > { %467 = vadd.xlane.f32.xlu0 %v466_v38  ;;  %v475_v45 = vsel %vm381_vm0, %v380_v44, 0.0 }
  0x5e   : > { %2979 = vmatmul.mubr.msk.f32.gmra.mrb[30].mxu0 %vm381_vm0, %v3597_v47 }
  0x5f   : > { %742 = vmatprep.mubr.f32.mxu0 %v3402_v7 }
  0x61   : > { %470 = vadd.xlane.f32.xlu0 %v469_v40 }
  0x62   : > { %2980 = vmatmul.mubr.msk.f32.gmra.mrb[32].mxu0 %vm381_vm0, %v3607_v53  ;;  %v843_v53 = vsub.s32 0, %v3755_v51 }
  0x63   : > { %748 = vmatprep.mubr.f32.mxu0 %v3402_v7 }
  0x65   : > { %473 = vadd.xlane.f32.xlu0 %v472_v43 }
  0x66   : > { %2981 = vmatmul.mubr.msk.f32.gmra.mrb[34].mxu0 %vm381_vm0, %v3616_v58 }
  0x67   : > { %754 = vmatprep.mubr.f32.mxu0 %v3402_v7 }
  0x69   : > { %476 = vadd.xlane.f32.xlu0 %v475_v45 }
  0x6a   : > { %2982 = vmatmul.mubr.msk.f32.gmra.mrb[36].mxu0 %vm381_vm0, %v3626_v63 }
  0x6b   : > { %760 = vmatprep.mubr.f32.mxu0 %v3402_v7 }
  0x6e   : > { %2983 = vmatmul.mubr.msk.f32.gmra.mrb[38].mxu0 %vm381_vm0, %v3636_v4 }
  0x6f   : > { %766 = vmatprep.mubr.f32.mxu0 %v3402_v7 }
  0x72   : > { %2984 = vmatmul.mubr.msk.f32.gmra.mrb[40].mxu0 %vm381_vm0, %v3639_v5 }
  0x73   : > { %772 = vmatprep.mubr.f32.mxu0 %v3402_v7 }
  0x76   : > { %2985 = vmatmul.mubr.msk.f32.gmra.mrb[42].mxu0 %vm381_vm0, %v3651_v11 }
  0x77   : > { %778 = vmatprep.mubr.f32.mxu0 %v3402_v7 }
  0x7a   : > { %2986 = vmatmul.mubr.msk.f32.gmra.mrb[44].mxu0 %vm381_vm0, %v3654_v12 }
  0x7b   : > { %784 = vmatprep.mubr.f32.mxu0 %v3402_v7 }
  0x7e   : > { %2987 = vmatmul.mubr.msk.f32.gmra.mrb[46].mxu0 %vm381_vm0, %v3666_v17 }
  0x7f   : > { %790 = vmatprep.mubr.f32.mxu0 %v3402_v7 }
  0x82   : > { %2988 = vmatmul.mubr.msk.f32.gmra.mrb[48].mxu0 %vm381_vm0, %v3669_v18 }
  0x83   : > { %796 = vmatprep.mubr.f32.mxu0 %v3402_v7 }
  0x86   : > { %2989 = vmatmul.mubr.msk.f32.gmra.mrb[50].mxu0 %vm381_vm0, %v342_v20 }
  0x87   : > { %802 = vmatprep.mubr.f32.mxu0 %v3402_v7 }
  0x8a   : > { %2990 = vmatmul.mubr.msk.f32.gmra.mrb[52].mxu0 %vm381_vm0, %v343_v25 }
  0x8b   : > { %808 = vmatprep.mubr.f32.mxu0 %v3402_v7 }
  0x8e   : > { %2991 = vmatmul.mubr.msk.f32.gmra.mrb[54].mxu0 %vm381_vm0, %v344_v22 }
  0x8f   : > { %814 = vmatprep.mubr.f32.mxu0 %v3402_v7 }
  0x92   : > { %2992 = vmatmul.mubr.msk.f32.gmra.mrb[56].mxu0 %vm381_vm0, %v345_v34 }
  0x93   : > { %820 = vmatprep.mubr.f32.mxu0 %v3402_v7 }
  0x96   : > { %2993 = vmatmul.mubr.msk.f32.gmra.mrb[58].mxu0 %vm381_vm0, %v346_v37 }
  0x97   : > { %826 = vmatprep.mubr.f32.mxu0 %v3402_v7 }
  0x9a   : > { %2994 = vmatmul.mubr.msk.f32.gmra.mrb[60].mxu0 %vm381_vm0, %v347_v35 }
  0x9b   : > { %832 = vmatprep.mubr.f32.mxu0 %v3402_v7  ;;  %v839_v7 = vld [vmem:[%s5370_s3] sm:$0x3] }
  0x9c   : > { %v3762_v55 = vrot.slane %v839_v7, %v843_v53  ;;  %v3764_v56 = vrot.slane %v839_v7, %v847_v54 }
  0x9e   : > { %2995 = vmatmul.mubr.msk.f32.gmra.mrb[62].mxu0 %vm381_vm0, %v348_v41 }
  0xae   : > { %v3748_v46 = vpop.xlane.xlu0 %404 }
  0xaf   : > { %v411_v41 = vpop.xlane.xlu1 %410 }
  0xb2   : > { %v3750_v47 = vpop.xlane.xlu0 %407 }
  0xb6   : > { %v3752_v48 = vpop.xlane.xlu0 %416 }
  0xba   : > { %v384_v50 = vpop.xlane.xlu0 %383 }
  0xbb   : > { %v851_v58 = vadd.f32 %v3762_v55, %v384_v50  ;;  %v852_v60 = vadd.f32 %v3764_v56, %v384_v50 }
  0xbe   : > { %v387_v52 = vpop.xlane.xlu0 %386 }
  0xbf   : > { %v853_v2 = vadd.f32 %v3762_v55, %v387_v52  ;;  %v854_v5 = vadd.f32 %v3764_v56, %v387_v52 }
  0xc2   : > { %v390_v57 = vpop.xlane.xlu0 %389 }
  0xc3   : > { %v855_v12 = vadd.f32 %v3762_v55, %v390_v57  ;;  %v856_v15 = vadd.f32 %v3764_v56, %v390_v57 }
  0xc6   : > { %v393_v0 = vpop.xlane.xlu0 %392 }
  0xc7   : > { %v857_v24 = vadd.f32 %v3762_v55, %v393_v0  ;;  %v858_v26 = vadd.f32 %v3764_v56, %v393_v0 }
  0xca   : > { %v396_v16 = vpop.xlane.xlu0 %395 }
  0xcb   : > { %v859_v33 = vadd.f32 %v3762_v55, %v396_v16  ;;  %v860_v36 = vadd.f32 %v3764_v56, %v396_v16 }
  0xce   : > { %v399_v31 = vpop.xlane.xlu0 %398 }
  0xcf   : > { %v861_v42 = vadd.f32 %v3762_v55, %v399_v31  ;;  %v862_v45 = vadd.f32 %v3764_v56, %v399_v31  ;;  %v870_v31 = vadd.f32 %v3764_v56, %v411_v41 }
  0xd2   : > { %v402_v50 = vpop.xlane.xlu0 %401 }
  0xf5   : > { %v648_v59 = vpop.f32.mrb[0].mxu0 }
  0xf6   : > { %v915_v61 = vmul.f32 2.0, %v648_v59  ;;  %v650_v62 = vpop.f32.mrb[1].mxu0 }
  0xf7   : > { %v916_v63 = vmul.f32 2.0, %v650_v62 }
  0xf8   : > { %v3772_v1 = vsub.f32 %v851_v58, %v915_v61  ;;  %v863_v58 = vadd.f32 %v3762_v55, %v402_v50  ;;  %v864_v61 = vadd.f32 %v3764_v56, %v402_v50 }
  0xf9   : > { %v3775_v3 = vsub.f32 %v852_v60, %v916_v63  ;;  %v654_v4 = vpop.f32.mrb[2].mxu0 }
  0xfa   : > { %1043 = vst [vmem:[%s3778_s29] sm:$0xff] %v3772_v1  ;;  %v917_v6 = vmul.f32 2.0, %v654_v4  ;;  %v656_v8 = vpop.f32.mrb[3].mxu0  ;;  %v414_v4 = vpop.xlane.xlu1 %413 }
  0xfb   : > { %1044 = vst [vmem:[%s3778_s29 + $0x8] sm:$0xff] %v3775_v3  ;;  %v918_v9 = vmul.f32 2.0, %v656_v8  ;;  %v1107_v10 = vmin.f32 %v3772_v1, %v3775_v3  ;;  %v866_v8 = vadd.f32 %v3764_v56, %v3748_v46 }
  0xfc   : > { %v3786_v11 = vsub.f32 %v853_v2, %v917_v6 }
  0xfd   : > { %v3789_v13 = vsub.f32 %v854_v5, %v918_v9  ;;  %v660_v14 = vpop.f32.mrb[4].mxu0  ;;  %1108 = vmin.xlane.f32.xlu0 %v1107_v10  ;;  %v865_v5 = vadd.f32 %v3762_v55, %v3748_v46  ;;  %v867_v46 = vadd.f32 %v3762_v55, %v3750_v47 }
  0xfe   : > { %1045 = vst [vmem:[%s3778_s29 + $0x10] sm:$0xff] %v3786_v11  ;;  %v919_v17 = vmul.f32 2.0, %v660_v14  ;;  %v662_v18 = vpop.f32.mrb[5].mxu0 }
  0xff   : > { %1046 = vst [vmem:[%s3778_s29 + $0x18] sm:$0xff] %v3789_v13  ;;  %v920_v19 = vmul.f32 2.0, %v662_v18  ;;  %v1110_v21 = vmin.f32 %v3786_v11, %v3789_v13 }
 0x100   : > { %v3798_v23 = vsub.f32 %v855_v12, %v919_v17  ;;  %v420_v17 = vpop.xlane.xlu1 %419 }
 0x101   : > { %v3801_v20 = vsub.f32 %v856_v15, %v920_v19  ;;  %v666_v25 = vpop.f32.mrb[6].mxu0  ;;  %1111 = vmin.xlane.f32.xlu0 %v1110_v21  ;;  %v868_v19 = vadd.f32 %v3764_v56, %v3750_v47  ;;  %v869_v47 = vadd.f32 %v3762_v55, %v411_v41 }
 0x102   : > { %1047 = vst [vmem:[%s3778_s29 + $0x20] sm:$0xff] %v3798_v23  ;;  %v921_v27 = vmul.f32 2.0, %v666_v25  ;;  %v668_v28 = vpop.f32.mrb[7].mxu0 }
 0x103   : > { %1048 = vst [vmem:[%s3778_s29 + $0x28] sm:$0xff] %v3801_v20  ;;  %v922_v30 = vmul.f32 2.0, %v668_v28  ;;  %v1113_v22 = vmin.f32 %v3798_v23, %v3801_v20 }
 0x104   : > { %v3810_v32 = vsub.f32 %v857_v24, %v921_v27 }
 0x105   : > { %v3813_v34 = vsub.f32 %v858_v26, %v922_v30  ;;  %v672_v29 = vpop.f32.mrb[8].mxu0  ;;  %1114 = vmin.xlane.f32.xlu0 %v1113_v22 }
 0x106   : > { %1049 = vst [vmem:[%s3778_s29 + $0x30] sm:$0xff] %v3810_v32  ;;  %v923_v37 = vmul.f32 2.0, %v672_v29  ;;  %v674_v38 = vpop.f32.mrb[9].mxu0  ;;  %v423_v29 = vpop.xlane.xlu1 %422 }
 0x107   : > { %1050 = vst [vmem:[%s3778_s29 + $0x38] sm:$0xff] %v3813_v34  ;;  %v924_v39 = vmul.f32 2.0, %v674_v38  ;;  %v1116_v35 = vmin.f32 %v3810_v32, %v3813_v34 }
 0x108   : > { %v3822_v40 = vsub.f32 %v859_v33, %v923_v37 }
 0x109   : > { %v3825_v43 = vsub.f32 %v860_v36, %v924_v39  ;;  %v678_v44 = vpop.f32.mrb[10].mxu0  ;;  %1117 = vmin.xlane.f32.xlu0 %v1116_v35 }
 0x10a   : > { %1051 = vst [vmem:[%s3778_s29 + $0x40] sm:$0xff] %v3822_v40  ;;  %v925_v52 = vmul.f32 2.0, %v678_v44  ;;  %v680_v53 = vpop.f32.mrb[11].mxu0  ;;  %v872_v44 = vadd.f32 %v3764_v56, %v414_v4 }
 0x10b   : > { %1052 = vst [vmem:[%s3778_s29 + $0x48] sm:$0xff] %v3825_v43  ;;  %v926_v7 = vmul.f32 2.0, %v680_v53  ;;  %v1119_v54 = vmin.f32 %v3822_v40, %v3825_v43 }
 0x10c   : > { %v3834_v57 = vsub.f32 %v861_v42, %v925_v52  ;;  %v871_v42 = vadd.f32 %v3762_v55, %v414_v4 }
 0x10d   : > { %v3837_v59 = vsub.f32 %v862_v45, %v926_v7  ;;  %v684_v60 = vpop.f32.mrb[12].mxu0  ;;  %1120 = vmin.xlane.f32.xlu0 %v1119_v54  ;;  %v426_v54 = vpop.xlane.xlu1 %425 }
 0x10e   : > { %1053 = vst [vmem:[%s3778_s29 + $0x50] sm:$0xff] %v3834_v57  ;;  %v927_v62 = vmul.f32 2.0, %v684_v60  ;;  %v686_v63 = vpop.f32.mrb[13].mxu0 }
 0x10f   : > { %1054 = vst [vmem:[%s3778_s29 + $0x58] sm:$0xff] %v3837_v59  ;;  %v928_v0 = vmul.f32 2.0, %v686_v63  ;;  %v1122_v2 = vmin.f32 %v3834_v57, %v3837_v59 }
 0x110   : > { %v3848_v6 = vsub.f32 %v863_v58, %v927_v62  ;;  %v873_v58 = vadd.f32 %v3762_v55, %v3752_v48 }
 0x111   : > { %v3852_v9 = vsub.f32 %v864_v61, %v928_v0  ;;  %v690_v10 = vpop.f32.mrb[14].mxu0  ;;  %1123 = vmin.xlane.f32.xlu0 %v1122_v2  ;;  %v874_v61 = vadd.f32 %v3764_v56, %v3752_v48  ;;  %v875_v48 = vadd.f32 %v3762_v55, %v420_v17 }
 0x112   : > { %1055 = vst [vmem:[%s3778_s29 + $0x60] sm:$0xff] %v3848_v6  ;;  %v929_v12 = vmul.f32 2.0, %v690_v10  ;;  %v692_v14 = vpop.f32.mrb[15].mxu0 }
 0x113   : > { %1056 = vst [vmem:[%s3778_s29 + $0x68] sm:$0xff] %v3852_v9  ;;  %v930_v15 = vmul.f32 2.0, %v692_v14  ;;  %v1125_v16 = vmin.f32 %v3848_v6, %v3852_v9 }
 0x114   : > { %v3862_v18 = vsub.f32 %v865_v5, %v929_v12  ;;  %v876_v12 = vadd.f32 %v3764_v56, %v420_v17 }
 0x115   : > { %v3866_v21 = vsub.f32 %v866_v8, %v930_v15  ;;  %v696_v24 = vpop.f32.mrb[16].mxu0  ;;  %1126 = vmin.xlane.f32.xlu0 %v1125_v16  ;;  %v429_v15 = vpop.xlane.xlu1 %428 }
 0x116   : > { %1057 = vst [vmem:[%s3778_s29 + $0x70] sm:$0xff] %v3862_v18  ;;  %v931_v25 = vmul.f32 2.0, %v696_v24  ;;  %v698_v26 = vpop.f32.mrb[17].mxu0 }
 0x117   : > { %1058 = vst [vmem:[%s3778_s29 + $0x78] sm:$0xff] %v3866_v21  ;;  %v932_v27 = vmul.f32 2.0, %v698_v26  ;;  %v1128_v28 = vmin.f32 %v3862_v18, %v3866_v21  ;;  %v877_v26 = vadd.f32 %v3762_v55, %v423_v29 }
 0x118   : > { %v3874_v30 = vsub.f32 %v867_v46, %v931_v25 }
 0x119   : > { %v3877_v22 = vsub.f32 %v868_v19, %v932_v27  ;;  %1129 = vmin.xlane.f32.xlu1 %v1128_v28  ;;  %v702_v33 = vpop.f32.mrb[18].mxu0  ;;  %v878_v28 = vadd.f32 %v3764_v56, %v423_v29 }
 0x11a   : > { %1059 = vst [vmem:[%s3778_s29 + $0x80] sm:$0xff] %v3874_v30  ;;  %v933_v36 = vmul.f32 2.0, %v702_v33  ;;  %v704_v37 = vpop.f32.mrb[19].mxu0 }
 0x11b   : > { %1060 = vst [vmem:[%s3778_s29 + $0x88] sm:$0xff] %v3877_v22  ;;  %v934_v38 = vmul.f32 2.0, %v704_v37  ;;  %v1131_v39 = vmin.f32 %v3874_v30, %v3877_v22  ;;  %v432_v37 = vpop.xlane.xlu1 %431 }
 0x11c   : > { %v3886_v35 = vsub.f32 %v869_v47, %v933_v36 }
 0x11d   : > { %v3889_v41 = vsub.f32 %v870_v31, %v934_v38  ;;  %1132 = vmin.xlane.f32.xlu1 %v1131_v39  ;;  %v708_v45 = vpop.f32.mrb[20].mxu0  ;;  %v879_v39 = vadd.f32 %v3762_v55, %v426_v54 }
 0x11e   : > { %1061 = vst [vmem:[%s3778_s29 + $0x90] sm:$0xff] %v3886_v35  ;;  %v935_v50 = vmul.f32 2.0, %v708_v45  ;;  %v710_v52 = vpop.f32.mrb[21].mxu0 }
 0x11f   : > { %1062 = vst [vmem:[%s3778_s29 + $0x98] sm:$0xff] %v3889_v41  ;;  %v936_v53 = vmul.f32 2.0, %v710_v52  ;;  %v1134_v7 = vmin.f32 %v3886_v35, %v3889_v41 }
 0x120   : > { %v3900_v60 = vsub.f32 %v871_v42, %v935_v50 }
 0x121   : > { %v3904_v62 = vsub.f32 %v872_v44, %v936_v53  ;;  %1135 = vmin.xlane.f32.xlu1 %v1134_v7  ;;  %v714_v63 = vpop.f32.mrb[22].mxu0  ;;  %v880_v44 = vadd.f32 %v3764_v56, %v426_v54 }
 0x122   : > { %1063 = vst [vmem:[%s3778_s29 + $0xa0] sm:$0xff] %v3900_v60  ;;  %v937_v0 = vmul.f32 2.0, %v714_v63  ;;  %v716_v2 = vpop.f32.mrb[23].mxu0  ;;  %v882_v63 = vadd.f32 %v3764_v56, %v429_v15 }
 0x123   : > { %1064 = vst [vmem:[%s3778_s29 + $0xa8] sm:$0xff] %v3904_v62  ;;  %v938_v4 = vmul.f32 2.0, %v716_v2  ;;  %v1137_v5 = vmin.f32 %v3900_v60, %v3904_v62 }
 0x124   : > { %v3912_v8 = vsub.f32 %v873_v58, %v937_v0  ;;  %v881_v58 = vadd.f32 %v3762_v55, %v429_v15  ;;  %v435_v0 = vpop.xlane.xlu1 %434 }
 0x125   : > { %v3915_v10 = vsub.f32 %v874_v61, %v938_v4  ;;  %1138 = vmin.xlane.f32.xlu1 %v1137_v5  ;;  %v720_v14 = vpop.f32.mrb[24].mxu0 }
 0x126   : > { %1065 = vst [vmem:[%s3778_s29 + $0xb0] sm:$0xff] %v3912_v8  ;;  %v939_v16 = vmul.f32 2.0, %v720_v14  ;;  %v722_v46 = vpop.f32.mrb[25].mxu0  ;;  %v883_v14 = vadd.f32 %v3762_v55, %v432_v37 }
 0x127   : > { %1066 = vst [vmem:[%s3778_s29 + $0xb8] sm:$0xff] %v3915_v10  ;;  %v940_v19 = vmul.f32 2.0, %v722_v46  ;;  %v1140_v24 = vmin.f32 %v3912_v8, %v3915_v10  ;;  %v884_v46 = vadd.f32 %v3764_v56, %v432_v37  ;;  %v886_v37 = vadd.f32 %v3764_v56, %v435_v0 }
 0x128   : > { %v3924_v25 = vsub.f32 %v875_v48, %v939_v16 }
 0x129   : > { %v3927_v17 = vsub.f32 %v876_v12, %v940_v19  ;;  %1141 = vmin.xlane.f32.xlu1 %v1140_v24  ;;  %v726_v27 = vpop.f32.mrb[26].mxu0 }
 0x12a   : > { %1067 = vst [vmem:[%s3778_s29 + $0xc0] sm:$0xff] %v3924_v25  ;;  %v941_v47 = vmul.f32 2.0, %v726_v27  ;;  %v728_v31 = vpop.f32.mrb[27].mxu0 }
 0x12b   : > { %1068 = vst [vmem:[%s3778_s29 + $0xc8] sm:$0xff] %v3927_v17  ;;  %v942_v33 = vmul.f32 2.0, %v728_v31  ;;  %v1143_v36 = vmin.f32 %v3924_v25, %v3927_v17  ;;  %v885_v31 = vadd.f32 %v3762_v55, %v435_v0 }
 0x12c   : > { %v3936_v38 = vsub.f32 %v877_v26, %v941_v47 }
 0x12d   : > { %v3939_v42 = vsub.f32 %v878_v28, %v942_v33  ;;  %1144 = vmin.xlane.f32.xlu1 %v1143_v36  ;;  %v732_v29 = vpop.f32.mrb[28].mxu0  ;;  %v438_v28 = vpop.xlane.xlu1 %437 }
 0x12e   : > { %1069 = vst [vmem:[%s3778_s29 + $0xd0] sm:$0xff] %v3936_v38  ;;  %v943_v45 = vmul.f32 2.0, %v732_v29  ;;  %v734_v50 = vpop.f32.mrb[29].mxu0 }
 0x12f   : > { %1070 = vst [vmem:[%s3778_s29 + $0xd8] sm:$0xff] %v3939_v42  ;;  %v944_v52 = vmul.f32 2.0, %v734_v50  ;;  %v1146_v53 = vmin.f32 %v3936_v38, %v3939_v42 }
 0x130   : > { %v3948_v7 = vsub.f32 %v879_v39, %v943_v45 }
 0x131   : > { %v3951_v61 = vsub.f32 %v880_v44, %v944_v52  ;;  %1147 = vmin.xlane.f32.xlu1 %v1146_v53  ;;  %v738_v54 = vpop.f32.mrb[30].mxu0  ;;  %v887_v52 = vadd.f32 %v3762_v55, %v438_v28 }
 0x132   : > { %1071 = vst [vmem:[%s3778_s29 + $0xe0] sm:$0xff] %v3948_v7  ;;  %v945_v2 = vmul.f32 2.0, %v738_v54  ;;  %v740_v4 = vpop.f32.mrb[31].mxu0  ;;  %v888_v54 = vadd.f32 %v3764_v56, %v438_v28 }
 0x133   : > { %1072 = vst [vmem:[%s3778_s29 + $0xe8] sm:$0xff] %v3951_v61  ;;  %v946_v5 = vmul.f32 2.0, %v740_v4  ;;  %v1149_v48 = vmin.f32 %v3948_v7, %v3951_v61 }
 0x134   : > { %v3960_v12 = vsub.f32 %v881_v58, %v945_v2 }
 0x135   : > { %v3963_v16 = vsub.f32 %v882_v63, %v946_v5  ;;  %1150 = vmin.xlane.f32.xlu1 %v1149_v48  ;;  %v744_v15 = vpop.f32.mrb[32].mxu0  ;;  %v441_v63 = vpop.xlane.xlu1 %440 }
 0x136   : > { %1073 = vst [vmem:[%s3778_s29 + $0xf0] sm:$0xff] %v3960_v12  ;;  %v947_v19 = vmul.f32 2.0, %v744_v15  ;;  %v746_v24 = vpop.f32.mrb[33].mxu0 }
 0x137   : > { %1074 = vst [vmem:[%s3778_s29 + $0xf8] sm:$0xff] %v3963_v16  ;;  %v948_v26 = vmul.f32 2.0, %v746_v24  ;;  %v1152_v27 = vmin.f32 %v3960_v12, %v3963_v16  ;;  %v444_v24 = vpop.xlane.xlu0 %443 }
 0x138   : > { %v3972_v47 = vsub.f32 %v883_v14, %v947_v19  ;;  %v889_v14 = vadd.f32 %v3762_v55, %v441_v63  ;;  %v890_v19 = vadd.f32 %v3764_v56, %v441_v63 }
 0x139   : > { %v3975_v33 = vsub.f32 %v884_v46, %v948_v26  ;;  %1153 = vmin.xlane.f32.xlu1 %v1152_v27  ;;  %v750_v36 = vpop.f32.mrb[34].mxu0 }
 0x13a   : > { %1075 = vst [vmem:[%s3778_s29 + $0x100] sm:$0xff] %v3972_v47  ;;  %v949_v39 = vmul.f32 2.0, %v750_v36  ;;  %v752_v29 = vpop.f32.mrb[35].mxu0 }
 0x13b   : > { %1076 = vst [vmem:[%s3778_s29 + $0x108] sm:$0xff] %v3975_v33  ;;  %v950_v44 = vmul.f32 2.0, %v752_v29  ;;  %v1155_v45 = vmin.f32 %v3972_v47, %v3975_v33 }
 0x13c   : > { %v3984_v50 = vsub.f32 %v885_v31, %v949_v39 }
 0x13d   : > { %v3987_v53 = vsub.f32 %v886_v37, %v950_v44  ;;  %1156 = vmin.xlane.f32.xlu1 %v1155_v45  ;;  %v756_v58 = vpop.f32.mrb[36].mxu0  ;;  %v891_v37 = vadd.f32 %v3762_v55, %v444_v24  ;;  %v892_v44 = vadd.f32 %v3764_v56, %v444_v24  ;;  %v447_v45 = vpop.xlane.xlu1 %446 }
 0x13e   : > { %1077 = vst [vmem:[%s3778_s29 + $0x110] sm:$0xff] %v3984_v50  ;;  %v951_v0 = vmul.f32 2.0, %v756_v58  ;;  %v758_v2 = vpop.f32.mrb[37].mxu0 }
 0x13f   : > { %1078 = vst [vmem:[%s3778_s29 + $0x118] sm:$0xff] %v3987_v53  ;;  %v952_v4 = vmul.f32 2.0, %v758_v2  ;;  %v1158_v5 = vmin.f32 %v3984_v50, %v3987_v53 }
 0x140   : > { %v3996_v48 = vsub.f32 %v887_v52, %v951_v0  ;;  %v450_v0 = vpop.xlane.xlu0 %449 }
 0x141   : > { %v3999_v15 = vsub.f32 %v888_v54, %v952_v4  ;;  %1159 = vmin.xlane.f32.xlu1 %v1158_v5  ;;  %v762_v46 = vpop.f32.mrb[38].mxu0  ;;  %v893_v4 = vadd.f32 %v3762_v55, %v447_v45 }
 0x142   : > { %1079 = vst [vmem:[%s3778_s29 + $0x120] sm:$0xff] %v3996_v48  ;;  %v953_v26 = vmul.f32 2.0, %v762_v46  ;;  %v764_v27 = vpop.f32.mrb[39].mxu0  ;;  %v894_v46 = vadd.f32 %v3764_v56, %v447_v45  ;;  %v896_v45 = vadd.f32 %v3764_v56, %v450_v0 }
 0x143   : > { %1080 = vst [vmem:[%s3778_s29 + $0x128] sm:$0xff] %v3999_v15  ;;  %v954_v28 = vmul.f32 2.0, %v764_v27  ;;  %v1161_v31 = vmin.f32 %v3996_v48, %v3999_v15 }
 0x144   : > { %v4008_v36 = vsub.f32 %v889_v14, %v953_v26 }
 0x145   : > { %v4011_v39 = vsub.f32 %v890_v19, %v954_v28  ;;  %1162 = vmin.xlane.f32.xlu1 %v1161_v31  ;;  %v768_v29 = vpop.f32.mrb[40].mxu0  ;;  %v456_v28 = vpop.xlane.xlu0 %455 }
 0x146   : > { %1081 = vst [vmem:[%s3778_s29 + $0x130] sm:$0xff] %v4008_v36  ;;  %v955_v52 = vmul.f32 2.0, %v768_v29  ;;  %v770_v58 = vpop.f32.mrb[41].mxu0 }
 0x147   : > { %1082 = vst [vmem:[%s3778_s29 + $0x138] sm:$0xff] %v4011_v39  ;;  %v956_v54 = vmul.f32 2.0, %v770_v58  ;;  %v1164_v63 = vmin.f32 %v4008_v36, %v4011_v39 }
 0x148   : > { %v4020_v2 = vsub.f32 %v891_v37, %v955_v52  ;;  %v895_v37 = vadd.f32 %v3762_v55, %v450_v0  ;;  %v453_v52 = vpop.xlane.xlu1 %452 }
 0x149   : > { %v4023_v5 = vsub.f32 %v892_v44, %v956_v54  ;;  %1165 = vmin.xlane.f32.xlu1 %v1164_v63  ;;  %v774_v14 = vpop.f32.mrb[42].mxu0 }
 0x14a   : > { %1083 = vst [vmem:[%s3778_s29 + $0x140] sm:$0xff] %v4020_v2  ;;  %v957_v19 = vmul.f32 2.0, %v774_v14  ;;  %v776_v24 = vpop.f32.mrb[43].mxu0  ;;  %v462_v14 = vpop.xlane.xlu0 %461 }
 0x14b   : > { %1084 = vst [vmem:[%s3778_s29 + $0x148] sm:$0xff] %v4023_v5  ;;  %v958_v26 = vmul.f32 2.0, %v776_v24  ;;  %v1167_v27 = vmin.f32 %v4020_v2, %v4023_v5 }
 0x14c   : > { %v4032_v31 = vsub.f32 %v893_v4, %v957_v19  ;;  %v897_v19 = vadd.f32 %v3762_v55, %v453_v52 }
 0x14d   : > { %v4035_v29 = vsub.f32 %v894_v46, %v958_v26  ;;  %v780_v44 = vpop.f32.mrb[44].mxu0  ;;  %1168 = vmin.xlane.f32.xlu0 %v1167_v27  ;;  %v898_v26 = vadd.f32 %v3764_v56, %v453_v52  ;;  %v900_v52 = vadd.f32 %v3764_v56, %v456_v28 }
 0x14e   : > { %1085 = vst [vmem:[%s3778_s29 + $0x150] sm:$0xff] %v4032_v31  ;;  %v959_v58 = vmul.f32 2.0, %v780_v44  ;;  %v782_v54 = vpop.f32.mrb[45].mxu0 }
 0x14f   : > { %1086 = vst [vmem:[%s3778_s29 + $0x158] sm:$0xff] %v4035_v29  ;;  %v960_v63 = vmul.f32 2.0, %v782_v54  ;;  %v1170_v4 = vmin.f32 %v4032_v31, %v4035_v29 }
 0x150   : > { %v4044_v46 = vsub.f32 %v895_v37, %v959_v58 }
 0x151   : > { %v4047_v24 = vsub.f32 %v896_v45, %v960_v63  ;;  %1171 = vmin.xlane.f32.xlu1 %v1170_v4  ;;  %v786_v0 = vpop.f32.mrb[46].mxu0  ;;  %v899_v45 = vadd.f32 %v3762_v55, %v456_v28  ;;  %v459_v63 = vpop.xlane.xlu1 %458 }
 0x152   : > { %5407 = vst [vmem:[#allocation9_spill] sm:$0xff] %v4044_v46  ;;  %1087 = vst [vmem:[%s3778_s29 + $0x160] sm:$0xff] %v4044_v46  ;;  %v961_v27 = vmul.f32 2.0, %v786_v0  ;;  %v788_v44 = vpop.f32.mrb[47].mxu0  ;;  %v465_v0 = vpop.xlane.xlu0 %464 }
 0x153   : > { %5408 = vst [vmem:[#allocation10_spill] sm:$0xff] %v4047_v24  ;;  %1088 = vst [vmem:[%s3778_s29 + $0x168] sm:$0xff] %v4047_v24  ;;  %v962_v54 = vmul.f32 2.0, %v788_v44  ;;  %v1173_v37 = vmin.f32 %v4044_v46, %v4047_v24 }
 0x154   : > { %v4056_v58 = vsub.f32 %v897_v19, %v961_v27 }
 0x155   : > { %v4059_v4 = vsub.f32 %v898_v26, %v962_v54  ;;  %v792_v49 = vpop.f32.mrb[48].mxu0  ;;  %1174 = vmin.xlane.f32.xlu0 %v1173_v37  ;;  %v901_v26 = vadd.f32 %v3762_v55, %v459_v63  ;;  %v902_v37 = vadd.f32 %v3764_v56, %v459_v63  ;;  %v904_v63 = vadd.f32 %v3764_v56, %v462_v14 }
 0x156   : > { %1089 = vst [vmem:[%s3778_s29 + $0x170] sm:$0xff] %v4056_v58  ;;  %v963_v44 = vmul.f32 2.0, %v792_v49  ;;  %v794_v51 = vpop.f32.mrb[49].mxu0 }
 0x157   : > { %5409 = vst [vmem:[#allocation11_spill] sm:$0xff] %v4059_v4  ;;  %1090 = vst [vmem:[%s3778_s29 + $0x178] sm:$0xff] %v4059_v4  ;;  %v964_v19 = vmul.f32 2.0, %v794_v51  ;;  %v1176_v27 = vmin.f32 %v4056_v58, %v4059_v4 }
 0x158   : > { %v4068_v24 = vsub.f32 %v899_v45, %v963_v44  ;;  %v468_v44 = vpop.xlane.xlu0 %467 }
 0x159   : > { %v4071_v54 = vsub.f32 %v900_v52, %v964_v19  ;;  %1177 = vmin.xlane.f32.xlu1 %v1176_v27  ;;  %v798_v28 = vpop.f32.mrb[50].mxu0  ;;  %v903_v52 = vadd.f32 %v3762_v55, %v462_v14 }
 0x15a   : > { %5410 = vst [vmem:[#allocation12_spill] sm:$0xff] %v4068_v24  ;;  %1091 = vst [vmem:[%s3778_s29 + $0x180] sm:$0xff] %v4068_v24  ;;  %v965_v49 = vmul.f32 2.0, %v798_v28  ;;  %v800_v46 = vpop.f32.mrb[51].mxu0 }
 0x15b   : > { %5411 = vst [vmem:[#allocation13_spill] sm:$0xff] %v4071_v54  ;;  %1092 = vst [vmem:[%s3778_s29 + $0x188] sm:$0xff] %v4071_v54  ;;  %v966_v51 = vmul.f32 2.0, %v800_v46  ;;  %v1179_v45 = vmin.f32 %v4068_v24, %v4071_v54 }
 0x15c   : > { %v4080_v4 = vsub.f32 %v901_v26, %v965_v49  ;;  %v471_v24 = vpop.xlane.xlu0 %470 }
 0x15d   : > { %v4083_v19 = vsub.f32 %v902_v37, %v966_v51  ;;  %v804_v27 = vpop.f32.mrb[52].mxu0  ;;  %1180 = vmin.xlane.f32.xlu0 %v1179_v45  ;;  %v905_v37 = vadd.f32 %v3762_v55, %v465_v0  ;;  %v906_v45 = vadd.f32 %v3764_v56, %v465_v0  ;;  %v908_v0 = vadd.f32 %v3764_v56, %v468_v44 }
 0x15e   : > { %5412 = vst [vmem:[#allocation14_spill] sm:$0xff] %v4080_v4  ;;  %1093 = vst [vmem:[%s3778_s29 + $0x190] sm:$0xff] %v4080_v4  ;;  %v967_v28 = vmul.f32 2.0, %v804_v27  ;;  %v806_v46 = vpop.f32.mrb[53].mxu0 }
 0x15f   : > { %5413 = vst [vmem:[#allocation15_spill] sm:$0xff] %v4083_v19  ;;  %1094 = vst [vmem:[%s3778_s29 + $0x198] sm:$0xff] %v4083_v19  ;;  %v968_v54 = vmul.f32 2.0, %v806_v46  ;;  %v1182_v26 = vmin.f32 %v4080_v4, %v4083_v19 }
 0x160   : > { %v4092_v49 = vsub.f32 %v903_v52, %v967_v28 }
 0x161   : > { %v4095_v51 = vsub.f32 %v904_v63, %v968_v54  ;;  %1183 = vmin.xlane.f32.xlu1 %v1182_v26  ;;  %v810_v14 = vpop.f32.mrb[54].mxu0  ;;  %v907_v54 = vadd.f32 %v3762_v55, %v468_v44  ;;  %v910_v44 = vadd.f32 %v3764_v56, %v471_v24 }
 0x162   : > { %1095 = vst [vmem:[%s3778_s29 + $0x1a0] sm:$0xff] %v4092_v49  ;;  %v969_v27 = vmul.f32 2.0, %v810_v14  ;;  %v812_v46 = vpop.f32.mrb[55].mxu0 }
 0x163   : > { %5414 = vst [vmem:[#allocation16_spill] sm:$0xff] %v4095_v51  ;;  %1096 = vst [vmem:[%s3778_s29 + $0x1a8] sm:$0xff] %v4095_v51  ;;  %v970_v19 = vmul.f32 2.0, %v812_v46  ;;  %v1185_v52 = vmin.f32 %v4092_v49, %v4095_v51 }
 0x164   : > { %v4104_v28 = vsub.f32 %v905_v37, %v969_v27  ;;  %v474_v27 = vpop.xlane.xlu0 %473 }
 0x165   : > { %v4107_v63 = vsub.f32 %v906_v45, %v970_v19  ;;  %v816_v26 = vpop.f32.mrb[56].mxu0  ;;  %1186 = vmin.xlane.f32.xlu0 %v1185_v52  ;;  %v909_v19 = vadd.f32 %v3762_v55, %v471_v24  ;;  %v912_v24 = vadd.f32 %v3764_v56, %v474_v27 }
 0x166   : > { %5415 = vst [vmem:[#allocation17_spill] sm:$0xff] %v4104_v28  ;;  %1097 = vst [vmem:[%s3778_s29 + $0x1b0] sm:$0xff] %v4104_v28  ;;  %v971_v14 = vmul.f32 2.0, %v816_v26  ;;  %v818_v4 = vpop.f32.mrb[57].mxu0 }
 0x167   : > { %5416 = vst [vmem:[#allocation18_spill] sm:$0xff] %v4107_v63  ;;  %1098 = vst [vmem:[%s3778_s29 + $0x1b8] sm:$0xff] %v4107_v63  ;;  %v972_v46 = vmul.f32 2.0, %v818_v4  ;;  %v1188_v37 = vmin.f32 %v4104_v28, %v4107_v63 }
 0x168   : > { %v4116_v51 = vsub.f32 %v907_v54, %v971_v14  ;;  %v477_v28 = vpop.xlane.xlu0 %476 }
 0x169   : > { %v4119_v45 = vsub.f32 %v908_v0, %v972_v46  ;;  %v822_v52 = vpop.f32.mrb[58].mxu0  ;;  %1189 = vmin.xlane.f32.xlu1 %v1188_v37  ;;  %v911_v0 = vadd.f32 %v3762_v55, %v474_v27 }
 0x16a   : > { %5417 = vst [vmem:[#allocation19_spill] sm:$0xff] %v4116_v51  ;;  %1099 = vst [vmem:[%s3778_s29 + $0x1c0] sm:$0xff] %v4116_v51  ;;  %v973_v26 = vmul.f32 2.0, %v822_v52  ;;  %v824_v4 = vpop.f32.mrb[59].mxu0 }
 0x16b   : > { %5418 = vst [vmem:[#allocation20_spill] sm:$0xff] %v4119_v45  ;;  %1100 = vst [vmem:[%s3778_s29 + $0x1c8] sm:$0xff] %v4119_v45  ;;  %v974_v63 = vmul.f32 2.0, %v824_v4  ;;  %v1191_v54 = vmin.f32 %v4116_v51, %v4119_v45 }
 0x16c   : > { %v4128_v14 = vsub.f32 %v909_v19, %v973_v26 }
 0x16d   : > { %v4131_v46 = vsub.f32 %v910_v44, %v974_v63  ;;  %v828_v37 = vpop.f32.mrb[60].mxu0  ;;  %1192 = vmin.xlane.f32.xlu1 %v1191_v54  ;;  %v913_v44 = vadd.f32 %v3762_v55, %v477_v28  ;;  %v914_v54 = vadd.f32 %v3764_v56, %v477_v28  ;;  %v5420_v56 = vlaneseq }
 0x16e   : > { %1101 = vst [vmem:[%s3778_s29 + $0x1d0] sm:$0xff] %v4128_v14  ;;  %v975_v52 = vmul.f32 2.0, %v828_v37  ;;  %v830_v4 = vpop.f32.mrb[61].mxu0 }
 0x16f   : > { %5419 = vst [vmem:[#allocation21_spill] sm:$0xff] %v4131_v46  ;;  %1102 = vst [vmem:[%s3778_s29 + $0x1d8] sm:$0xff] %v4131_v46  ;;  %v976_v45 = vmul.f32 2.0, %v830_v4  ;;  %v1194_v19 = vmin.f32 %v4128_v14, %v4131_v46  ;;  %v4163_v28 = vand.u32 127, %v5420_v56 }
 0x170   : > { %v4140_v63 = vsub.f32 %v911_v0, %v975_v52 }
 0x171   : > { %v4143_v26 = vsub.f32 %v912_v24, %v976_v45  ;;  %v834_v27 = vpop.f32.mrb[62].mxu0  ;;  %1195 = vmin.xlane.f32.xlu1 %v1194_v19  ;;  %v4166_v45 = vadd.s32 128, %v4163_v28 }
 0x172   : > { %1103 = vst [vmem:[%s3778_s29 + $0x1e0] sm:$0xff] %v4140_v63  ;;  %v977_v37 = vmul.f32 2.0, %v834_v27  ;;  %v836_v51 = vpop.f32.mrb[63].mxu0 }
 0x173   : > { %1104 = vst [vmem:[%s3778_s29 + $0x1e8] sm:$0xff] %v4143_v26  ;;  %v978_v4 = vmul.f32 2.0, %v836_v51  ;;  %v1197_v0 = vmin.f32 %v4140_v63, %v4143_v26 }
 0x174   : > { %v4152_v52 = vsub.f32 %v913_v44, %v977_v37 }
 0x175   : > { %v4154_v46 = vsub.f32 %v914_v54, %v978_v4  ;;  %1198 = vmin.xlane.f32.xlu1 %v1197_v0 }
 0x176   : > { %1105 = vst [vmem:[%s3778_s29 + $0x1f0] sm:$0xff] %v4152_v52 }
 0x177   : > { %1106 = vst [vmem:[%s3778_s29 + $0x1f8] sm:$0xff] %v4154_v46  ;;  %v1200_v55 = vmin.f32 %v4152_v52, %v4154_v46 }
 0x179   : > { %1201 = vmin.xlane.f32.xlu1 %v1200_v55 }
 0x18a   : > { %v1109_v51 = vpop.xlane.xlu0 %1108 }
 0x18b   : > { %vm1206_vm7 = vcmp.le.f32.partialorder %v3772_v1, %v1109_v51  ;;  %vm1207_vm8 = vcmp.le.f32.partialorder %v3775_v3, %v1109_v51 }
 0x18c   : > { %v1270_v1 = vsel %vm1206_vm7, %v4163_v28, 256  ;;  %v1271_v3 = vsel %vm1207_vm8, %v4166_v45, 256 }
 0x18e   : > { %v1112_v19 = vpop.xlane.xlu0 %1111 }
 0x18f   : > { %vm1208_vm12 = vcmp.le.f32.partialorder %v3786_v11, %v1112_v19  ;;  %vm1209_vm13 = vcmp.le.f32.partialorder %v3789_v13, %v1112_v19 }
 0x190   : > { %v1272_v11 = vsel %vm1208_vm12, %v4163_v28, 256  ;;  %v1273_v13 = vsel %vm1209_vm13, %v4166_v45, 256 }
 0x191   : > { %vm1350_vm7 = vcmp.lt.s32.totalorder %v1272_v11, %v1273_v13 }
 0x192   : > { %v1115_v55 = vpop.xlane.xlu0 %1114 }
 0x1a6   : > { %v1130_v24 = vpop.xlane.xlu1 %1129 }
 0x1a7   : > { %vm1220_vm1 = vcmp.le.f32.partialorder %v3862_v18, %v1130_v24  ;;  %vm1221_vm2 = vcmp.le.f32.partialorder %v3866_v21, %v1130_v24 }
 0x1a8   : > { %v1284_v44 = vsel %vm1220_vm1, %v4163_v28, 256  ;;  %v1285_v27 = vsel %vm1221_vm2, %v4166_v45, 256  ;;  %vm1334_vm1 = vcmp.lt.s32.totalorder %v1270_v1, %v1271_v3 }
 0x1a9   : > { %vm1446_vm3 = vcmp.lt.s32.totalorder %v1284_v44, %v1285_v27 }
 0x1aa   : > { %v1133_v54 = vpop.xlane.xlu1 %1132  ;;  %v4172_v37 = vsel %vm1446_vm3, %v1284_v44, %v1285_v27  ;;  %vm1210_vm3 = vcmp.le.f32.partialorder %v3798_v23, %v1115_v55  ;;  %v4220_v23 = vsel %vm1334_vm1, %v1270_v1, %v1271_v3  ;;  %v4235_v3 = vsel %vm1350_vm7, %v1272_v11, %v1273_v13 }
 0x1ab   : > { %vm1222_vm4 = vcmp.le.f32.partialorder %v3874_v30, %v1133_v54  ;;  %vm1223_vm5 = vcmp.le.f32.partialorder %v3877_v22, %v1133_v54  ;;  %v1449_v4 = vshra.s32 %v4172_v37, 16  ;;  %v1118_v54 = vpop.xlane.xlu0 %1117 }
 0x1ac   : > { %v1286_v0 = vsel %vm1222_vm4, %v4163_v28, 256  ;;  %v1287_v18 = vsel %vm1223_vm5, %v4166_v45, 256  ;;  %vm1211_vm4 = vcmp.le.f32.partialorder %v3801_v20, %v1115_v55  ;;  %v1274_v20 = vsel %vm1210_vm3, %v4163_v28, 256 }
 0x1ad   : > { %v4179_v21 = vcvt.s32.f32 %v1449_v4  ;;  %vm1462_vm6 = vcmp.lt.s32.totalorder %v1286_v0, %v1287_v18  ;;  %v1275_v55 = vsel %vm1211_vm4, %v4166_v45, 256 }
 0x1ae   : > { %v1136_v56 = vpop.xlane.xlu1 %1135  ;;  %v4183_v24 = vsel %vm1462_vm6, %v1286_v0, %v1287_v18  ;;  %vm1366_vm13 = vcmp.lt.s32.totalorder %v1274_v20, %v1275_v55 }
 0x1af   : > { %vm1224_vm9 = vcmp.le.f32.partialorder %v3886_v35, %v1136_v56  ;;  %vm1225_vm10 = vcmp.le.f32.partialorder %v3889_v41, %v1136_v56  ;;  %1452 = vmin.xlane.f32.xlu0 %v4179_v21  ;;  %v1465_v30 = vshra.s32 %v4183_v24, 16  ;;  %v4251_v13 = vsel %vm1366_vm13, %v1274_v20, %v1275_v55 }
 0x1b0   : > { %v1288_v22 = vsel %vm1224_vm9, %v4163_v28, 256  ;;  %v1289_v44 = vsel %vm1225_vm10, %v4166_v45, 256  ;;  %vm1212_vm9 = vcmp.le.f32.partialorder %v3810_v32, %v1118_v54  ;;  %vm1213_vm10 = vcmp.le.f32.partialorder %v3813_v34, %v1118_v54 }
 0x1b1   : > { %vm1478_vm11 = vcmp.lt.s32.totalorder %v1288_v22, %v1289_v44  ;;  %v4193_v51 = vcvt.s32.f32 %v1465_v30  ;;  %v1369_v55 = vshra.s32 %v4251_v13, 16 }
 0x1b2   : > { %v1139_v35 = vpop.xlane.xlu1 %1138  ;;  %v4197_v41 = vsel %vm1478_vm11, %v1288_v22, %v1289_v44 }
 0x1b3   : > { %vm1226_vm14 = vcmp.le.f32.partialorder %v3900_v60, %v1139_v35  ;;  %vm1227_vm15 = vcmp.le.f32.partialorder %v3904_v62, %v1139_v35  ;;  %1468 = vmin.xlane.f32.xlu0 %v4193_v51  ;;  %v1481_v27 = vshra.s32 %v4197_v41, 16  ;;  %v1337_v35 = vshra.s32 %v4220_v23, 16 }
 0x1b4   : > { %v1290_v4 = vsel %vm1226_vm14, %v4163_v28, 256  ;;  %v1291_v0 = vsel %vm1227_vm15, %v4166_v45, 256 }
 0x1b5   : > { %vm1494_vm2 = vcmp.lt.s32.totalorder %v1290_v4, %v1291_v0  ;;  %v4207_v19 = vcvt.s32.f32 %v1481_v27  ;;  %v1276_v27 = vsel %vm1212_vm9, %v4163_v28, 256 }
 0x1b6   : > { %v1142_v60 = vpop.xlane.xlu1 %1141  ;;  %v4211_v62 = vsel %vm1494_vm2, %v1290_v4, %v1291_v0  ;;  %v1353_v0 = vshra.s32 %v4235_v3, 16 }
 0x1b7   : > { %vm1228_vm5 = vcmp.le.f32.partialorder %v3912_v8, %v1142_v60  ;;  %vm1229_vm6 = vcmp.le.f32.partialorder %v3915_v10, %v1142_v60  ;;  %1484 = vmin.xlane.f32.xlu0 %v4207_v19  ;;  %v1497_v18 = vshra.s32 %v4211_v62, 16  ;;  %v1121_v10 = vpop.xlane.xlu0 %1120 }
 0x1b8   : > { %v1292_v56 = vsel %vm1228_vm5, %v4163_v28, 256  ;;  %v1293_v30 = vsel %vm1229_vm6, %v4166_v45, 256  ;;  %vm1214_vm3 = vcmp.le.f32.partialorder %v3822_v40, %v1121_v10  ;;  %vm1215_vm4 = vcmp.le.f32.partialorder %v3825_v43, %v1121_v10 }
 0x1b9   : > { %vm1510_vm8 = vcmp.lt.s32.totalorder %v1292_v56, %v1293_v30  ;;  %v4224_v8 = vcvt.s32.f32 %v1497_v18  ;;  %v4263_v20 = vcvt.s32.f32 %v1353_v0  ;;  %v1278_v10 = vsel %vm1214_vm3, %v4163_v28, 256 }
 0x1ba   : > { %v1145_v22 = vpop.xlane.xlu1 %1144  ;;  %v4228_v44 = vsel %vm1510_vm8, %v1292_v56, %v1293_v30  ;;  %v4255_v30 = vcvt.s32.f32 %v1337_v35 }
 0x1bb   : > { %vm1230_vm11 = vcmp.le.f32.partialorder %v3924_v25, %v1145_v22  ;;  %vm1231_vm12 = vcmp.le.f32.partialorder %v3927_v17, %v1145_v22  ;;  %1500 = vmin.xlane.f32.xlu0 %v4224_v8  ;;  %v1513_v1 = vshra.s32 %v4228_v44, 16  ;;  %v1277_v25 = vsel %vm1213_vm10, %v4166_v45, 256  ;;  %v1124_v60 = vpop.xlane.xlu0 %1123 }
 0x1bc   : > { %v1294_v32 = vsel %vm1230_vm11, %v4163_v28, 256  ;;  %v1295_v34 = vsel %vm1231_vm12, %v4166_v45, 256  ;;  %vm1382_vm2 = vcmp.lt.s32.totalorder %v1276_v27, %v1277_v25  ;;  %vm1216_vm8 = vcmp.le.f32.partialorder %v3834_v57, %v1124_v60 }
 0x1bd   : > { %vm1526_vm14 = vcmp.lt.s32.totalorder %v1294_v32, %v1295_v34  ;;  %v4242_v17 = vcvt.s32.f32 %v1513_v1  ;;  %v4272_v43 = vsel %vm1382_vm2, %v1276_v27, %v1277_v25  ;;  %v1279_v1 = vsel %vm1215_vm4, %v4166_v45, 256 }
 0x1be   : > { %v1148_v54 = vpop.xlane.xlu1 %1147  ;;  %v4244_v4 = vsel %vm1526_vm14, %v1294_v32, %v1295_v34  ;;  %vm1217_vm9 = vcmp.le.f32.partialorder %v3837_v59, %v1124_v60  ;;  %v4284_v27 = vcvt.s32.f32 %v1369_v55  ;;  %v1385_v25 = vshra.s32 %v4272_v43, 16 }
 0x1bf   : > { %vm1232_vm15 = vcmp.le.f32.partialorder %v3936_v38, %v1148_v54  ;;  %vm1233_vm1 = vcmp.le.f32.partialorder %v3939_v42, %v1148_v54  ;;  %1516 = vmin.xlane.f32.xlu0 %v4242_v17  ;;  %v1529_v11 = vshra.s32 %v4244_v4, 16  ;;  %vm1398_vm11 = vcmp.lt.s32.totalorder %v1278_v10, %v1279_v1 }
 0x1c0   : > { %v1296_v18 = vsel %vm1232_vm15, %v4163_v28, 256  ;;  %v1297_v56 = vsel %vm1233_vm1, %v4166_v45, 256  ;;  %v1280_v59 = vsel %vm1216_vm8, %v4163_v28, 256  ;;  %v1281_v0 = vsel %vm1217_vm9, %v4166_v45, 256 }
 0x1c1   : > { %vm1542_vm5 = vcmp.lt.s32.totalorder %v1296_v18, %v1297_v56  ;;  %v4259_v38 = vcvt.s32.f32 %v1529_v11  ;;  %vm1414_vm2 = vcmp.lt.s32.totalorder %v1280_v59, %v1281_v0 }
 0x1c2   : > { %v1151_v42 = vpop.xlane.xlu1 %1150  ;;  %v4261_v22 = vsel %vm1542_vm5, %v1296_v18, %v1297_v56  ;;  %v4303_v56 = vsel %vm1398_vm11, %v1278_v10, %v1279_v1 }
 0x1c3   : > { %vm1234_vm6 = vcmp.le.f32.partialorder %v3948_v7, %v1151_v42  ;;  %vm1235_vm7 = vcmp.le.f32.partialorder %v3951_v61, %v1151_v42  ;;  %1532 = vmin.xlane.f32.xlu1 %v4259_v38  ;;  %1340 = vmin.xlane.f32.xlu0 %v4255_v30  ;;  %v1545_v40 = vshra.s32 %v4261_v22, 16  ;;  %v1127_v61 = vpop.xlane.xlu0 %1126 }
 0x1c4   : > { %v1298_v32 = vsel %vm1234_vm6, %v4163_v28, 256  ;;  %v1299_v34 = vsel %vm1235_vm7, %v4166_v45, 256  ;;  %vm1218_vm14 = vcmp.le.f32.partialorder %v3848_v6, %v1127_v61  ;;  %vm1219_vm15 = vcmp.le.f32.partialorder %v3852_v9, %v1127_v61 }
 0x1c5   : > { %vm1558_vm10 = vcmp.lt.s32.totalorder %v1298_v32, %v1299_v34  ;;  %v4280_v7 = vcvt.s32.f32 %v1545_v40  ;;  %v1282_v9 = vsel %vm1218_vm14, %v4163_v28, 256  ;;  %v1283_v42 = vsel %vm1219_vm15, %v4166_v45, 256 }
 0x1c6   : > { %v1154_v35 = vpop.xlane.xlu1 %1153  ;;  %v4282_v54 = vsel %vm1558_vm10, %v1298_v32, %v1299_v34  ;;  %v4322_v34 = vsel %vm1414_vm2, %v1280_v59, %v1281_v0  ;;  %vm1430_vm6 = vcmp.lt.s32.totalorder %v1282_v9, %v1283_v42 }
 0x1c7   : > { %vm1236_vm12 = vcmp.le.f32.partialorder %v3960_v12, %v1154_v35  ;;  %vm1237_vm13 = vcmp.le.f32.partialorder %v3963_v16, %v1154_v35  ;;  %1548 = vmin.xlane.f32.xlu1 %v4280_v7  ;;  %1356 = vmin.xlane.f32.xlu0 %v4263_v20  ;;  %v1561_v57 = vshra.s32 %v4282_v54, 16  ;;  %v1417_v0 = vshra.s32 %v4322_v34, 16 }
 0x1c8   : > { %v1300_v11 = vsel %vm1236_vm12, %v4163_v28, 256  ;;  %v1301_v60 = vsel %vm1237_vm13, %v4166_v45, 256 }
 0x1c9   : > { %vm1574_vm1 = vcmp.lt.s32.totalorder %v1300_v11, %v1301_v60  ;;  %v4298_v12 = vcvt.s32.f32 %v1561_v57 }
 0x1ca   : > { %v1157_v16 = vpop.xlane.xlu1 %1156  ;;  %v4300_v18 = vsel %vm1574_vm1, %v1300_v11, %v1301_v60 }
 0x1cb   : > { %vm1238_vm3 = vcmp.le.f32.partialorder %v3972_v47, %v1157_v16  ;;  %vm1239_vm4 = vcmp.le.f32.partialorder %v3975_v33, %v1157_v16  ;;  %1564 = vmin.xlane.f32.xlu1 %v4298_v12  ;;  %1372 = vmin.xlane.f32.xlu0 %v4284_v27  ;;  %v1577_v6 = vshra.s32 %v4300_v18, 16  ;;  %v4316_v47 = vcvt.s32.f32 %v1385_v25 }
 0x1cc   : > { %v1302_v55 = vsel %vm1238_vm3, %v4163_v28, 256  ;;  %v1303_v40 = vsel %vm1239_vm4, %v4166_v45, 256  ;;  %v1401_v33 = vshra.s32 %v4303_v56, 16 }
 0x1cd   : > { %vm1590_vm5 = vcmp.lt.s32.totalorder %v1302_v55, %v1303_v40  ;;  %v4314_v10 = vcvt.s32.f32 %v1577_v6 }
 0x1ce   : > { %v1160_v1 = vpop.xlane.xlu1 %1159  ;;  %v4319_v32 = vsel %vm1590_vm5, %v1302_v55, %v1303_v40  ;;  %v4333_v59 = vcvt.s32.f32 %v1401_v33  ;;  %v4349_v40 = vcvt.s32.f32 %v1417_v0 }
 0x1cf   : > { %vm1240_vm7 = vcmp.le.f32.partialorder %v3984_v50, %v1160_v1  ;;  %vm1241_vm8 = vcmp.le.f32.partialorder %v3987_v53, %v1160_v1  ;;  %1580 = vmin.xlane.f32.xlu1 %v4314_v10  ;;  %1388 = vmin.xlane.f32.xlu0 %v4316_v47  ;;  %v1593_v61 = vshra.s32 %v4319_v32, 16  ;;  %v4338_v53 = vsel %vm1430_vm6, %v1282_v9, %v1283_v42 }
 0x1d0   : > { %v1304_v35 = vsel %vm1240_vm7, %v4163_v28, 256  ;;  %v1305_v25 = vsel %vm1241_vm8, %v4166_v45, 256  ;;  %v1433_v9 = vshra.s32 %v4338_v53, 16 }
 0x1d1   : > { %vm1606_vm9 = vcmp.lt.s32.totalorder %v1304_v35, %v1305_v25  ;;  %v4331_v57 = vcvt.s32.f32 %v1593_v61 }
 0x1d2   : > { %v1163_v50 = vpop.xlane.xlu1 %1162  ;;  %v4336_v11 = vsel %vm1606_vm9, %v1304_v35, %v1305_v25  ;;  %v4363_v35 = vcvt.s32.f32 %v1433_v9 }
 0x1d3   : > { %vm1242_vm10 = vcmp.le.f32.partialorder %v3996_v48, %v1163_v50  ;;  %vm1243_vm11 = vcmp.le.f32.partialorder %v3999_v15, %v1163_v50  ;;  %1596 = vmin.xlane.f32.xlu1 %v4331_v57  ;;  %1404 = vmin.xlane.f32.xlu0 %v4333_v59  ;;  %v1609_v60 = vshra.s32 %v4336_v11, 16 }
 0x1d4   : > { %v1306_v16 = vsel %vm1242_vm10, %v4163_v28, 256  ;;  %v1307_v6 = vsel %vm1243_vm11, %v4166_v45, 256 }
 0x1d5   : > { %vm1622_vm12 = vcmp.lt.s32.totalorder %v1306_v16, %v1307_v6  ;;  %v4347_v55 = vcvt.s32.f32 %v1609_v60 }
 0x1d6   : > { %v1166_v48 = vpop.xlane.xlu1 %1165  ;;  %v4352_v42 = vsel %vm1622_vm12, %v1306_v16, %v1307_v6 }
 0x1d7   : > { %vm1244_vm13 = vcmp.le.f32.partialorder %v4008_v36, %v1166_v48  ;;  %vm1245_vm14 = vcmp.le.f32.partialorder %v4011_v39, %v1166_v48  ;;  %1612 = vmin.xlane.f32.xlu1 %v4347_v55  ;;  %1420 = vmin.xlane.f32.xlu0 %v4349_v40  ;;  %v1625_v15 = vshra.s32 %v4352_v42, 16 }
 0x1d8   : > { %v1308_v33 = vsel %vm1244_vm13, %v4163_v28, 256  ;;  %v1309_v1 = vsel %vm1245_vm14, %v4166_v45, 256 }
 0x1d9   : > { %vm1638_vm15 = vcmp.lt.s32.totalorder %v1308_v33, %v1309_v1  ;;  %v4361_v61 = vcvt.s32.f32 %v1625_v15 }
 0x1da   : > { %v1169_v25 = vpop.xlane.xlu0 %1168  ;;  %v4365_v0 = vsel %vm1638_vm15, %v1308_v33, %v1309_v1  ;;  %v5421_v1 = vld [vmem:[#allocation9_spill] sm:$0xff] }
 0x1db   : > { %vm1246_vm1 = vcmp.le.f32.partialorder %v4020_v2, %v1169_v25  ;;  %vm1247_vm2 = vcmp.le.f32.partialorder %v4023_v5, %v1169_v25  ;;  %1628 = vmin.xlane.f32.xlu1 %v4361_v61  ;;  %1436 = vmin.xlane.f32.xlu0 %v4363_v35  ;;  %v1641_v36 = vshra.s32 %v4365_v0, 16  ;;  %v5422_v25 = vld [vmem:[#allocation10_spill] sm:$0xff] }
 0x1dc   : > { %v1310_v39 = vsel %vm1246_vm1, %v4163_v28, 256  ;;  %v1311_v50 = vsel %vm1247_vm2, %v4166_v45, 256 }
 0x1dd   : > { %vm1654_vm3 = vcmp.lt.s32.totalorder %v1310_v39, %v1311_v50  ;;  %v4374_v60 = vcvt.s32.f32 %v1641_v36 }
 0x1de   : > { %v1172_v16 = vpop.xlane.xlu1 %1171  ;;  %v4376_v6 = vsel %vm1654_vm3, %v1310_v39, %v1311_v50 }
 0x1df   : > { %vm1248_vm4 = vcmp.le.f32.partialorder %v4032_v31, %v1172_v16  ;;  %vm1249_vm5 = vcmp.le.f32.partialorder %v4035_v29, %v1172_v16  ;;  %1644 = vmin.xlane.f32.xlu1 %v4374_v60  ;;  %v1657_v2 = vshra.s32 %v4376_v6, 16 }
 0x1e0   : > { %v1312_v5 = vsel %vm1248_vm4, %v4163_v28, 256  ;;  %v1313_v9 = vsel %vm1249_vm5, %v4166_v45, 256 }
 0x1e1   : > { %vm1670_vm6 = vcmp.lt.s32.totalorder %v1312_v5, %v1313_v9  ;;  %v4384_v48 = vcvt.s32.f32 %v1657_v2  ;;  %v5425_v2 = vld [vmem:[#allocation11_spill] sm:$0xff] }
 0x1e2   : > { %v1175_v15 = vpop.xlane.xlu0 %1174  ;;  %v4386_v33 = vsel %vm1670_vm6, %v1312_v5, %v1313_v9 }
 0x1e3   : > { %vm1250_vm7 = vcmp.le.f32.partialorder %v5421_v1, %v1175_v15  ;;  %vm1251_vm8 = vcmp.le.f32.partialorder %v5422_v25, %v1175_v15  ;;  %1660 = vmin.xlane.f32.xlu0 %v4384_v48  ;;  %v1673_v31 = vshra.s32 %v4386_v33, 16 }
 0x1e4   : > { %v1314_v29 = vsel %vm1250_vm7, %v4163_v28, 256  ;;  %v1315_v36 = vsel %vm1251_vm8, %v4166_v45, 256 }
 0x1e5   : > { %vm1686_vm9 = vcmp.lt.s32.totalorder %v1314_v29, %v1315_v36  ;;  %v4394_v39 = vcvt.s32.f32 %v1673_v31 }
 0x1e6   : > { %v1178_v50 = vpop.xlane.xlu1 %1177  ;;  %v4396_v16 = vsel %vm1686_vm9, %v1314_v29, %v1315_v36  ;;  %v5428_v29 = vld [vmem:[#allocation12_spill] sm:$0xff]  ;;  %v5429_v36 = vld [vmem:[#allocation13_spill] sm:$0xff] }
 0x1e7   : > { %5423 = vst [vmem:[#allocation9_spill] sm:$0xff] %v4394_v39  ;;  %5424 = vst [vmem:[#allocation10_spill] sm:$0xff] %v4396_v16  ;;  %vm1252_vm10 = vcmp.le.f32.partialorder %v4056_v58, %v1178_v50  ;;  %vm1253_vm11 = vcmp.le.f32.partialorder %v5425_v2, %v1178_v50  ;;  %1676 = vmin.xlane.f32.xlu1 %v4394_v39  ;;  %v1689_v5 = vshra.s32 %v4396_v16, 16 }
 0x1e8   : > { %v1316_v9 = vsel %vm1252_vm10, %v4163_v28, 256  ;;  %v1317_v15 = vsel %vm1253_vm11, %v4166_v45, 256 }
 0x1e9   : > { %vm1702_vm12 = vcmp.lt.s32.totalorder %v1316_v9, %v1317_v15  ;;  %v4404_v1 = vcvt.s32.f32 %v1689_v5 }
 0x1ea   : > { %v1181_v25 = vpop.xlane.xlu0 %1180  ;;  %v4406_v31 = vsel %vm1702_vm12, %v1316_v9, %v1317_v15  ;;  %v5431_v9 = vld [vmem:[#allocation14_spill] sm:$0xff]  ;;  %v5432_v15 = vld [vmem:[#allocation15_spill] sm:$0xff] }
 0x1eb   : > { %5426 = vst [vmem:[#allocation11_spill] sm:$0xff] %v4404_v1  ;;  %5427 = vst [vmem:[#allocation22_spill] sm:$0xff] %v4406_v31  ;;  %vm1254_vm13 = vcmp.le.f32.partialorder %v5428_v29, %v1181_v25  ;;  %vm1255_vm14 = vcmp.le.f32.partialorder %v5429_v36, %v1181_v25  ;;  %1692 = vmin.xlane.f32.xlu0 %v4404_v1  ;;  %v1705_v58 = vshra.s32 %v4406_v31, 16 }
 0x1ec   : > { %v1318_v50 = vsel %vm1254_vm13, %v4163_v28, 256  ;;  %v1319_v2 = vsel %vm1255_vm14, %v4166_v45, 256 }
 0x1ed   : > { %vm1718_vm15 = vcmp.lt.s32.totalorder %v1318_v50, %v1319_v2  ;;  %v4414_v39 = vcvt.s32.f32 %v1705_v58 }
 0x1ee   : > { %v1184_v5 = vpop.xlane.xlu1 %1183  ;;  %v4416_v16 = vsel %vm1718_vm15, %v1318_v50, %v1319_v2  ;;  %v5435_v50 = vld [vmem:[#allocation16_spill] sm:$0xff] }
 0x1ef   : > { %5430 = vst [vmem:[#allocation12_spill] sm:$0xff] %v4414_v39  ;;  %vm1256_vm1 = vcmp.le.f32.partialorder %v5431_v9, %v1184_v5  ;;  %vm1257_vm2 = vcmp.le.f32.partialorder %v5432_v15, %v1184_v5  ;;  %1708 = vmin.xlane.f32.xlu1 %v4414_v39  ;;  %v1721_v25 = vshra.s32 %v4416_v16, 16 }
 0x1f0   : > { %v1320_v29 = vsel %vm1256_vm1, %v4163_v28, 256  ;;  %v1321_v36 = vsel %vm1257_vm2, %v4166_v45, 256 }
 0x1f1   : > { %vm1734_vm3 = vcmp.lt.s32.totalorder %v1320_v29, %v1321_v36  ;;  %v4424_v1 = vcvt.s32.f32 %v1721_v25 }
 0x1f2   : > { %v1187_v58 = vpop.xlane.xlu0 %1186  ;;  %v4426_v31 = vsel %vm1734_vm3, %v1320_v29, %v1321_v36  ;;  %v5438_v29 = vld [vmem:[#allocation17_spill] sm:$0xff]  ;;  %v5439_v36 = vld [vmem:[#allocation18_spill] sm:$0xff] }
 0x1f3   : > { %5433 = vst [vmem:[#allocation13_spill] sm:$0xff] %v4424_v1  ;;  %5434 = vst [vmem:[#allocation14_spill] sm:$0xff] %v4426_v31  ;;  %vm1258_vm4 = vcmp.le.f32.partialorder %v4092_v49, %v1187_v58  ;;  %vm1259_vm5 = vcmp.le.f32.partialorder %v5435_v50, %v1187_v58  ;;  %1724 = vmin.xlane.f32.xlu0 %v4424_v1  ;;  %v1737_v2 = vshra.s32 %v4426_v31, 16 }
 0x1f4   : > { %v1322_v5 = vsel %vm1258_vm4, %v4163_v28, 256  ;;  %v1323_v9 = vsel %vm1259_vm5, %v4166_v45, 256 }
 0x1f5   : > { %vm1750_vm6 = vcmp.lt.s32.totalorder %v1322_v5, %v1323_v9  ;;  %v4434_v15 = vcvt.s32.f32 %v1737_v2 }
 0x1f6   : > { %v1190_v25 = vpop.xlane.xlu1 %1189  ;;  %v4436_v39 = vsel %vm1750_vm6, %v1322_v5, %v1323_v9  ;;  %v5441_v5 = vld [vmem:[#allocation19_spill] sm:$0xff]  ;;  %v5442_v9 = vld [vmem:[#allocation20_spill] sm:$0xff] }
 0x1f7   : > { %5436 = vst [vmem:[#allocation15_spill] sm:$0xff] %v4434_v15  ;;  %5437 = vst [vmem:[#allocation16_spill] sm:$0xff] %v4436_v39  ;;  %vm1260_vm7 = vcmp.le.f32.partialorder %v5438_v29, %v1190_v25  ;;  %vm1261_vm8 = vcmp.le.f32.partialorder %v5439_v36, %v1190_v25  ;;  %1740 = vmin.xlane.f32.xlu1 %v4434_v15  ;;  %v1753_v49 = vshra.s32 %v4436_v39, 16 }
 0x1f8   : > { %v1324_v58 = vsel %vm1260_vm7, %v4163_v28, 256  ;;  %v1325_v50 = vsel %vm1261_vm8, %v4166_v45, 256 }
 0x1f9   : > { %vm1766_vm9 = vcmp.lt.s32.totalorder %v1324_v58, %v1325_v50  ;;  %v4444_v1 = vcvt.s32.f32 %v1753_v49 }
 0x1fa   : > { %v1193_v2 = vpop.xlane.xlu1 %1192  ;;  %v4446_v31 = vsel %vm1766_vm9, %v1324_v58, %v1325_v50  ;;  %v5443_v58 = vld [vmem:[#allocation21_spill] sm:$0xff] }
 0x1fb   : > { %5440 = vst [vmem:[#allocation17_spill] sm:$0xff] %v4444_v1  ;;  %vm1262_vm10 = vcmp.le.f32.partialorder %v5441_v5, %v1193_v2  ;;  %vm1263_vm11 = vcmp.le.f32.partialorder %v5442_v9, %v1193_v2  ;;  %1756 = vmin.xlane.f32.xlu1 %v4444_v1  ;;  %v1769_v25 = vshra.s32 %v4446_v31, 16 }
 0x1fc   : > { %v1326_v29 = vsel %vm1262_vm10, %v4163_v28, 256  ;;  %v1327_v36 = vsel %vm1263_vm11, %v4166_v45, 256 }
 0x1fd   : > { %vm1782_vm12 = vcmp.lt.s32.totalorder %v1326_v29, %v1327_v36  ;;  %v4454_v15 = vcvt.s32.f32 %v1769_v25 }
 0x1fe   : > { %v1196_v49 = vpop.xlane.xlu1 %1195  ;;  %v4456_v39 = vsel %vm1782_vm12, %v1326_v29, %v1327_v36 }
 0x1ff   : > { %vm1264_vm13 = vcmp.le.f32.partialorder %v4128_v14, %v1196_v49  ;;  %vm1265_vm14 = vcmp.le.f32.partialorder %v5443_v58, %v1196_v49  ;;  %1772 = vmin.xlane.f32.xlu1 %v4454_v15  ;;  %v1785_v50 = vshra.s32 %v4456_v39, 16 }
 0x200   : > { %v1328_v2 = vsel %vm1264_vm13, %v4163_v28, 256  ;;  %v1329_v5 = vsel %vm1265_vm14, %v4166_v45, 256 }
 0x201   : > { %vm1798_vm15 = vcmp.lt.s32.totalorder %v1328_v2, %v1329_v5  ;;  %v4464_v9 = vcvt.s32.f32 %v1785_v50 }
 0x202   : > { %v1199_v25 = vpop.xlane.xlu1 %1198  ;;  %v4466_v1 = vsel %vm1798_vm15, %v1328_v2, %v1329_v5  ;;  %v2136_v2 = vld [vmem:[%s5369_s2 + $0x8] sm:$0xff] }
 0x203   : > { %vm1266_vm1 = vcmp.le.f32.partialorder %v4140_v63, %v1199_v25  ;;  %vm1267_vm2 = vcmp.le.f32.partialorder %v4143_v26, %v1199_v25  ;;  %1788 = vmin.xlane.f32.xlu1 %v4464_v9  ;;  %v1801_v14 = vshra.s32 %v4466_v1, 16  ;;  %v2135_v26 = vld [vmem:[%s5369_s2] sm:$0xff]  ;;  %v3403_v25 = vmov 0.0|0.0  }
 0x204   : > { %v1330_v29 = vsel %vm1266_vm1, %v4163_v28, 256  ;;  %v1331_v36 = vsel %vm1267_vm2, %v4166_v45, 256  ;;  %v3144_v5 = vpack.c.bf16 %v2136_v2, %v2135_v26  ;;  %3191 = vmatprep.subr.bf16.mxu1 %v3403_v25  ;;  %3143 = vmatprep.subr.bf16.mxu0 %v3403_v25  ;;  %v2140_v26 = vld [vmem:[%s5369_s2 + $0x28] sm:$0xff]  ;;  %v2141_v2 = vld [vmem:[%s5369_s2 + $0x30] sm:$0xff] }
 0x205   : > { %vm1814_vm3 = vcmp.lt.s32.totalorder %v1330_v29, %v1331_v36  ;;  %v4474_v49 = vcvt.s32.f32 %v1801_v14  ;;  %v2137_v14 = vld [vmem:[%s5369_s2 + $0x10] sm:$0xff] }
 0x206   : > { %v4476_v58 = vsel %vm1814_vm3, %v1330_v29, %v1331_v36  ;;  %3207 = vmatpush1.bf16.msra.mxu1 %v3144_v5  ;;  %3145 = vmatpush1.bf16.msra.mxu0 %v3144_v5  ;;  %v2138_v29 = vld [vmem:[%s5369_s2 + $0x18] sm:$0xff] }
 0x207   : > { %5444 = vst [vmem:[#allocation18_spill] sm:$0xff] %v4474_v49  ;;  %5445 = vst [vmem:[#allocation19_spill] sm:$0xff] %v4476_v58  ;;  %1804 = vmin.xlane.f32.xlu1 %v4474_v49  ;;  %v1817_v50 = vshra.s32 %v4476_v58, 16  ;;  %3192 = vmatprep.subr.bf16.mxu1 %v3403_v25  ;;  %v3147_v36 = vpack.c.bf16 %v2138_v29, %v2137_v14  ;;  %v2142_v14 = vld [vmem:[%s5369_s2 + $0x38] sm:$0xff] }
 0x208   : > { %3146 = vmatprep.subr.bf16.mxu0 %v3403_v25  ;;  %v3153_v29 = vpack.c.bf16 %v2142_v14, %v2141_v2  ;;  %v2146_v2 = vld [vmem:[%s5369_s2 + $0x58] sm:$0xff]  ;;  %v2148_v14 = vld [vmem:[%s5369_s2 + $0x68] sm:$0xff] }
 0x209   : > { %v4480_v63 = vcvt.s32.f32 %v1817_v50  ;;  %v2139_v50 = vld [vmem:[%s5369_s2 + $0x20] sm:$0xff] }
 0x20a   : > { %3208 = vmatpush1.bf16.msra.mxu1 %v3147_v36  ;;  %3148 = vmatpush1.bf16.msra.mxu0 %v3147_v36  ;;  %v3150_v5 = vpack.c.bf16 %v2140_v26, %v2139_v50  ;;  %v2143_v36 = vld [vmem:[%s5369_s2 + $0x40] sm:$0xff]  ;;  %v2145_v26 = vld [vmem:[%s5369_s2 + $0x50] sm:$0xff] }
 0x20b   : > { %5446 = vst [vmem:[#allocation20_spill] sm:$0xff] %v4480_v63  ;;  %1820 = vmin.xlane.f32.xlu1 %v4480_v63  ;;  %3193 = vmatprep.subr.bf16.mxu1 %v3403_v25  ;;  %v2144_v63 = vld [vmem:[%s5369_s2 + $0x48] sm:$0xff] }
 0x20c   : > { %3149 = vmatprep.subr.bf16.mxu0 %v3403_v25  ;;  %v3156_v50 = vpack.c.bf16 %v2144_v63, %v2143_v36  ;;  %v2147_v63 = vld [vmem:[%s5369_s2 + $0x60] sm:$0xff]  ;;  %v2149_v36 = vld [vmem:[%s5369_s2 + $0x70] sm:$0xff] }
 0x20e   : > { %3209 = vmatpush1.bf16.msra.mxu1 %v3150_v5  ;;  %3151 = vmatpush1.bf16.msra.mxu0 %v3150_v5  ;;  %v3159_v5 = vpack.c.bf16 %v2146_v2, %v2145_v26  ;;  %v2151_v2 = vld [vmem:[%s5369_s2 + $0x80] sm:$0xff] }
 0x20f   : > { %3194 = vmatprep.subr.bf16.mxu1 %v3403_v25  ;;  %3152 = vmatprep.subr.bf16.mxu0 %v3403_v25 }
 0x212   : > { %3210 = vmatpush1.bf16.msra.mxu1 %v3153_v29  ;;  %3154 = vmatpush1.bf16.msra.mxu0 %v3153_v29  ;;  %v3162_v29 = vpack.c.bf16 %v2148_v14, %v2147_v63  ;;  %v2153_v14 = vld [vmem:[%s5369_s2 + $0x90] sm:$0xff] }
 0x213   : > { %3195 = vmatprep.subr.bf16.mxu1 %v3403_v25  ;;  %3155 = vmatprep.subr.bf16.mxu0 %v3403_v25 }
 0x216   : > { %3211 = vmatpush1.bf16.msra.mxu1 %v3156_v50  ;;  %3157 = vmatpush1.bf16.msra.mxu0 %v3156_v50  ;;  %v2150_v50 = vld [vmem:[%s5369_s2 + $0x78] sm:$0xff] }
 0x217   : > { %3196 = vmatprep.subr.bf16.mxu1 %v3403_v25  ;;  %3158 = vmatprep.subr.bf16.mxu0 %v3403_v25  ;;  %v3165_v26 = vpack.c.bf16 %v2150_v50, %v2149_v36  ;;  %v2155_v50 = vld [vmem:[%s5369_s2 + $0xa0] sm:$0xff] }
 0x21a   : > { %3212 = vmatpush1.bf16.msra.mxu1 %v3159_v5  ;;  %3160 = vmatpush1.bf16.msra.mxu0 %v3159_v5  ;;  %v2152_v5 = vld [vmem:[%s5369_s2 + $0x88] sm:$0xff] }
 0x21b   : > { %3197 = vmatprep.subr.bf16.mxu1 %v3403_v25  ;;  %3161 = vmatprep.subr.bf16.mxu0 %v3403_v25  ;;  %v3168_v63 = vpack.c.bf16 %v2152_v5, %v2151_v2  ;;  %v1448_v2 = vand.u32 65535, %v4172_v37  ;;  %v1464_v37 = vand.u32 65535, %v4183_v24 }
 0x21d   : > { %v1450_v49 = vcvt.s32.f32 %v1448_v2  ;;  %v2160_v2 = vld [vmem:[%s5369_s2 + $0xc8] sm:$0xff]  ;;  %v1466_v24 = vcvt.s32.f32 %v1464_v37 }
 0x21e   : > { %3213 = vmatpush1.bf16.msra.mxu1 %v3162_v29  ;;  %3163 = vmatpush1.bf16.msra.mxu0 %v3162_v29  ;;  %v2154_v29 = vld [vmem:[%s5369_s2 + $0x98] sm:$0xff] }
 0x21f   : > { %3198 = vmatprep.subr.bf16.mxu1 %v3403_v25  ;;  %3164 = vmatprep.subr.bf16.mxu0 %v3403_v25  ;;  %v3171_v36 = vpack.c.bf16 %v2154_v29, %v2153_v14  ;;  %v2158_v14 = vld [vmem:[%s5369_s2 + $0xb8] sm:$0xff] }
 0x222   : > { %3214 = vmatpush1.bf16.msra.mxu1 %v3165_v26  ;;  %3166 = vmatpush1.bf16.msra.mxu0 %v3165_v26  ;;  %v2156_v26 = vld [vmem:[%s5369_s2 + $0xa8] sm:$0xff] }
 0x223   : > { %3199 = vmatprep.subr.bf16.mxu1 %v3403_v25  ;;  %3167 = vmatprep.subr.bf16.mxu0 %v3403_v25  ;;  %v3174_v5 = vpack.c.bf16 %v2156_v26, %v2155_v50  ;;  %v2159_v26 = vld [vmem:[%s5369_s2 + $0xc0] sm:$0xff] }
 0x226   : > { %3215 = vmatpush1.bf16.msra.mxu1 %v3168_v63  ;;  %3169 = vmatpush1.bf16.msra.mxu0 %v3168_v63  ;;  %v2157_v63 = vld [vmem:[%s5369_s2 + $0xb0] sm:$0xff] }
 0x227   : > { %3200 = vmatprep.subr.bf16.mxu1 %v3403_v25  ;;  %3170 = vmatprep.subr.bf16.mxu0 %v3403_v25  ;;  %v3177_v50 = vpack.c.bf16 %v2158_v14, %v2157_v63  ;;  %v3180_v63 = vpack.c.bf16 %v2160_v2, %v2159_v26  ;;  %v2161_v14 = vld [vmem:[%s5369_s2 + $0xd0] sm:$0xff]  ;;  %v1512_v2 = vand.u32 65535, %v4228_v44  ;;  %v2164_v44 = vld [vmem:[%s5369_s2 + $0xe8] sm:$0xff] }
 0x22a   : > { %3216 = vmatpush1.bf16.msra.mxu1 %v3171_v36  ;;  %3172 = vmatpush1.bf16.msra.mxu0 %v3171_v36 }
 0x22b   : > { %3201 = vmatprep.subr.bf16.mxu1 %v3403_v25  ;;  %3173 = vmatprep.subr.bf16.mxu0 %v3403_v25 }
 0x22e   : > { %3217 = vmatpush1.bf16.msra.mxu1 %v3174_v5  ;;  %3175 = vmatpush1.bf16.msra.mxu0 %v3174_v5 }
 0x22f   : > { %3202 = vmatprep.subr.bf16.mxu1 %v3403_v25  ;;  %3176 = vmatprep.subr.bf16.mxu0 %v3403_v25 }
 0x232   : > { %3218 = vmatpush1.bf16.msra.mxu1 %v3177_v50  ;;  %3178 = vmatpush1.bf16.msra.mxu0 %v3177_v50 }
 0x233   : > { %3203 = vmatprep.subr.bf16.mxu1 %v3403_v25  ;;  %3179 = vmatprep.subr.bf16.mxu0 %v3403_v25 }
 0x236   : > { %3219 = vmatpush1.bf16.msra.mxu1 %v3180_v63  ;;  %3181 = vmatpush1.bf16.msra.mxu0 %v3180_v63  ;;  %v1514_v63 = vcvt.s32.f32 %v1512_v2 }
 0x237   : > { %3204 = vmatprep.subr.bf16.mxu1 %v3403_v25  ;;  %3182 = vmatprep.subr.bf16.mxu0 %v3403_v25 }
 0x23c   : > { %v4578_v29 = vpop.xlane.xlu0 %1452 }
 0x23d   : > { %vm1454_vm4 = vcmp.eq.f32.partialorder %v4179_v21, %v4578_v29  ;;  %v1480_v21 = vand.u32 65535, %v4197_v41  ;;  %v2162_v41 = vld [vmem:[%s5369_s2 + $0xd8] sm:$0xff] }
 0x23e   : > { %v1455_v36 = vsel %vm1454_vm4, %v1450_v49, inf  ;;  %v1202_v49 = vpop.xlane.xlu1 %1201  ;;  %v3183_v26 = vpack.c.bf16 %v2162_v41, %v2161_v14 }
 0x23f   : > { %1456 = vmin.xlane.f32.xlu0 %v1455_v36  ;;  %v1482_v36 = vcvt.s32.f32 %v1480_v21  ;;  %vm1268_vm6 = vcmp.le.f32.partialorder %v4152_v52, %v1202_v49  ;;  %vm1269_vm7 = vcmp.le.f32.partialorder %v4154_v46, %v1202_v49  ;;  %v1528_v49 = vand.u32 65535, %v4244_v4  ;;  %v2166_v4 = vld [vmem:[%s5369_s2 + $0xf8] sm:$0xff] }
 0x240   : > { %v4590_v58 = vpop.xlane.xlu0 %1468  ;;  %3220 = vmatpush1.bf16.msra.mxu1 %v3183_v26  ;;  %3184 = vmatpush1.bf16.msra.mxu0 %v3183_v26 }
 0x241   : > { %vm1470_vm5 = vcmp.eq.f32.partialorder %v4193_v51, %v4590_v58  ;;  %v1496_v51 = vand.u32 65535, %v4211_v62  ;;  %v1332_v62 = vsel %vm1268_vm6, %v4163_v28, 256  ;;  %3205 = vmatprep.subr.bf16.mxu1 %v3403_v25  ;;  %3185 = vmatprep.subr.bf16.mxu0 %v3403_v25  ;;  %v1530_v26 = vcvt.s32.f32 %v1528_v49 }
 0x242   : > { %v1471_v5 = vsel %vm1470_vm5, %v1466_v24, inf  ;;  %v1333_v24 = vsel %vm1269_vm7, %v4166_v45, 256 }
 0x243   : > { %1472 = vmin.xlane.f32.xlu0 %v1471_v5  ;;  %v1498_v52 = vcvt.s32.f32 %v1496_v51  ;;  %vm1830_vm10 = vcmp.lt.s32.totalorder %v1332_v62, %v1333_v24  ;;  %v1336_v5 = vand.u32 65535, %v4220_v23  ;;  %v2165_v23 = vld [vmem:[%s5369_s2 + $0xf0] sm:$0xff]  ;;  %v1544_v51 = vand.u32 65535, %v4261_v22 }
 0x244   : > { %v4603_v37 = vpop.xlane.xlu0 %1484  ;;  %v4634_v41 = vsel %vm1830_vm10, %v1332_v62, %v1333_v24  ;;  %v3189_v62 = vpack.c.bf16 %v2166_v4, %v2165_v23  ;;  %v1352_v22 = vand.u32 65535, %v4235_v3  ;;  %v1368_v3 = vand.u32 65535, %v4251_v13 }
 0x245   : > { %vm1486_vm8 = vcmp.eq.f32.partialorder %v4207_v19, %v4603_v37  ;;  %v2163_v19 = vld [vmem:[%s5369_s2 + $0xe0] sm:$0xff]  ;;  %v1338_v2 = vcvt.s32.f32 %v1336_v5  ;;  %v1833_v24 = vshra.s32 %v4634_v41, 16  ;;  %v1384_v13 = vand.u32 65535, %v4272_v43 }
 0x246   : > { %v1487_v50 = vsel %vm1486_vm8, %v1482_v36, inf  ;;  %v3186_v14 = vpack.c.bf16 %v2164_v44, %v2163_v19  ;;  %v1560_v19 = vand.u32 65535, %v4282_v54  ;;  %v1576_v54 = vand.u32 65535, %v4300_v18 }
 0x247   : > { %1488 = vmin.xlane.f32.xlu0 %v1487_v50  ;;  %v1400_v43 = vand.u32 65535, %v4303_v56  ;;  %v1416_v56 = vand.u32 65535, %v4322_v34  ;;  %v1432_v34 = vand.u32 65535, %v4338_v53  ;;  %v1656_v53 = vand.u32 65535, %v4376_v6 }
 0x248   : > { %v4615_v21 = vpop.xlane.xlu0 %1500  ;;  %3221 = vmatpush1.bf16.msra.mxu1 %v3186_v14  ;;  %3187 = vmatpush1.bf16.msra.mxu0 %v3186_v14  ;;  %v1562_v14 = vcvt.s32.f32 %v1560_v19 }
 0x249   : > { %vm1502_vm9 = vcmp.eq.f32.partialorder %v4224_v8, %v4615_v21  ;;  %3206 = vmatprep.subr.bf16.mxu1 %v3403_v25  ;;  %3188 = vmatprep.subr.bf16.mxu0 %v3403_v25 }
 0x24a   : > { %v1503_v46 = vsel %vm1502_vm9, %v1498_v52, inf }
 0x24b   : > { %1504 = vmin.xlane.f32.xlu0 %v1503_v46 }
 0x24c   : > { %v4629_v8 = vpop.xlane.xlu0 %1516  ;;  %3222 = vmatpush1.bf16.msra.mxu1 %v3189_v62  ;;  %3190 = vmatpush1.bf16.msra.mxu0 %v3189_v62 }
 0x24d   : > { %vm1518_vm11 = vcmp.eq.f32.partialorder %v4242_v17, %v4629_v8 }
 0x24e   : > { %v1519_v36 = vsel %vm1518_vm11, %v1514_v63, inf }
 0x24f   : > { %1520 = vmin.xlane.f32.xlu0 %v1519_v36  ;;  %v1354_v36 = vcvt.s32.f32 %v1352_v22 }
 0x250   : > { %v4644_v50 = vpop.xlane.xlu1 %1532  ;;  %v4646_v17 = vpop.xlane.xlu0 %1340 }
 0x251   : > { %vm1534_vm12 = vcmp.eq.f32.partialorder %v4259_v38, %v4644_v50  ;;  %vm1342_vm13 = vcmp.eq.f32.partialorder %v4255_v30, %v4646_v17  ;;  %v1546_v38 = vcvt.s32.f32 %v1544_v51  ;;  %v4662_v30 = vcvt.s32.f32 %v1833_v24 }
 0x252   : > { %v1535_v52 = vsel %vm1534_vm12, %v1530_v26, inf  ;;  %v1343_v46 = vsel %vm1342_vm13, %v1338_v2, inf  ;;  %v1578_v51 = vcvt.s32.f32 %v1576_v54  ;;  %v1370_v26 = vcvt.s32.f32 %v1368_v3 }
 0x253   : > { %1536 = vmin.xlane.f32.xlu0 %v1535_v52  ;;  %1344 = vmin.xlane.f32.xlu1 %v1343_v46  ;;  %v1386_v52 = vcvt.s32.f32 %v1384_v13 }
 0x254   : > { %v4656_v44 = vpop.xlane.xlu1 %1548  ;;  %v4658_v25 = vpop.xlane.xlu0 %1356 }
 0x255   : > { %vm1550_vm14 = vcmp.eq.f32.partialorder %v4280_v7, %v4656_v44  ;;  %vm1358_vm15 = vcmp.eq.f32.partialorder %v4263_v20, %v4658_v25  ;;  %v1592_v20 = vand.u32 65535, %v4319_v32 }
 0x256   : > { %v1551_v49 = vsel %vm1550_vm14, %v1546_v38, inf  ;;  %v1359_v23 = vsel %vm1358_vm15, %v1354_v36, inf  ;;  %v1402_v38 = vcvt.s32.f32 %v1400_v43 }
 0x257   : > { %1836 = vmin.xlane.f32.xlu0 %v4662_v30  ;;  %1552 = vmin.xlane.f32.xlu1 %v1551_v49  ;;  %v1594_v24 = vcvt.s32.f32 %v1592_v20 }
 0x258   : > { %v4669_v5 = vpop.xlane.xlu1 %1564  ;;  %v4671_v63 = vpop.xlane.xlu0 %1372 }
 0x259   : > { %vm1566_vm1 = vcmp.eq.f32.partialorder %v4298_v12, %v4669_v5  ;;  %vm1374_vm2 = vcmp.eq.f32.partialorder %v4284_v27, %v4671_v63  ;;  %v1608_v27 = vand.u32 65535, %v4336_v11 }
 0x25a   : > { %v1567_v7 = vsel %vm1566_vm1, %v1562_v14, inf  ;;  %v1375_v2 = vsel %vm1374_vm2, %v1370_v26, inf  ;;  %v1418_v14 = vcvt.s32.f32 %v1416_v56 }
 0x25b   : > { %1568 = vmin.xlane.f32.xlu1 %v1567_v7  ;;  %1360 = vmin.xlane.f32.xlu0 %v1359_v23  ;;  %v1610_v19 = vcvt.s32.f32 %v1608_v27  ;;  %v1434_v7 = vcvt.s32.f32 %v1432_v34  ;;  %v5449_v27 = vld [vmem:[#allocation22_spill] sm:$0xff] }
 0x25c   : > { %v4679_v18 = vpop.xlane.xlu1 %1580  ;;  %v4681_v4 = vpop.xlane.xlu0 %1388 }
 0x25d   : > { %vm1582_vm3 = vcmp.eq.f32.partialorder %v4314_v10, %v4679_v18  ;;  %vm1390_vm4 = vcmp.eq.f32.partialorder %v4316_v47, %v4681_v4  ;;  %v1624_v47 = vand.u32 65535, %v4352_v42 }
 0x25e   : > { %v1583_v12 = vsel %vm1582_vm3, %v1578_v51, inf  ;;  %v1391_v46 = vsel %vm1390_vm4, %v1386_v52, inf  ;;  %v5447_v51 = vld [vmem:[#allocation10_spill] sm:$0xff] }
 0x25f   : > { %1584 = vmin.xlane.f32.xlu1 %v1583_v12  ;;  %1376 = vmin.xlane.f32.xlu0 %v1375_v2  ;;  %v1626_v54 = vcvt.s32.f32 %v1624_v47  ;;  %v1688_v26 = vand.u32 65535, %v5447_v51  ;;  %v1784_v51 = vand.u32 65535, %v4456_v39 }
 0x260   : > { %v4689_v32 = vpop.xlane.xlu1 %1596  ;;  %v4691_v62 = vpop.xlane.xlu0 %1404 }
 0x261   : > { %vm1598_vm5 = vcmp.eq.f32.partialorder %v4331_v57, %v4689_v32  ;;  %vm1406_vm6 = vcmp.eq.f32.partialorder %v4333_v59, %v4691_v62  ;;  %v1640_v59 = vand.u32 65535, %v4365_v0  ;;  %v1690_v52 = vcvt.s32.f32 %v1688_v26 }
 0x262   : > { %v1599_v10 = vsel %vm1598_vm5, %v1594_v24, inf  ;;  %v1407_v49 = vsel %vm1406_vm6, %v1402_v38, inf }
 0x263   : > { %1600 = vmin.xlane.f32.xlu1 %v1599_v10  ;;  %1392 = vmin.xlane.f32.xlu0 %v1391_v46  ;;  %v1642_v0 = vcvt.s32.f32 %v1640_v59  ;;  %v5450_v10 = vld [vmem:[#allocation11_spill] sm:$0xff]  ;;  %v1720_v46 = vand.u32 65535, %v4416_v16 }
 0x264   : > { %v4699_v11 = vpop.xlane.xlu1 %1612  ;;  %v4701_v22 = vpop.xlane.xlu0 %1420 }
 0x265   : > { %vm1614_vm7 = vcmp.eq.f32.partialorder %v4347_v55, %v4699_v11  ;;  %vm1422_vm8 = vcmp.eq.f32.partialorder %v4349_v40, %v4701_v22  ;;  %v1722_v59 = vcvt.s32.f32 %v1720_v46  ;;  %v5458_v46 = vld [vmem:[#allocation18_spill] sm:$0xff] }
 0x266   : > { %v1615_v57 = vsel %vm1614_vm7, %v1610_v19, inf  ;;  %v1423_v36 = vsel %vm1422_vm8, %v1418_v14, inf  ;;  %v5451_v19 = vld [vmem:[#allocation12_spill] sm:$0xff]  ;;  %vm1910_vm8 = vcmask 7168  }
 0x267   : > { %1616 = vmin.xlane.f32.xlu1 %v1615_v57  ;;  %1408 = vmin.xlane.f32.xlu0 %v1407_v49  ;;  %v5452_v57 = vld [vmem:[#allocation14_spill] sm:$0xff] }
 0x268   : > { %v4709_v42 = vpop.xlane.xlu1 %1628  ;;  %v4711_v3 = vpop.xlane.xlu0 %1436  ;;  %v1736_v49 = vand.u32 65535, %v5452_v57  ;;  %v1475_v57 = vcvt.f32.s32 %v4590_v58 }
 0x269   : > { %vm1630_vm9 = vcmp.eq.f32.partialorder %v4361_v61, %v4709_v42  ;;  %vm1438_vm10 = vcmp.eq.f32.partialorder %v4363_v35, %v4711_v3  ;;  %v1672_v61 = vand.u32 65535, %v4386_v33  ;;  %v1658_v35 = vcvt.s32.f32 %v1656_v53 }
 0x26a   : > { %v1631_v55 = vsel %vm1630_vm9, %v1626_v54, inf  ;;  %v1439_v13 = vsel %vm1438_vm10, %v1434_v7, inf  ;;  %v1704_v33 = vand.u32 65535, %v5449_v27  ;;  %v5453_v54 = vld [vmem:[#allocation13_spill] sm:$0xff]  ;;  %v1738_v53 = vcvt.s32.f32 %v1736_v49 }
 0x26b   : > { %1632 = vmin.xlane.f32.xlu1 %v1631_v55  ;;  %1424 = vmin.xlane.f32.xlu0 %v1423_v36  ;;  %v1674_v2 = vcvt.s32.f32 %v1672_v61  ;;  %v5454_v55 = vld [vmem:[#allocation16_spill] sm:$0xff]  ;;  %v1786_v27 = vcvt.s32.f32 %v1784_v51 }
 0x26c   : > { %v4718_v40 = vpop.xlane.xlu1 %1644  ;;  %v1706_v47 = vcvt.s32.f32 %v1704_v33  ;;  %v1752_v16 = vand.u32 65535, %v5454_v55  ;;  %v1476_v55 = vshll.u32 %v1475_v57, 16 }
 0x26d   : > { %vm1646_vm11 = vcmp.eq.f32.partialorder %v4374_v60, %v4718_v40  ;;  %v5448_v60 = vld [vmem:[#allocation9_spill] sm:$0xff] }
 0x26e   : > { %v1647_v23 = vsel %vm1646_vm11, %v1642_v0, inf  ;;  %v5455_v0 = vld [vmem:[#allocation15_spill] sm:$0xff]  ;;  %v1754_v61 = vcvt.s32.f32 %v1752_v16 }
 0x26f   : > { %1648 = vmin.xlane.f32.xlu1 %v1647_v23  ;;  %1440 = vmin.xlane.f32.xlu0 %v1439_v13  ;;  %v1768_v23 = vand.u32 65535, %v4446_v31  ;;  %v1800_v31 = vand.u32 65535, %v4466_v1 }
 0x270   : > { %v4723_v20 = vpop.xlane.xlu0 %1660 }
 0x271   : > { %vm1662_vm12 = vcmp.eq.f32.partialorder %v4384_v48, %v4723_v20  ;;  %v1802_v39 = vcvt.s32.f32 %v1800_v31  ;;  %v1523_v31 = vcvt.f32.s32 %v4629_v8  ;;  %v1347_v8 = vcvt.f32.s32 %v4646_v17 }
 0x272   : > { %v1663_v6 = vsel %vm1662_vm12, %v1658_v35, inf  ;;  %v5456_v35 = vld [vmem:[#allocation17_spill] sm:$0xff] }
 0x273   : > { %1664 = vmin.xlane.f32.xlu0 %v1663_v6  ;;  %v1348_v57 = vshll.u32 %v1347_v8, 16 }
 0x274   : > { %v4728_v12 = vpop.xlane.xlu1 %1676 }
 0x275   : > { %vm1678_vm13 = vcmp.eq.f32.partialorder %v5448_v60, %v4728_v12 }
 0x276   : > { %v1679_v43 = vsel %vm1678_vm13, %v1674_v2, inf  ;;  %v1770_v2 = vcvt.s32.f32 %v1768_v23 }
 0x277   : > { %1680 = vmin.xlane.f32.xlu1 %v1679_v43 }
 0x278   : > { %v4733_v24 = vpop.xlane.xlu0 %1692 }
 0x279   : > { %vm1694_vm14 = vcmp.eq.f32.partialorder %v5450_v10, %v4733_v24  ;;  %v5457_v10 = vld [vmem:[#allocation19_spill] sm:$0xff] }
 0x27a   : > { %v1695_v48 = vsel %vm1694_vm14, %v1690_v52, inf }
 0x27b   : > { %1696 = vmin.xlane.f32.xlu0 %v1695_v48  ;;  %v1816_v48 = vand.u32 65535, %v5457_v10 }
 0x27c   : > { %v4738_v56 = vpop.xlane.xlu1 %1708 }
 0x27d   : > { %vm1710_vm15 = vcmp.eq.f32.partialorder %v5451_v19, %v4738_v56  ;;  %v5459_v19 = vld [vmem:[#allocation20_spill] sm:$0xff] }
 0x27e   : > { %v1711_v38 = vsel %vm1710_vm15, %v1706_v47, inf  ;;  %v1818_v47 = vcvt.s32.f32 %v1816_v48  ;;  %v1524_v48 = vshll.u32 %v1523_v31, 16 }
 0x27f   : > { %1712 = vmin.xlane.f32.xlu1 %v1711_v38  ;;  %v1459_v38 = vcvt.f32.s32 %v4578_v29 }
 0x280   : > { %v4743_v34 = vpop.xlane.xlu0 %1724 }
 0x281   : > { %vm1726_vm1 = vcmp.eq.f32.partialorder %v5453_v54, %v4743_v34 }
 0x282   : > { %v1727_v14 = vsel %vm1726_vm1, %v1722_v59, inf  ;;  %v1460_v59 = vshll.u32 %v1459_v38, 16  ;;  %v1832_v38 = vand.u32 65535, %v4634_v41  ;;  %v1571_v41 = vcvt.f32.s32 %v4669_v5 }
 0x283   : > { %1728 = vmin.xlane.f32.xlu0 %v1727_v14 }
 0x284   : > { %v4748_v36 = vpop.xlane.xlu1 %1740 }
 0x285   : > { %vm1742_vm2 = vcmp.eq.f32.partialorder %v5455_v0, %v4748_v36 }
 0x286   : > { %v1743_v7 = vsel %vm1742_vm2, %v1738_v53, inf  ;;  %v1491_v53 = vcvt.f32.s32 %v4603_v37 }
 0x287   : > { %1744 = vmin.xlane.f32.xlu1 %v1743_v7  ;;  %v3404_v7 = vmov 1.0  }
 0x288   : > { %v4753_v13 = vpop.xlane.xlu1 %1756 }
 0x289   : > { %vm1758_vm3 = vcmp.eq.f32.partialorder %v5456_v35, %v4753_v13  ;;  %v1507_v35 = vcvt.f32.s32 %v4615_v21 }
 0x28a   : > { %v1759_v6 = vsel %vm1758_vm3, %v1754_v61, inf  ;;  %v1492_v61 = vshll.u32 %v1491_v53, 16 }
 0x28b   : > { %1760 = vmin.xlane.f32.xlu0 %v1759_v6 }
 0x28c   : > { %v4758_v26 = vpop.xlane.xlu1 %1772 }
 0x28d   : > { %vm1774_vm4 = vcmp.eq.f32.partialorder %v4454_v15, %v4758_v26 }
 0x28e   : > { %v1775_v60 = vsel %vm1774_vm4, %v1770_v2, inf }
 0x28f   : > { %1776 = vmin.xlane.f32.xlu1 %v1775_v60  ;;  %v1508_v60 = vshll.u32 %v1507_v35, 16 }
 0x290   : > { %v4763_v43 = vpop.xlane.xlu1 %1788 }
 0x291   : > { %vm1790_vm5 = vcmp.eq.f32.partialorder %v4464_v9, %v4763_v43 }
 0x292   : > { %v1791_v33 = vsel %vm1790_vm5, %v1786_v27, inf }
 0x293   : > { %1792 = vmin.xlane.f32.xlu0 %v1791_v33 }
 0x294   : > { %v4767_v52 = vpop.xlane.xlu1 %1804 }
 0x295   : > { %vm1806_vm6 = vcmp.eq.f32.partialorder %v5458_v46, %v4767_v52 }
 0x296   : > { %v1807_v15 = vsel %vm1806_vm6, %v1802_v39, inf  ;;  %v1539_v39 = vcvt.f32.s32 %v4644_v50 }
 0x297   : > { %1808 = vmin.xlane.f32.xlu1 %v1807_v15 }
 0x298   : > { %v4772_v1 = vpop.xlane.xlu1 %1820  ;;  %v1540_v50 = vshll.u32 %v1539_v39, 16 }
 0x299   : > { %vm1822_vm7 = vcmp.eq.f32.partialorder %v5459_v19, %v4772_v1  ;;  %v1555_v19 = vcvt.f32.s32 %v4656_v44 }
 0x29a   : > { %v1823_v9 = vsel %vm1822_vm7, %v1818_v47, inf }
 0x29b   : > { %1824 = vmin.xlane.f32.xlu0 %v1823_v9  ;;  %v1556_v44 = vshll.u32 %v1555_v19, 16 }
 0x2cc   : > { %v1457_v49 = vpop.xlane.xlu0 %1456 }
 0x2cd   : > { %v1458_v54 = vcvt.f32.s32 %v1457_v49 }
 0x2cf   : > { %v1461_v14 = vadd.s32 %v1460_v59, %v1458_v54 }
 0x2d0   : > { %v1473_v16 = vpop.xlane.xlu0 %1472 }
 0x2d1   : > { %v1474_v0 = vcvt.f32.s32 %v1473_v16  ;;  %vm1860_vm9 = vcmp.lt.s32.totalorder %v1461_v14, 255  ;;  %v1363_v16 = vcvt.f32.s32 %v4658_v25 }
 0x2d2   : > { %v1861_v29 = vsel %vm1860_vm9, %v1461_v14, 255 }
 0x2d3   : > { %v1477_v58 = vadd.s32 %v1476_v55, %v1474_v0  ;;  %1918 = vst.msk [vmem:[%s4782_s18 + $0x38] sm:$0xff] %vm1910_vm8, %v1861_v29  ;;  %vm1958_vm10 = vcmp.eq.s32.totalorder %v4166_v45, %v1861_v29  ;;  %vm1957_vm11 = vcmp.eq.s32.totalorder %v4163_v28, %v1861_v29  ;;  %v1834_v29 = vcvt.s32.f32 %v1832_v38 }
 0x2d4   : > { %3074 = vmatprep.mubr.msk.f32.mxu1 %vm1958_vm10, %v3404_v7  ;;  %v1489_v23 = vpop.xlane.xlu0 %1488  ;;  %v1364_v35 = vshll.u32 %v1363_v16, 16  ;;  %v1619_v38 = vcvt.f32.s32 %v4699_v11 }
 0x2d5   : > { %vm1862_vm12 = vcmp.lt.s32.totalorder %v1477_v58, 255  ;;  %v1490_v37 = vcvt.f32.s32 %v1489_v23  ;;  %3075 = vmatmul.mubr.msk.f32.vlgmr.msra.gmra.mrb[0].mxu1 %vm1957_vm11, %v3404_v7 }
 0x2d6   : > { %v1863_v6 = vsel %vm1862_vm12, %v1477_v58, 255 }
 0x2d7   : > { %1919 = vst.msk [vmem:[%s4782_s18 + $0x40] sm:$0xff] %vm1910_vm8, %v1863_v6  ;;  %v1493_v51 = vadd.s32 %v1492_v61, %v1490_v37  ;;  %vm1960_vm13 = vcmp.eq.s32.totalorder %v4166_v45, %v1863_v6  ;;  %vm1959_vm14 = vcmp.eq.s32.totalorder %v4163_v28, %v1863_v6  ;;  %v1587_v37 = vcvt.f32.s32 %v4679_v18 }
 0x2d8   : > { %3076 = vmatprep.mubr.msk.f32.mxu1 %vm1960_vm13, %v3404_v7  ;;  %v1505_v2 = vpop.xlane.xlu0 %1504 }
 0x2d9   : > { %vm1864_vm15 = vcmp.lt.s32.totalorder %v1493_v51, 255  ;;  %v1506_v21 = vcvt.f32.s32 %v1505_v2  ;;  %3077 = vmatmul.mubr.msk.f32.gmra.mrb[2].mxu1 %vm1959_vm14, %v3404_v7  ;;  %v1572_v2 = vshll.u32 %v1571_v41, 16  ;;  %v1588_v39 = vshll.u32 %v1587_v37, 16 }
 0x2da   : > { %v1865_v27 = vsel %vm1864_vm15, %v1493_v51, 255  ;;  %v1620_v41 = vshll.u32 %v1619_v38, 16 }
 0x2db   : > { %1920 = vst.msk [vmem:[%s4782_s18 + $0x48] sm:$0xff] %vm1910_vm8, %v1865_v27  ;;  %v1509_v33 = vadd.s32 %v1508_v60, %v1506_v21  ;;  %vm1962_vm1 = vcmp.eq.s32.totalorder %v4166_v45, %v1865_v27  ;;  %vm1961_vm2 = vcmp.eq.s32.totalorder %v4163_v28, %v1865_v27 }
 0x2dc   : > { %3078 = vmatprep.mubr.msk.f32.mxu1 %vm1962_vm1, %v3404_v7  ;;  %v1521_v10 = vpop.xlane.xlu0 %1520 }
 0x2dd   : > { %vm1866_vm3 = vcmp.lt.s32.totalorder %v1509_v33, 255  ;;  %v1522_v46 = vcvt.f32.s32 %v1521_v10  ;;  %3079 = vmatmul.mubr.msk.f32.gmra.mrb[4].mxu1 %vm1961_vm2, %v3404_v7  ;;  %v1603_v10 = vcvt.f32.s32 %v4689_v32 }
 0x2de   : > { %v1867_v15 = vsel %vm1866_vm3, %v1509_v33, 255 }
 0x2df   : > { %1921 = vst.msk [vmem:[%s4782_s18 + $0x50] sm:$0xff] %vm1910_vm8, %v1867_v15  ;;  %v1525_v47 = vadd.s32 %v1524_v48, %v1522_v46  ;;  %vm1964_vm4 = vcmp.eq.s32.totalorder %v4166_v45, %v1867_v15  ;;  %vm1963_vm5 = vcmp.eq.s32.totalorder %v4163_v28, %v1867_v15 }
 0x2e0   : > { %v1345_v9 = vpop.xlane.xlu1 %1344  ;;  %3080 = vmatprep.mubr.msk.f32.mxu1 %vm1964_vm4, %v3404_v7  ;;  %v1537_v17 = vpop.xlane.xlu0 %1536 }
 0x2e1   : > { %vm1868_vm6 = vcmp.lt.s32.totalorder %v1525_v47, 255  ;;  %v1346_v49 = vcvt.f32.s32 %v1345_v9  ;;  %v1538_v59 = vcvt.f32.s32 %v1537_v17  ;;  %3081 = vmatmul.mubr.msk.f32.gmra.mrb[6].mxu1 %vm1963_vm5, %v3404_v7  ;;  %v1604_v17 = vshll.u32 %v1603_v10, 16 }
 0x2e2   : > { %v1869_v54 = vsel %vm1868_vm6, %v1525_v47, 255  ;;  %v1411_v47 = vcvt.f32.s32 %v4691_v62 }
 0x2e3   : > { %1922 = vst.msk [vmem:[%s4782_s18 + $0x58] sm:$0xff] %vm1910_vm8, %v1869_v54  ;;  %v1349_v14 = vadd.s32 %v1348_v57, %v1346_v49  ;;  %v1541_v55 = vadd.s32 %v1540_v50, %v1538_v59  ;;  %vm1966_vm7 = vcmp.eq.s32.totalorder %v4166_v45, %v1869_v54  ;;  %vm1965_vm9 = vcmp.eq.s32.totalorder %v4163_v28, %v1869_v54 }
 0x2e4   : > { %v1553_v53 = vpop.xlane.xlu1 %1552  ;;  %3082 = vmatprep.mubr.msk.f32.mxu1 %vm1966_vm7, %v3404_v7  ;;  %v4822_v0 = vpop.xlane.xlu0 %1836  ;;  %v1412_v11 = vshll.u32 %v1411_v47, 16  ;;  %v1427_v54 = vcvt.f32.s32 %v4701_v22 }
 0x2e5   : > { %vm1846_vm10 = vcmp.lt.s32.totalorder %v1349_v14, 255  ;;  %vm1870_vm11 = vcmp.lt.s32.totalorder %v1541_v55, 255  ;;  %v1554_v58 = vcvt.f32.s32 %v1553_v53  ;;  %vm1838_vm12 = vcmp.eq.f32.partialorder %v4662_v30, %v4822_v0  ;;  %3083 = vmatmul.mubr.msk.f32.gmra.mrb[8].mxu1 %vm1965_vm9, %v3404_v7 }
 0x2e6   : > { %v1847_v23 = vsel %vm1846_vm10, %v1349_v14, 255  ;;  %v1871_v61 = vsel %vm1870_vm11, %v1541_v55, 255  ;;  %v1839_v25 = vsel %vm1838_vm12, %v1834_v29, inf  ;;  %v1379_v30 = vcvt.f32.s32 %v4671_v63 }
 0x2e7   : > { %1911 = vst.msk [vmem:[%s4782_s18] sm:$0xff] %vm1910_vm8, %v1847_v23  ;;  %vm1943_vm13 = vcmp.eq.s32.totalorder %v4163_v28, %v1847_v23  ;;  %1923 = vst.msk [vmem:[%s4782_s18 + $0x60] sm:$0xff] %vm1910_vm8, %v1871_v61  ;;  %v1557_v5 = vadd.s32 %v1556_v44, %v1554_v58  ;;  %1840 = vmin.xlane.f32.xlu1 %v1839_v25  ;;  %vm1944_vm14 = vcmp.eq.s32.totalorder %v4166_v45, %v1847_v23 }
 0x2e8   : > { %vm1968_vm15 = vcmp.eq.s32.totalorder %v4166_v45, %v1871_v61  ;;  %3060 = vmatprep.mubr.msk.f32.mxu0 %vm1944_vm14, %v3404_v7  ;;  %v1569_v6 = vpop.xlane.xlu1 %1568  ;;  %v1361_v51 = vpop.xlane.xlu0 %1360  ;;  %vm1967_vm1 = vcmp.eq.s32.totalorder %v4163_v28, %v1871_v61  ;;  %v1395_v63 = vcvt.f32.s32 %v4681_v4  ;;  %v1380_v33 = vshll.u32 %v1379_v30, 16 }
 0x2e9   : > { %3084 = vmatprep.mubr.msk.f32.mxu1 %vm1968_vm15, %v3404_v7  ;;  %vm1872_vm2 = vcmp.lt.s32.totalorder %v1557_v5, 255  ;;  %v1570_v60 = vcvt.f32.s32 %v1569_v6  ;;  %v1362_v31 = vcvt.f32.s32 %v1361_v51  ;;  %3061 = vmatmul.mubr.msk.f32.vlgmr.msra.gmra.mrb[64].mxu0 %vm1943_vm13, %v3404_v7  ;;  %v1635_v53 = vcvt.f32.s32 %v4709_v42 }
 0x2ea   : > { %3085 = vmatmul.mubr.msk.f32.gmra.mrb[10].mxu1 %vm1967_vm1, %v3404_v7  ;;  %v1873_v18 = vsel %vm1872_vm2, %v1557_v5, 255  ;;  %v1396_v15 = vshll.u32 %v1395_v63, 16  ;;  %v1428_v42 = vshll.u32 %v1427_v54, 16  ;;  %v1443_v61 = vcvt.f32.s32 %v4711_v3 }
 0x2eb   : > { %1924 = vst.msk [vmem:[%s4782_s18 + $0x68] sm:$0xff] %vm1910_vm8, %v1873_v18  ;;  %v1573_v21 = vadd.s32 %v1572_v2, %v1570_v60  ;;  %v1365_v27 = vadd.s32 %v1364_v35, %v1362_v31  ;;  %vm1970_vm3 = vcmp.eq.s32.totalorder %v4166_v45, %v1873_v18  ;;  %vm1969_vm4 = vcmp.eq.s32.totalorder %v4163_v28, %v1873_v18 }
 0x2ec   : > { %v1585_v48 = vpop.xlane.xlu1 %1584  ;;  %3086 = vmatprep.mubr.msk.f32.mxu1 %vm1970_vm3, %v3404_v7  ;;  %v1377_v8 = vpop.xlane.xlu0 %1376  ;;  %v1636_v37 = vshll.u32 %v1635_v53, 16  ;;  %v1651_v6 = vcvt.f32.s32 %v4718_v40  ;;  %v1444_v40 = vshll.u32 %v1443_v61, 16  ;;  %v1747_v61 = vcvt.f32.s32 %v4748_v36 }
 0x2ed   : > { %vm1874_vm5 = vcmp.lt.s32.totalorder %v1573_v21, 255  ;;  %vm1848_vm6 = vcmp.lt.s32.totalorder %v1365_v27, 255  ;;  %v1586_v4 = vcvt.f32.s32 %v1585_v48  ;;  %v1378_v46 = vcvt.f32.s32 %v1377_v8 }
 0x2ee   : > { %3087 = vmatmul.mubr.msk.f32.gmra.mrb[12].mxu1 %vm1969_vm4, %v3404_v7  ;;  %v1875_v50 = vsel %vm1874_vm5, %v1573_v21, 255  ;;  %v1849_v19 = vsel %vm1848_vm6, %v1365_v27, 255  ;;  %v1652_v27 = vshll.u32 %v1651_v6, 16 }
 0x2ef   : > { %1925 = vst.msk [vmem:[%s4782_s18 + $0x70] sm:$0xff] %vm1910_vm8, %v1875_v50  ;;  %1912 = vst.msk [vmem:[%s4782_s18 + $0x8] sm:$0xff] %vm1910_vm8, %v1849_v19  ;;  %v1589_v32 = vadd.s32 %v1588_v39, %v1586_v4  ;;  %v1381_v9 = vadd.s32 %v1380_v33, %v1378_v46  ;;  %vm1946_vm7 = vcmp.eq.s32.totalorder %v4166_v45, %v1849_v19  ;;  %v1667_v33 = vcvt.f32.s32 %v4723_v20 }
 0x2f0   : > { %vm1972_vm9 = vcmp.eq.s32.totalorder %v4166_v45, %v1875_v50  ;;  %v1601_v57 = vpop.xlane.xlu1 %1600  ;;  %3062 = vmatprep.mubr.msk.f32.mxu0 %vm1946_vm7, %v3404_v7  ;;  %v1393_v62 = vpop.xlane.xlu0 %1392  ;;  %vm1945_vm10 = vcmp.eq.s32.totalorder %v4163_v28, %v1849_v19  ;;  %vm1971_vm11 = vcmp.eq.s32.totalorder %v4163_v28, %v1875_v50  ;;  %v1683_v19 = vcvt.f32.s32 %v4728_v12 }
 0x2f1   : > { %3088 = vmatprep.mubr.msk.f32.mxu1 %vm1972_vm9, %v3404_v7  ;;  %vm1876_vm12 = vcmp.lt.s32.totalorder %v1589_v32, 255  ;;  %vm1850_vm13 = vcmp.lt.s32.totalorder %v1381_v9, 255  ;;  %v1602_v49 = vcvt.f32.s32 %v1601_v57  ;;  %v1394_v59 = vcvt.f32.s32 %v1393_v62  ;;  %3063 = vmatmul.mubr.msk.f32.gmra.mrb[66].mxu0 %vm1945_vm10, %v3404_v7 }
 0x2f2   : > { %3089 = vmatmul.mubr.msk.f32.gmra.mrb[14].mxu1 %vm1971_vm11, %v3404_v7  ;;  %v1877_v14 = vsel %vm1876_vm12, %v1589_v32, 255  ;;  %v1851_v55 = vsel %vm1850_vm13, %v1381_v9, 255  ;;  %v1668_v47 = vshll.u32 %v1667_v33, 16  ;;  %v1684_v57 = vshll.u32 %v1683_v19, 16 }
 0x2f3   : > { %1926 = vst.msk [vmem:[%s4782_s18 + $0x78] sm:$0xff] %vm1910_vm8, %v1877_v14  ;;  %1913 = vst.msk [vmem:[%s4782_s18 + $0x10] sm:$0xff] %vm1910_vm8, %v1851_v55  ;;  %v1605_v44 = vadd.s32 %v1604_v17, %v1602_v49  ;;  %v1397_v16 = vadd.s32 %v1396_v15, %v1394_v59  ;;  %vm1948_vm14 = vcmp.eq.s32.totalorder %v4166_v45, %v1851_v55  ;;  %v1699_v62 = vcvt.f32.s32 %v4733_v24 }
 0x2f4   : > { %vm1974_vm15 = vcmp.eq.s32.totalorder %v4166_v45, %v1877_v14  ;;  %v1617_v29 = vpop.xlane.xlu1 %1616  ;;  %3064 = vmatprep.mubr.msk.f32.mxu0 %vm1948_vm14, %v3404_v7  ;;  %v1409_v22 = vpop.xlane.xlu0 %1408  ;;  %vm1947_vm1 = vcmp.eq.s32.totalorder %v4163_v28, %v1851_v55  ;;  %vm1973_vm2 = vcmp.eq.s32.totalorder %v4163_v28, %v1877_v14  ;;  %v1715_v24 = vcvt.f32.s32 %v4738_v56 }
 0x2f5   : > { %3090 = vmatprep.mubr.msk.f32.mxu1 %vm1974_vm15, %v3404_v7  ;;  %vm1878_vm3 = vcmp.lt.s32.totalorder %v1605_v44, 255  ;;  %vm1852_vm4 = vcmp.lt.s32.totalorder %v1397_v16, 255  ;;  %v1618_v58 = vcvt.f32.s32 %v1617_v29  ;;  %v1410_v23 = vcvt.f32.s32 %v1409_v22  ;;  %3065 = vmatmul.mubr.msk.f32.gmra.mrb[68].mxu0 %vm1947_vm1, %v3404_v7 }
 0x2f6   : > { %3091 = vmatmul.mubr.msk.f32.gmra.mrb[16].mxu1 %vm1973_vm2, %v3404_v7  ;;  %v1879_v25 = vsel %vm1878_vm3, %v1605_v44, 255  ;;  %v1853_v5 = vsel %vm1852_vm4, %v1397_v16, 255  ;;  %v1700_v14 = vshll.u32 %v1699_v62, 16  ;;  %v1716_v53 = vshll.u32 %v1715_v24, 16 }
 0x2f7   : > { %1927 = vst.msk [vmem:[%s4782_s18 + $0x80] sm:$0xff] %vm1910_vm8, %v1879_v25  ;;  %1914 = vst.msk [vmem:[%s4782_s18 + $0x18] sm:$0xff] %vm1910_vm8, %v1853_v5  ;;  %v1621_v35 = vadd.s32 %v1620_v41, %v1618_v58  ;;  %v1413_v30 = vadd.s32 %v1412_v11, %v1410_v23  ;;  %vm1950_vm5 = vcmp.eq.s32.totalorder %v4166_v45, %v1853_v5  ;;  %v1731_v29 = vcvt.f32.s32 %v4743_v34 }
 0x2f8   : > { %vm1976_vm6 = vcmp.eq.s32.totalorder %v4166_v45, %v1879_v25  ;;  %v1633_v51 = vpop.xlane.xlu1 %1632  ;;  %3066 = vmatprep.mubr.msk.f32.mxu0 %vm1950_vm5, %v3404_v7  ;;  %v1425_v3 = vpop.xlane.xlu0 %1424  ;;  %vm1949_vm7 = vcmp.eq.s32.totalorder %v4163_v28, %v1853_v5  ;;  %vm1975_vm9 = vcmp.eq.s32.totalorder %v4163_v28, %v1879_v25 }
 0x2f9   : > { %3092 = vmatprep.mubr.msk.f32.mxu1 %vm1976_vm6, %v3404_v7  ;;  %vm1880_vm10 = vcmp.lt.s32.totalorder %v1621_v35, 255  ;;  %vm1854_vm11 = vcmp.lt.s32.totalorder %v1413_v30, 255  ;;  %v1634_v2 = vcvt.f32.s32 %v1633_v51  ;;  %v1426_v60 = vcvt.f32.s32 %v1425_v3  ;;  %3067 = vmatmul.mubr.msk.f32.gmra.mrb[70].mxu0 %vm1949_vm7, %v3404_v7 }
 0x2fa   : > { %3093 = vmatmul.mubr.msk.f32.gmra.mrb[18].mxu1 %vm1975_vm9, %v3404_v7  ;;  %v1881_v31 = vsel %vm1880_vm10, %v1621_v35, 255  ;;  %v1855_v63 = vsel %vm1854_vm11, %v1413_v30, 255  ;;  %v1748_v30 = vshll.u32 %v1747_v61, 16 }
 0x2fb   : > { %1928 = vst.msk [vmem:[%s4782_s18 + $0x88] sm:$0xff] %vm1910_vm8, %v1881_v31  ;;  %1915 = vst.msk [vmem:[%s4782_s18 + $0x20] sm:$0xff] %vm1910_vm8, %v1855_v63  ;;  %v1637_v18 = vadd.s32 %v1636_v37, %v1634_v2  ;;  %v1429_v21 = vadd.s32 %v1428_v42, %v1426_v60  ;;  %vm1952_vm12 = vcmp.eq.s32.totalorder %v4166_v45, %v1855_v63  ;;  %v1732_v42 = vshll.u32 %v1731_v29, 16 }
 0x2fc   : > { %vm1978_vm13 = vcmp.eq.s32.totalorder %v4166_v45, %v1881_v31  ;;  %v1649_v39 = vpop.xlane.xlu1 %1648  ;;  %3068 = vmatprep.mubr.msk.f32.mxu0 %vm1952_vm12, %v3404_v7  ;;  %v1441_v10 = vpop.xlane.xlu0 %1440  ;;  %vm1951_vm14 = vcmp.eq.s32.totalorder %v4163_v28, %v1855_v63  ;;  %vm1977_vm15 = vcmp.eq.s32.totalorder %v4163_v28, %v1881_v31  ;;  %v1763_v37 = vcvt.f32.s32 %v4753_v13 }
 0x2fd   : > { %3094 = vmatprep.mubr.msk.f32.mxu1 %vm1978_vm13, %v3404_v7  ;;  %vm1882_vm1 = vcmp.lt.s32.totalorder %v1637_v18, 255  ;;  %vm1856_vm2 = vcmp.lt.s32.totalorder %v1429_v21, 255  ;;  %v1650_v48 = vcvt.f32.s32 %v1649_v39  ;;  %v1442_v8 = vcvt.f32.s32 %v1441_v10  ;;  %3069 = vmatmul.mubr.msk.f32.gmra.mrb[72].mxu0 %vm1951_vm14, %v3404_v7 }
 0x2fe   : > { %3095 = vmatmul.mubr.msk.f32.gmra.mrb[20].mxu1 %vm1977_vm15, %v3404_v7  ;;  %v1883_v20 = vsel %vm1882_vm1, %v1637_v18, 255  ;;  %v1857_v4 = vsel %vm1856_vm2, %v1429_v21, 255  ;;  %v1764_v2 = vshll.u32 %v1763_v37, 16  ;;  %v1779_v60 = vcvt.f32.s32 %v4758_v26 }
 0x2ff   : > { %1929 = vst.msk [vmem:[%s4782_s18 + $0x90] sm:$0xff] %vm1910_vm8, %v1883_v20  ;;  %1916 = vst.msk [vmem:[%s4782_s18 + $0x28] sm:$0xff] %vm1910_vm8, %v1857_v4  ;;  %v1653_v46 = vadd.s32 %v1652_v27, %v1650_v48  ;;  %v1445_v15 = vadd.s32 %v1444_v40, %v1442_v8  ;;  %vm1954_vm3 = vcmp.eq.s32.totalorder %v4166_v45, %v1857_v4  ;;  %v1795_v21 = vcvt.f32.s32 %v4763_v43 }
 0x300   : > { %vm1980_vm4 = vcmp.eq.s32.totalorder %v4166_v45, %v1883_v20  ;;  %3070 = vmatprep.mubr.msk.f32.mxu0 %vm1954_vm3, %v3404_v7  ;;  %v1665_v50 = vpop.xlane.xlu0 %1664  ;;  %vm1953_vm5 = vcmp.eq.s32.totalorder %v4163_v28, %v1857_v4  ;;  %vm1979_vm6 = vcmp.eq.s32.totalorder %v4163_v28, %v1883_v20  ;;  %v1780_v18 = vshll.u32 %v1779_v60, 16 }
 0x301   : > { %3096 = vmatprep.mubr.msk.f32.mxu1 %vm1980_vm4, %v3404_v7  ;;  %vm1884_vm7 = vcmp.lt.s32.totalorder %v1653_v46, 255  ;;  %vm1858_vm9 = vcmp.lt.s32.totalorder %v1445_v15, 255  ;;  %v1666_v32 = vcvt.f32.s32 %v1665_v50  ;;  %3071 = vmatmul.mubr.msk.f32.gmra.mrb[74].mxu0 %vm1953_vm5, %v3404_v7  ;;  %v1796_v10 = vshll.u32 %v1795_v21, 16 }
 0x302   : > { %3097 = vmatmul.mubr.msk.f32.gmra.mrb[22].mxu1 %vm1979_vm6, %v3404_v7  ;;  %v1885_v9 = vsel %vm1884_vm7, %v1653_v46, 255  ;;  %v1859_v17 = vsel %vm1858_vm9, %v1445_v15, 255  ;;  %v1811_v48 = vcvt.f32.s32 %v4767_v52  ;;  %v1827_v15 = vcvt.f32.s32 %v4772_v1 }
 0x303   : > { %1930 = vst.msk [vmem:[%s4782_s18 + $0x98] sm:$0xff] %vm1910_vm8, %v1885_v9  ;;  %1917 = vst.msk [vmem:[%s4782_s18 + $0x30] sm:$0xff] %vm1910_vm8, %v1859_v17  ;;  %v1669_v38 = vadd.s32 %v1668_v47, %v1666_v32  ;;  %vm1956_vm10 = vcmp.eq.s32.totalorder %v4166_v45, %v1859_v17  ;;  %vm1982_vm11 = vcmp.eq.s32.totalorder %v4166_v45, %v1885_v9 }
 0x304   : > { %vm1955_vm12 = vcmp.eq.s32.totalorder %v4163_v28, %v1859_v17  ;;  %v1681_v12 = vpop.xlane.xlu1 %1680  ;;  %3072 = vmatprep.mubr.msk.f32.mxu0 %vm1956_vm10, %v3404_v7  ;;  %3098 = vmatprep.mubr.msk.f32.mxu1 %vm1982_vm11, %v3404_v7  ;;  %vm1981_vm13 = vcmp.eq.s32.totalorder %v4163_v28, %v1885_v9  ;;  %v1812_v46 = vshll.u32 %v1811_v48, 16  ;;  %v1828_v32 = vshll.u32 %v1827_v15, 16 }
 0x305   : > { %vm1886_vm14 = vcmp.lt.s32.totalorder %v1669_v38, 255  ;;  %v1682_v49 = vcvt.f32.s32 %v1681_v12  ;;  %3073 = vmatmul.mubr.msk.f32.gmra.mrb[76].mxu0 %vm1955_vm12, %v3404_v7  ;;  %v1843_v12 = vcvt.f32.s32 %v4822_v0 }
 0x306   : > { %3099 = vmatmul.mubr.msk.f32.gmra.mrb[24].mxu1 %vm1981_vm13, %v3404_v7  ;;  %v1887_v59 = vsel %vm1886_vm14, %v1669_v38, 255 }
 0x307   : > { %1931 = vst.msk [vmem:[%s4782_s18 + $0xa0] sm:$0xff] %vm1910_vm8, %v1887_v59  ;;  %v1685_v11 = vadd.s32 %v1684_v57, %v1682_v49  ;;  %vm1984_vm15 = vcmp.eq.s32.totalorder %v4166_v45, %v1887_v59  ;;  %vm1983_vm1 = vcmp.eq.s32.totalorder %v4163_v28, %v1887_v59  ;;  %v1844_v62 = vshll.u32 %v1843_v12, 16 }
 0x308   : > { %3100 = vmatprep.mubr.msk.f32.mxu1 %vm1984_vm15, %v3404_v7  ;;  %v1697_v54 = vpop.xlane.xlu0 %1696 }
 0x309   : > { %vm1888_vm2 = vcmp.lt.s32.totalorder %v1685_v11, 255  ;;  %v1698_v55 = vcvt.f32.s32 %v1697_v54 }
 0x30a   : > { %3101 = vmatmul.mubr.msk.f32.gmra.mrb[26].mxu1 %vm1983_vm1, %v3404_v7  ;;  %v1889_v44 = vsel %vm1888_vm2, %v1685_v11, 255 }
 0x30b   : > { %1932 = vst.msk [vmem:[%s4782_s18 + $0xa8] sm:$0xff] %vm1910_vm8, %v1889_v44  ;;  %v1701_v16 = vadd.s32 %v1700_v14, %v1698_v55  ;;  %vm1986_vm3 = vcmp.eq.s32.totalorder %v4166_v45, %v1889_v44  ;;  %vm1985_vm4 = vcmp.eq.s32.totalorder %v4163_v28, %v1889_v44 }
 0x30c   : > { %v1713_v41 = vpop.xlane.xlu1 %1712  ;;  %3102 = vmatprep.mubr.msk.f32.mxu1 %vm1986_vm3, %v3404_v7 }
 0x30d   : > { %vm1890_vm5 = vcmp.lt.s32.totalorder %v1701_v16, 255  ;;  %v1714_v56 = vcvt.f32.s32 %v1713_v41 }
 0x30e   : > { %3103 = vmatmul.mubr.msk.f32.gmra.mrb[28].mxu1 %vm1985_vm4, %v3404_v7  ;;  %v1891_v22 = vsel %vm1890_vm5, %v1701_v16, 255 }
 0x30f   : > { %1933 = vst.msk [vmem:[%s4782_s18 + $0xb0] sm:$0xff] %vm1910_vm8, %v1891_v22  ;;  %v1717_v58 = vadd.s32 %v1716_v53, %v1714_v56  ;;  %vm1988_vm6 = vcmp.eq.s32.totalorder %v4166_v45, %v1891_v22  ;;  %vm1987_vm7 = vcmp.eq.s32.totalorder %v4163_v28, %v1891_v22  ;;  %v5460_v22 = vld [vmem:[#allocation8_spill] sm:$0xff] }
 0x310   : > { %3104 = vmatprep.mubr.msk.f32.mxu1 %vm1988_vm6, %v3404_v7  ;;  %v1729_v23 = vpop.xlane.xlu0 %1728 }
 0x311   : > { %vm1892_vm9 = vcmp.lt.s32.totalorder %v1717_v58, 255  ;;  %v1730_v34 = vcvt.f32.s32 %v1729_v23  ;;  %v5053_v23 = vstv %s3124_s16 }
 0x312   : > { %3105 = vmatmul.mubr.msk.f32.gmra.mrb[30].mxu1 %vm1987_vm7, %v3404_v7  ;;  %v1893_v25 = vsel %vm1892_vm9, %v1717_v58, 255  ;;  %v2426_v58 = vadd.s32 8, %v5460_v22 }
 0x313   : > { %1934 = vst.msk [vmem:[%s4782_s18 + $0xb8] sm:$0xff] %vm1910_vm8, %v1893_v25  ;;  %v1733_v5 = vadd.s32 %v1732_v42, %v1730_v34  ;;  %vm1990_vm10 = vcmp.eq.s32.totalorder %v4166_v45, %v1893_v25  ;;  %vm1989_vm11 = vcmp.eq.s32.totalorder %v4163_v28, %v1893_v25  ;;  %v3274_v42 = vld [vmem:[%s3529_s20] sm:$0xff]  ;;  %v2459_v34 = vadd.s32 %v5053_v23, %v5460_v22 }
 0x314   : > { %v1745_v35 = vpop.xlane.xlu1 %1744  ;;  %3106 = vmatprep.mubr.msk.f32.mxu1 %vm1990_vm10, %v3404_v7 }
 0x315   : > { %vm1894_vm12 = vcmp.lt.s32.totalorder %v1733_v5, 255  ;;  %v1746_v36 = vcvt.f32.s32 %v1745_v35  ;;  %v2427_v35 = vadd.s32 16, %v5460_v22 }
 0x316   : > { %3107 = vmatmul.mubr.msk.f32.gmra.mrb[32].mxu1 %vm1989_vm11, %v3404_v7  ;;  %v1895_v6 = vsel %vm1894_vm12, %v1733_v5, 255 }
 0x317   : > { %1935 = vst.msk [vmem:[%s4782_s18 + $0xc0] sm:$0xff] %vm1910_vm8, %v1895_v6  ;;  %v1749_v51 = vadd.s32 %v1748_v30, %v1746_v36  ;;  %vm1992_vm13 = vcmp.eq.s32.totalorder %v4166_v45, %v1895_v6  ;;  %vm1991_vm14 = vcmp.eq.s32.totalorder %v4163_v28, %v1895_v6  ;;  %v2460_v30 = vadd.s32 %v5053_v23, %v2426_v58 }
 0x318   : > { %3108 = vmatprep.mubr.msk.f32.mxu1 %vm1992_vm13, %v3404_v7  ;;  %v1761_v3 = vpop.xlane.xlu0 %1760 }
 0x319   : > { %vm1896_vm15 = vcmp.lt.s32.totalorder %v1749_v51, 255  ;;  %v1762_v13 = vcvt.f32.s32 %v1761_v3 }
 0x31a   : > { %3109 = vmatmul.mubr.msk.f32.gmra.mrb[34].mxu1 %vm1991_vm14, %v3404_v7  ;;  %v1897_v40 = vsel %vm1896_vm15, %v1749_v51, 255  ;;  %v3275_v51 = vld [vmem:[%s3529_s20 + $0x8] sm:$0xff] }
 0x31b   : > { %1936 = vst.msk [vmem:[%s4782_s18 + $0xc8] sm:$0xff] %vm1910_vm8, %v1897_v40  ;;  %v1765_v31 = vadd.s32 %v1764_v2, %v1762_v13  ;;  %vm1994_vm1 = vcmp.eq.s32.totalorder %v4166_v45, %v1897_v40  ;;  %vm1993_vm2 = vcmp.eq.s32.totalorder %v4163_v28, %v1897_v40  ;;  %v2461_v13 = vadd.s32 %v5053_v23, %v2427_v35  ;;  %v3279_v35 = vld [vmem:[%s3529_s20 + $0x38] sm:$0xff] }
 0x31c   : > { %v1777_v63 = vpop.xlane.xlu1 %1776  ;;  %3110 = vmatprep.mubr.msk.f32.mxu1 %vm1994_vm1, %v3404_v7  ;;  %v2428_v40 = vadd.s32 24, %v5460_v22 }
 0x31d   : > { %vm1898_vm3 = vcmp.lt.s32.totalorder %v1765_v31, 255  ;;  %v1778_v26 = vcvt.f32.s32 %v1777_v63 }
 0x31e   : > { %3111 = vmatmul.mubr.msk.f32.gmra.mrb[36].mxu1 %vm1993_vm2, %v3404_v7  ;;  %v1899_v27 = vsel %vm1898_vm3, %v1765_v31, 255 }
 0x31f   : > { %1937 = vst.msk [vmem:[%s4782_s18 + $0xd0] sm:$0xff] %vm1910_vm8, %v1899_v27  ;;  %v1781_v33 = vadd.s32 %v1780_v18, %v1778_v26  ;;  %vm1996_vm4 = vcmp.eq.s32.totalorder %v4166_v45, %v1899_v27  ;;  %vm1995_vm5 = vcmp.eq.s32.totalorder %v4163_v28, %v1899_v27  ;;  %v3276_v27 = vld [vmem:[%s3529_s20 + $0x10] sm:$0xff] }
 0x320   : > { %3112 = vmatprep.mubr.msk.f32.mxu1 %vm1996_vm4, %v3404_v7  ;;  %v1793_v39 = vpop.xlane.xlu0 %1792 }
 0x321   : > { %vm1900_vm6 = vcmp.lt.s32.totalorder %v1781_v33, 255  ;;  %v1794_v43 = vcvt.f32.s32 %v1793_v39 }
 0x322   : > { %3113 = vmatmul.mubr.msk.f32.gmra.mrb[38].mxu1 %vm1995_vm5, %v3404_v7  ;;  %v1901_v8 = vsel %vm1900_vm6, %v1781_v33, 255 }
 0x323   : > { %1938 = vst.msk [vmem:[%s4782_s18 + $0xd8] sm:$0xff] %vm1910_vm8, %v1901_v8  ;;  %v1797_v20 = vadd.s32 %v1796_v10, %v1794_v43  ;;  %vm1998_vm7 = vcmp.eq.s32.totalorder %v4166_v45, %v1901_v8  ;;  %vm1997_vm9 = vcmp.eq.s32.totalorder %v4163_v28, %v1901_v8  ;;  %v2462_v8 = vadd.s32 %v5053_v23, %v2428_v40  ;;  %v3281_v40 = vld [vmem:[%s3529_s20 + $0x40] sm:$0xff] }
 0x324   : > { %v1809_v4 = vpop.xlane.xlu1 %1808  ;;  %3114 = vmatprep.mubr.msk.f32.mxu1 %vm1998_vm7, %v3404_v7  ;;  %vm2492_vm7 = vcmp.lt.s32.totalorder %v2460_v30, 512 }
 0x325   : > { %vm1902_vm10 = vcmp.lt.s32.totalorder %v1797_v20, 255  ;;  %v1810_v52 = vcvt.f32.s32 %v1809_v4 }
 0x326   : > { %3115 = vmatmul.mubr.msk.f32.gmra.mrb[40].mxu1 %vm1997_vm9, %v3404_v7  ;;  %v1903_v47 = vsel %vm1902_vm10, %v1797_v20, 255  ;;  %vm2493_vm9 = vcmp.lt.s32.totalorder %v2461_v13, 512  ;;  %v2429_v20 = vadd.s32 32, %v5460_v22  ;;  %vm2494_vm10 = vcmp.lt.s32.totalorder %v2462_v8, 512 }
 0x327   : > { %1939 = vst.msk [vmem:[%s4782_s18 + $0xe0] sm:$0xff] %vm1910_vm8, %v1903_v47  ;;  %v1813_v50 = vadd.s32 %v1812_v46, %v1810_v52  ;;  %vm2000_vm11 = vcmp.eq.s32.totalorder %v4166_v45, %v1903_v47  ;;  %vm1999_vm12 = vcmp.eq.s32.totalorder %v4163_v28, %v1903_v47 }
 0x328   : > { %3116 = vmatprep.mubr.msk.f32.mxu1 %vm2000_vm11, %v3404_v7  ;;  %v1825_v19 = vpop.xlane.xlu0 %1824 }
 0x329   : > { %vm1904_vm13 = vcmp.lt.s32.totalorder %v1813_v50, 255  ;;  %v1826_v1 = vcvt.f32.s32 %v1825_v19 }
 0x32a   : > { %3117 = vmatmul.mubr.msk.f32.gmra.mrb[42].mxu1 %vm1999_vm12, %v3404_v7  ;;  %v1905_v9 = vsel %vm1904_vm13, %v1813_v50, 255  ;;  %v3277_v50 = vld [vmem:[%s3529_s20 + $0x18] sm:$0xff] }
 0x32b   : > { %1940 = vst.msk [vmem:[%s4782_s18 + $0xe8] sm:$0xff] %vm1910_vm8, %v1905_v9  ;;  %v1829_v17 = vadd.s32 %v1828_v32, %v1826_v1  ;;  %vm2002_vm14 = vcmp.eq.s32.totalorder %v4166_v45, %v1905_v9  ;;  %vm2001_vm15 = vcmp.eq.s32.totalorder %v4163_v28, %v1905_v9 }
 0x32c   : > { %3118 = vmatprep.mubr.msk.f32.mxu1 %vm2002_vm14, %v3404_v7 }
 0x32d   : > { %vm1906_vm1 = vcmp.lt.s32.totalorder %v1829_v17, 255 }
 0x32e   : > { %3119 = vmatmul.mubr.msk.f32.gmra.mrb[44].mxu1 %vm2001_vm15, %v3404_v7  ;;  %v1907_v38 = vsel %vm1906_vm1, %v1829_v17, 255  ;;  %v2463_v17 = vadd.s32 %v5053_v23, %v2429_v20  ;;  %v3283_v20 = vld [vmem:[%s3529_s20 + $0x30] sm:$0xff] }
 0x32f   : > { %1941 = vst.msk [vmem:[%s4782_s18 + $0xf0] sm:$0xff] %vm1910_vm8, %v1907_v38  ;;  %vm2004_vm2 = vcmp.eq.s32.totalorder %v4166_v45, %v1907_v38  ;;  %vm2003_vm3 = vcmp.eq.s32.totalorder %v4163_v28, %v1907_v38  ;;  %v2430_v38 = vadd.s32 40, %v5460_v22 }
 0x330   : > { %3120 = vmatprep.mubr.msk.f32.mxu1 %vm2004_vm2, %v3404_v7  ;;  %vm2495_vm11 = vcmp.lt.s32.totalorder %v2463_v17, 512 }
 0x332   : > { %3121 = vmatmul.mubr.msk.f32.gmra.mrb[46].mxu1 %vm2003_vm3, %v3404_v7 }
 0x374   : > { %v1841_v57 = vpop.xlane.xlu1 %1840 }
 0x375   : > { %v1842_v49 = vcvt.f32.s32 %v1841_v57 }
 0x377   : > { %v1845_v59 = vadd.s32 %v1844_v62, %v1842_v49  ;;  %v2432_v62 = vadd.s32 56, %v5460_v22 }
 0x379   : > { %vm1908_vm4 = vcmp.lt.s32.totalorder %v1845_v59, 255 }
 0x37a   : > { %v1909_v11 = vsel %vm1908_vm4, %v1845_v59, 255 }
 0x37b   : > { %1942 = vst.msk [vmem:[%s4782_s18 + $0xf8] sm:$0xff] %vm1910_vm8, %v1909_v11  ;;  %vm2006_vm5 = vcmp.eq.s32.totalorder %v4166_v45, %v1909_v11  ;;  %vm2005_vm6 = vcmp.eq.s32.totalorder %v4163_v28, %v1909_v11  ;;  %vm2491_vm8 = vcmp.lt.s32.totalorder %v2459_v34, 512  ;;  %s3405_s18 = smov [#allocation2]  }
 0x37c   : > { %3122 = vmatprep.mubr.msk.f32.mxu1 %vm2006_vm5, %v3404_v7  ;;  %s3310_s19 = sshll.u32 %s3405_s18, 4  ;;  %s3311_s19 = int_to_ptr.vmem [resolvable:$false] %s3310_s19 }
 0x37d   : > { %3123 = vmatmul.mubr.msk.f32.gmra.mrb[48].mxu1 %vm2005_vm6, %v3404_v7  ;;  %s3312_s21 = scalar_lea.vmem %s3311_s19, 16384  ;;  %p3313_p0 = scmp.lt.s32.totalorder %s5293_s15, %s3311_s19 }
 0x37e   : > { %p3314_p1 = scmp.lt.s32.totalorder %s3312_s21, %s3306_s17 }
 0x380   : > { %p3315_p2 = por %p3314_p1, %p3313_p0 }
 0x382   : > { %p3316_p3 = pnand %p3315_p2, %p3309_p13 }
 0x3a8   : > { %v5019_v0 = vpop.f32.mrb[0].mxu1 }
 0x3a9   : > { %2399 = vst.msk [vmem:[%s5017_s23 + $0x38] sm:$0xff] %vm381_vm0, %v5019_v0  ;;  %v2270_v28 = vpop.f32.mrb[1].mxu1  ;;  %v2530_v30 = vsub.f32 %v5019_v0, %v3279_v35 }
 0x3aa   : > { %v3278_v28 = vld [vmem:[%s3529_s20 + $0x20] sm:$0xff] }
 0x3ac   : > { %v5024_v45 = vpop.f32.mrb[2].mxu1 }
 0x3ad   : > { %2400 = vst.msk [vmem:[%s5017_s23 + $0x40] sm:$0xff] %vm381_vm0, %v5024_v45  ;;  %v2275_v7 = vpop.f32.mrb[3].mxu1 }
 0x3b0   : > { %v5029_v54 = vpop.f32.mrb[4].mxu1 }
 0x3b1   : > { %2401 = vst.msk [vmem:[%s5017_s23 + $0x48] sm:$0xff] %vm381_vm0, %v5029_v54  ;;  %v2280_v14 = vpop.f32.mrb[5].mxu1 }
 0x3b4   : > { %v5034_v24 = vpop.f32.mrb[6].mxu1 }
 0x3b5   : > { %2402 = vst.msk [vmem:[%s5017_s23 + $0x50] sm:$0xff] %vm381_vm0, %v5034_v24  ;;  %v2285_v55 = vpop.f32.mrb[7].mxu1 }
 0x3b8   : > { %v5039_v44 = vpop.f32.mrb[8].mxu1 }
 0x3b9   : > { %2403 = vst.msk [vmem:[%s5017_s23 + $0x58] sm:$0xff] %vm381_vm0, %v5039_v44  ;;  %v2290_v16 = vpop.f32.mrb[9].mxu1 }
 0x3bc   : > { %v2233_v41 = vpop.f32.mrb[64].mxu0 }
 0x3bd   : > { %v5045_v53 = vpop.f32.mrb[10].mxu1  ;;  %2392 = vst.msk [vmem:[%s5017_s23] sm:$0xff] %vm381_vm0, %v2233_v41  ;;  %v2235_v29 = vpop.f32.mrb[65].mxu0  ;;  %v2523_v61 = vsub.f32 %v2233_v41, %v3274_v42  ;;  %v2464_v41 = vadd.s32 %v5053_v23, %v2430_v38  ;;  %v2466_v42 = vadd.s32 %v5053_v23, %v2432_v62  ;;  %v2437_v38 = vadd.s32 96, %v5460_v22 }
 0x3be   : > { %2404 = vst.msk [vmem:[%s5017_s23 + $0x60] sm:$0xff] %vm381_vm0, %v5045_v53  ;;  %v2295_v56 = vpop.f32.mrb[11].mxu1  ;;  %v2431_v29 = vadd.s32 48, %v5460_v22 }
 0x3bf   : > { %v2555_v37 = vmul.f32 %v2523_v61, %v2523_v61  ;;  %v2433_v61 = vadd.s32 64, %v5460_v22  ;;  %vm2496_vm12 = vcmp.lt.s32.totalorder %v2464_v41, 512  ;;  %vm2498_vm13 = vcmp.lt.s32.totalorder %v2466_v42, 512 }
 0x3c0   : > { %v2465_v0 = vadd.s32 %v5053_v23, %v2431_v29  ;;  %v3286_v29 = vld [vmem:[%s3529_s20 + $0x60] sm:$0xff]  ;;  %v2471_v42 = vadd.s32 %v5053_v23, %v2437_v38  ;;  %v3291_v38 = vld [vmem:[%s3529_s20 + $0x88] sm:$0xff] }
 0x3c1   : > { %v5058_v25 = vpop.f32.mrb[12].mxu1  ;;  %v2651_v31 = vsel %vm2491_vm8, %v2555_v37, 0.0 }
 0x3c2   : > { %2405 = vst.msk [vmem:[%s5017_s23 + $0x68] sm:$0xff] %vm381_vm0, %v5058_v25  ;;  %v2300_v5 = vpop.f32.mrb[13].mxu1  ;;  %v2683_v48 = vsel %vm381_vm0, %v2651_v31, 0.0  ;;  %v2531_v31 = vsub.f32 %v5024_v45, %v3281_v40  ;;  %vm2497_vm14 = vcmp.lt.s32.totalorder %v2465_v0, 512  ;;  %v3288_v40 = vld [vmem:[%s3529_s20 + $0x70] sm:$0xff]  ;;  %vm2503_vm4 = vcmp.lt.s32.totalorder %v2471_v42, 512 }
 0x3c3   : > { %v3293_v42 = vld [vmem:[%s3529_s20 + $0x98] sm:$0xff] }
 0x3c4   : > { %v2238_v36 = vpop.f32.mrb[66].mxu0 }
 0x3c5   : > { %v5065_v6 = vpop.f32.mrb[14].mxu1  ;;  %2393 = vst.msk [vmem:[%s5017_s23 + $0x8] sm:$0xff] %vm381_vm0, %v2238_v36  ;;  %v2524_v3 = vsub.f32 %v2238_v36, %v3275_v51  ;;  %v2240_v2 = vpop.f32.mrb[67].mxu0  ;;  %v3280_v36 = vld [vmem:[%s3529_s20 + $0x28] sm:$0xff] }
 0x3c6   : > { %2406 = vst.msk [vmem:[%s5017_s23 + $0x70] sm:$0xff] %vm381_vm0, %v5065_v6  ;;  %v2305_v60 = vpop.f32.mrb[15].mxu1 }
 0x3c7   : > { %v2556_v63 = vmul.f32 %v2524_v3, %v2524_v3  ;;  %v2434_v60 = vadd.s32 72, %v5460_v22 }
 0x3c8   : > { %v2243_v18 = vpop.f32.mrb[68].mxu0 }
 0x3c9   : > { %v5075_v21 = vpop.f32.mrb[16].mxu1  ;;  %v2652_v26 = vsel %vm2492_vm7, %v2556_v63, 0.0  ;;  %2394 = vst.msk [vmem:[%s5017_s23 + $0x10] sm:$0xff] %vm381_vm0, %v2243_v18  ;;  %v2525_v33 = vsub.f32 %v2243_v18, %v3276_v27  ;;  %v2245_v39 = vpop.f32.mrb[69].mxu0  ;;  %v2435_v27 = vadd.s32 80, %v5460_v22 }
 0x3ca   : > { %2407 = vst.msk [vmem:[%s5017_s23 + $0x78] sm:$0xff] %vm381_vm0, %v5075_v21  ;;  %v2310_v10 = vpop.f32.mrb[17].mxu1  ;;  %v2684_v43 = vsel %vm381_vm0, %v2652_v26, 0.0  ;;  %v2467_v26 = vadd.s32 %v5053_v23, %v2433_v61  ;;  %v2439_v61 = vadd.s32 112, %v5460_v22 }
 0x3cb   : > { %v2685_v4 = vadd.f32 %v2684_v43, %v2683_v48  ;;  %v2557_v46 = vmul.f32 %v2525_v33, %v2525_v33  ;;  %v2562_v10 = vmul.f32 %v2530_v30, %v2530_v30  ;;  %v3282_v48 = vld [vmem:[%s3529_s20 + $0x48] sm:$0xff]  ;;  %v2469_v17 = vadd.s32 %v5053_v23, %v2435_v27 }
 0x3cc   : > { %v2248_v15 = vpop.f32.mrb[70].mxu0  ;;  %v2532_v43 = vsub.f32 %v5029_v54, %v3282_v48  ;;  %v2563_v54 = vmul.f32 %v2531_v31, %v2531_v31  ;;  %vm2499_vm15 = vcmp.lt.s32.totalorder %v2467_v26, 512  ;;  %v2537_v31 = vsub.f32 %v5065_v6, %v3288_v40  ;;  %v3289_v48 = vld [vmem:[%s3529_s20 + $0x78] sm:$0xff] }
 0x3cd   : > { %v5087_v52 = vpop.f32.mrb[18].mxu1  ;;  %v2653_v47 = vsel %vm2493_vm9, %v2557_v46, 0.0  ;;  %2395 = vst.msk [vmem:[%s5017_s23 + $0x18] sm:$0xff] %vm381_vm0, %v2248_v15  ;;  %v2526_v19 = vsub.f32 %v2248_v15, %v3277_v50  ;;  %v2250_v32 = vpop.f32.mrb[71].mxu0  ;;  %v2468_v15 = vadd.s32 %v5053_v23, %v2434_v60  ;;  %vm2501_vm2 = vcmp.lt.s32.totalorder %v2469_v17, 512 }
 0x3ce   : > { %2408 = vst.msk [vmem:[%s5017_s23 + $0x80] sm:$0xff] %vm381_vm0, %v5087_v52  ;;  %v2315_v1 = vpop.f32.mrb[19].mxu1  ;;  %v2686_v9 = vsel %vm381_vm0, %v2653_v47, 0.0  ;;  %v2436_v47 = vadd.s32 88, %v5460_v22  ;;  %v2564_v62 = vmul.f32 %v2532_v43, %v2532_v43  ;;  %v2440_v60 = vadd.s32 120, %v5460_v22 }
 0x3cf   : > { %v2687_v12 = vadd.f32 %v2686_v9, %v2685_v4  ;;  %v2558_v57 = vmul.f32 %v2526_v19, %v2526_v19  ;;  %v3284_v19 = vld [vmem:[%s3529_s20 + $0x50] sm:$0xff]  ;;  %vm2500_vm1 = vcmp.lt.s32.totalorder %v2468_v15, 512  ;;  %v2441_v26 = vadd.s32 128, %v5460_v22 }
 0x3d0   : > { %v2253_v49 = vpop.f32.mrb[72].mxu0  ;;  %v2533_v32 = vsub.f32 %v5034_v24, %v3284_v19  ;;  %v2660_v35 = vsel %vm2500_vm1, %v2564_v62, 0.0  ;;  %v2538_v43 = vsub.f32 %v5075_v21, %v3289_v48  ;;  %v2569_v15 = vmul.f32 %v2537_v31, %v2537_v31 }
 0x3d1   : > { %v5099_v59 = vpop.f32.mrb[20].mxu1  ;;  %v2654_v11 = vsel %vm2494_vm10, %v2558_v57, 0.0  ;;  %2396 = vst.msk [vmem:[%s5017_s23 + $0x20] sm:$0xff] %vm381_vm0, %v2253_v49  ;;  %v2527_v7 = vsub.f32 %v2253_v49, %v3278_v28  ;;  %v2255_v14 = vpop.f32.mrb[73].mxu0  ;;  %v2658_v57 = vsel %vm2498_vm13, %v2562_v10, 0.0  ;;  %v3285_v49 = vld [vmem:[%s3529_s20 + $0x58] sm:$0xff]  ;;  %v2475_v19 = vadd.s32 %v5053_v23, %v2441_v26 }
 0x3d2   : > { %2409 = vst.msk [vmem:[%s5017_s23 + $0x88] sm:$0xff] %vm381_vm0, %v5099_v59  ;;  %v2320_v55 = vpop.f32.mrb[21].mxu1  ;;  %v2688_v16 = vsel %vm381_vm0, %v2654_v11, 0.0  ;;  %v2534_v11 = vsub.f32 %v5039_v44, %v3285_v49  ;;  %v2438_v14 = vadd.s32 104, %v5460_v22  ;;  %v2565_v41 = vmul.f32 %v2533_v32, %v2533_v32 }
 0x3d3   : > { %v2689_v56 = vadd.f32 %v2688_v16, %v2687_v12  ;;  %v2559_v58 = vmul.f32 %v2527_v7, %v2527_v7  ;;  %v2470_v7 = vadd.s32 %v5053_v23, %v2436_v47  ;;  %v2659_v16 = vsel %vm2499_vm15, %v2563_v54, 0.0  ;;  %v3290_v47 = vld [vmem:[%s3529_s20 + $0x80] sm:$0xff] }
 0x3d4   : > { %v2258_v34 = vpop.f32.mrb[74].mxu0  ;;  %v2566_v30 = vmul.f32 %v2534_v11, %v2534_v11  ;;  %v2443_v32 = vadd.s32 144, %v5460_v22  ;;  %v2570_v17 = vmul.f32 %v2538_v43, %v2538_v43  ;;  %vm2507_vm7 = vcmp.lt.s32.totalorder %v2475_v19, 512 }
 0x3d5   : > { %v5112_v5 = vpop.f32.mrb[22].mxu1  ;;  %v2655_v37 = vsel %vm2495_vm11, %v2559_v58, 0.0  ;;  %2397 = vst.msk [vmem:[%s5017_s23 + $0x28] sm:$0xff] %vm381_vm0, %v2258_v34  ;;  %v2528_v51 = vsub.f32 %v2258_v34, %v3280_v36  ;;  %v2260_v3 = vpop.f32.mrb[75].mxu0  ;;  %v2696_v58 = vsel %vm381_vm0, %v2658_v57, 0.0  ;;  %vm2502_vm3 = vcmp.lt.s32.totalorder %v2470_v7, 512 }
 0x3d6   : > { %2410 = vst.msk [vmem:[%s5017_s23 + $0x90] sm:$0xff] %vm381_vm0, %v5112_v5  ;;  %v2325_v2 = vpop.f32.mrb[23].mxu1  ;;  %v2690_v13 = vsel %vm381_vm0, %v2655_v37, 0.0  ;;  %v3287_v37 = vld [vmem:[%s3529_s20 + $0x68] sm:$0xff]  ;;  %v2698_v3 = vsel %vm381_vm0, %v2659_v16, 0.0  ;;  %v2540_v57 = vsub.f32 %v5099_v59, %v3291_v38  ;;  %v2448_v48 = vadd.s32 184, %v5460_v22 }
 0x3d7   : > { %v2691_v63 = vadd.f32 %v2690_v13, %v2689_v56  ;;  %v2560_v18 = vmul.f32 %v2528_v51, %v2528_v51  ;;  %v2535_v56 = vsub.f32 %v5045_v53, %v3286_v29  ;;  %v2536_v36 = vsub.f32 %v5058_v25, %v3287_v37 }
 0x3d8   : > { %v2263_v33 = vpop.f32.mrb[76].mxu0  ;;  %v2472_v2 = vadd.s32 %v5053_v23, %v2438_v14  ;;  %v2661_v13 = vsel %vm2501_vm2, %v2565_v41, 0.0  ;;  %v3292_v14 = vld [vmem:[%s3529_s20 + $0x90] sm:$0xff]  ;;  %v2477_v41 = vadd.s32 %v5053_v23, %v2443_v32  ;;  %v2445_v29 = vadd.s32 160, %v5460_v22 }
 0x3d9   : > { %v5129_v39 = vpop.f32.mrb[24].mxu1  ;;  %v2656_v8 = vsel %vm2496_vm12, %v2560_v18, 0.0  ;;  %2398 = vst.msk [vmem:[%s5017_s23 + $0x30] sm:$0xff] %vm381_vm0, %v2263_v33  ;;  %v2529_v45 = vsub.f32 %v2263_v33, %v3283_v20  ;;  %v2265_v4 = vpop.f32.mrb[77].mxu0  ;;  %v2567_v0 = vmul.f32 %v2535_v56, %v2535_v56  ;;  %v2473_v18 = vadd.s32 %v5053_v23, %v2439_v61 }
 0x3da   : > { %2411 = vst.msk [vmem:[%s5017_s23 + $0x98] sm:$0xff] %vm381_vm0, %v5129_v39  ;;  %v2330_v46 = vpop.f32.mrb[25].mxu1  ;;  %v2692_v50 = vsel %vm381_vm0, %v2656_v8, 0.0  ;;  %v2662_v33 = vsel %vm2502_vm3, %v2566_v30, 0.0  ;;  %v2568_v10 = vmul.f32 %v2536_v36, %v2536_v36  ;;  %v2702_v20 = vsel %vm381_vm0, %v2661_v13, 0.0 }
 0x3db   : > { %v2693_v1 = vadd.f32 %v2692_v50, %v2691_v63  ;;  %v2561_v9 = vmul.f32 %v2529_v45, %v2529_v45  ;;  %v2700_v63 = vsel %vm381_vm0, %v2660_v35, 0.0  ;;  %vm2504_vm5 = vcmp.lt.s32.totalorder %v2472_v2, 512  ;;  %v3294_v2 = vld [vmem:[%s3529_s20 + $0xa0] sm:$0xff] }
 0x3dc   : > { %v2474_v45 = vadd.s32 %v5053_v23, %v2440_v60  ;;  %v2442_v4 = vadd.s32 136, %v5460_v22  ;;  %v2663_v46 = vsel %vm2503_vm4, %v2567_v0, 0.0  ;;  %v2539_v50 = vsub.f32 %v5087_v52, %v3290_v47 }
 0x3dd   : > { %v5146_v12 = vpop.f32.mrb[26].mxu1  ;;  %v2657_v28 = vsel %vm2497_vm14, %v2561_v9, 0.0  ;;  %v2704_v54 = vsel %vm381_vm0, %v2662_v33, 0.0  ;;  %vm2505_vm6 = vcmp.lt.s32.totalorder %v2473_v18, 512  ;;  %v2664_v9 = vsel %vm2504_vm5, %v2568_v10, 0.0  ;;  %v3295_v18 = vld [vmem:[%s3529_s20 + $0xa8] sm:$0xff] }
 0x3de   : > { %2412 = vst.msk [vmem:[%s5017_s23 + $0xa0] sm:$0xff] %vm381_vm0, %v5146_v12  ;;  %v2335_v24 = vpop.f32.mrb[27].mxu1  ;;  %v2694_v55 = vsel %vm381_vm0, %v2657_v28, 0.0  ;;  %v2706_v49 = vsel %vm381_vm0, %v2663_v46, 0.0  ;;  %vm2506_vm8 = vcmp.lt.s32.totalorder %v2474_v45, 512  ;;  %v2476_v11 = vadd.s32 %v5053_v23, %v2442_v4 }
 0x3df   : > { %v2695_v44 = vadd.f32 %v2694_v55, %v2693_v1  ;;  %v2444_v28 = vadd.s32 152, %v5460_v22  ;;  %v2665_v24 = vsel %vm2505_vm6, %v2569_v15, 0.0  ;;  %v2571_v7 = vmul.f32 %v2539_v50, %v2539_v50 }
 0x3e0   : > { %v2541_v55 = vsub.f32 %v5112_v5, %v3292_v14  ;;  %v2708_v16 = vsel %vm381_vm0, %v2664_v9, 0.0  ;;  %v2542_v61 = vsub.f32 %v5129_v39, %v3293_v42  ;;  %v2710_v5 = vsel %vm381_vm0, %v2665_v24, 0.0 }
 0x3e1   : > { %v5162_v34 = vpop.f32.mrb[28].mxu1  ;;  %v2697_v51 = vadd.f32 %v2696_v58, %v2695_v44  ;;  %v2666_v44 = vsel %vm2506_vm8, %v2570_v17, 0.0  ;;  %v2572_v58 = vmul.f32 %v2540_v57, %v2540_v57  ;;  %vm2508_vm9 = vcmp.lt.s32.totalorder %v2476_v11, 512 }
 0x3e2   : > { %2413 = vst.msk [vmem:[%s5017_s23 + $0xa8] sm:$0xff] %vm381_vm0, %v5162_v34  ;;  %v2340_v53 = vpop.f32.mrb[29].mxu1  ;;  %v2478_v37 = vadd.s32 %v5053_v23, %v2444_v28  ;;  %v2446_v36 = vadd.s32 168, %v5460_v22  ;;  %v2543_v60 = vsub.f32 %v5146_v12, %v3294_v2  ;;  %v2712_v39 = vsel %vm381_vm0, %v2666_v44, 0.0 }
 0x3e3   : > { %v2699_v25 = vadd.f32 %v2698_v3, %v2697_v51  ;;  %v2667_v51 = vsel %vm2507_vm7, %v2571_v7, 0.0  ;;  %v2573_v53 = vmul.f32 %v2541_v55, %v2541_v55  ;;  %vm2509_vm10 = vcmp.lt.s32.totalorder %v2477_v41, 512 }
 0x3e4   : > { %v2479_v13 = vadd.s32 %v5053_v23, %v2445_v29  ;;  %v2447_v0 = vadd.s32 176, %v5460_v22  ;;  %v2668_v31 = vsel %vm2508_vm9, %v2572_v58, 0.0  ;;  %v2544_v26 = vsub.f32 %v5162_v34, %v3295_v18 }
 0x3e5   : > { %v5177_v27 = vpop.f32.mrb[30].mxu1  ;;  %v2701_v8 = vadd.f32 %v2700_v63, %v2699_v25  ;;  %v2574_v25 = vmul.f32 %v2542_v61, %v2542_v61  ;;  %v2714_v12 = vsel %vm381_vm0, %v2667_v51, 0.0  ;;  %vm2510_vm11 = vcmp.lt.s32.totalorder %v2478_v37, 512 }
 0x3e6   : > { %2414 = vst.msk [vmem:[%s5017_s23 + $0xb0] sm:$0xff] %vm381_vm0, %v5177_v27  ;;  %v2345_v6 = vpop.f32.mrb[31].mxu1  ;;  %v2480_v10 = vadd.s32 %v5053_v23, %v2446_v36  ;;  %v2669_v43 = vsel %vm2509_vm10, %v2573_v53, 0.0  ;;  %v2716_v34 = vsel %vm381_vm0, %v2668_v31, 0.0  ;;  %vm2511_vm12 = vcmp.lt.s32.totalorder %v2479_v13, 512 }
 0x3e7   : > { %v2703_v21 = vadd.f32 %v2702_v20, %v2701_v8  ;;  %v2575_v6 = vmul.f32 %v2543_v60, %v2543_v60  ;;  %v3296_v20 = vld [vmem:[%s3529_s20 + $0xb0] sm:$0xff]  ;;  %v2481_v4 = vadd.s32 %v5053_v23, %v2447_v0  ;;  %v2449_v46 = vadd.s32 192, %v5460_v22  ;;  %v3301_v60 = vld [vmem:[%s3529_s20 + $0xd8] sm:$0xff] }
 0x3e8   : > { %v2545_v45 = vsub.f32 %v5177_v27, %v3296_v20  ;;  %v2670_v47 = vsel %vm2510_vm11, %v2574_v25, 0.0  ;;  %v2718_v27 = vsel %vm381_vm0, %v2669_v43, 0.0  ;;  %vm2512_vm13 = vcmp.lt.s32.totalorder %v2480_v10, 512 }
 0x3e9   : > { %v5192_v1 = vpop.f32.mrb[32].mxu1  ;;  %v2705_v62 = vadd.f32 %v2704_v54, %v2703_v21  ;;  %v2576_v21 = vmul.f32 %v2544_v26, %v2544_v26  ;;  %v3297_v54 = vld [vmem:[%s3529_s20 + $0xb8] sm:$0xff]  ;;  %v2482_v9 = vadd.s32 %v5053_v23, %v2448_v48  ;;  %v2450_v17 = vadd.s32 200, %v5460_v22  ;;  %v3302_v26 = vld [vmem:[%s3529_s20 + $0xe0] sm:$0xff] }
 0x3ea   : > { %2415 = vst.msk [vmem:[%s5017_s23 + $0xb8] sm:$0xff] %vm381_vm0, %v5192_v1  ;;  %v2350_v52 = vpop.f32.mrb[33].mxu1  ;;  %v2546_v19 = vsub.f32 %v5192_v1, %v3297_v54  ;;  %v2671_v57 = vsel %vm2511_vm12, %v2575_v6, 0.0  ;;  %v2720_v1 = vsel %vm381_vm0, %v2670_v47, 0.0  ;;  %vm2513_vm14 = vcmp.lt.s32.totalorder %v2481_v4, 512 }
 0x3eb   : > { %v2707_v59 = vadd.f32 %v2706_v49, %v2705_v62  ;;  %v2577_v62 = vmul.f32 %v2545_v45, %v2545_v45  ;;  %v3298_v52 = vld [vmem:[%s3529_s20 + $0xc0] sm:$0xff]  ;;  %v2483_v11 = vadd.s32 %v5053_v23, %v2449_v46  ;;  %v2451_v28 = vadd.s32 208, %v5460_v22  ;;  %v3303_v45 = vld [vmem:[%s3529_s20 + $0xe8] sm:$0xff] }
 0x3ec   : > { %v2672_v14 = vsel %vm2512_vm13, %v2576_v21, 0.0  ;;  %v2578_v55 = vmul.f32 %v2546_v19, %v2546_v19  ;;  %v2722_v29 = vsel %vm381_vm0, %v2671_v57, 0.0  ;;  %vm2514_vm15 = vcmp.lt.s32.totalorder %v2482_v9, 512 }
 0x3ed   : > { %v2353_v56 = vpop.f32.mrb[34].mxu1  ;;  %v2709_v35 = vadd.f32 %v2708_v16, %v2707_v59  ;;  %v3299_v59 = vld [vmem:[%s3529_s20 + $0xc8] sm:$0xff]  ;;  %v2452_v44 = vadd.s32 216, %v5460_v22  ;;  %v2673_v42 = vsel %vm2513_vm14, %v2577_v62, 0.0  ;;  %vm2515_vm1 = vcmp.lt.s32.totalorder %v2483_v11, 512 }
 0x3ee   : > { %2416 = vst.msk [vmem:[%s5017_s23 + $0xc0] sm:$0xff] %vm381_vm0, %v2353_v56  ;;  %v2355_v30 = vpop.f32.mrb[35].mxu1  ;;  %v2547_v49 = vsub.f32 %v2353_v56, %v3298_v52  ;;  %v2484_v56 = vadd.s32 %v5053_v23, %v2450_v17  ;;  %v2485_v37 = vadd.s32 %v5053_v23, %v2451_v28  ;;  %v2453_v51 = vadd.s32 224, %v5460_v22 }
 0x3ef   : > { %v2711_v3 = vadd.f32 %v2710_v5, %v2709_v35  ;;  %v3300_v35 = vld [vmem:[%s3529_s20 + $0xd0] sm:$0xff]  ;;  %v2724_v5 = vsel %vm381_vm0, %v2672_v14, 0.0  ;;  %v2726_v0 = vsel %vm381_vm0, %v2673_v42, 0.0  ;;  %v2454_v31 = vadd.s32 232, %v5460_v22 }
 0x3f0   : > { %v2579_v61 = vmul.f32 %v2547_v49, %v2547_v49  ;;  %vm2516_vm2 = vcmp.lt.s32.totalorder %v2484_v56, 512  ;;  %vm2517_vm3 = vcmp.lt.s32.totalorder %v2485_v37, 512  ;;  %v2487_v10 = vadd.s32 %v5053_v23, %v2453_v51 }
 0x3f1   : > { %v2358_v40 = vpop.f32.mrb[36].mxu1  ;;  %v2713_v63 = vadd.f32 %v2712_v39, %v2711_v3  ;;  %v2674_v3 = vsel %vm2514_vm15, %v2578_v55, 0.0  ;;  %v2455_v43 = vadd.s32 240, %v5460_v22 }
 0x3f2   : > { %2417 = vst.msk [vmem:[%s5017_s23 + $0xc8] sm:$0xff] %vm381_vm0, %v2358_v40  ;;  %v2360_v33 = vpop.f32.mrb[37].mxu1  ;;  %v2548_v16 = vsub.f32 %v2358_v40, %v3299_v59  ;;  %v2486_v40 = vadd.s32 %v5053_v23, %v2452_v44  ;;  %vm2519_vm5 = vcmp.lt.s32.totalorder %v2487_v10, 512  ;;  %v2456_v44 = vadd.s32 248, %v5460_v22 }
 0x3f3   : > { %v2715_v8 = vadd.f32 %v2714_v12, %v2713_v63  ;;  %v2675_v63 = vsel %vm2515_vm1, %v2579_v61, 0.0  ;;  %v2728_v12 = vsel %vm381_vm0, %v2674_v3, 0.0  ;;  %v3305_v61 = vld [vmem:[%s3529_s20 + $0xf8] sm:$0xff] }
 0x3f4   : > { %v2580_v2 = vmul.f32 %v2548_v16, %v2548_v16  ;;  %v2730_v46 = vsel %vm381_vm0, %v2675_v63, 0.0  ;;  %vm2518_vm4 = vcmp.lt.s32.totalorder %v2486_v40, 512 }
 0x3f5   : > { %v2363_v15 = vpop.f32.mrb[38].mxu1  ;;  %v2717_v50 = vadd.f32 %v2716_v34, %v2715_v8 }
 0x3f6   : > { %2418 = vst.msk [vmem:[%s5017_s23 + $0xd0] sm:$0xff] %vm381_vm0, %v2363_v15  ;;  %v2365_v32 = vpop.f32.mrb[39].mxu1  ;;  %v2549_v30 = vsub.f32 %v2363_v15, %v3300_v35  ;;  %v2676_v6 = vsel %vm2516_vm2, %v2580_v2, 0.0  ;;  %v2488_v15 = vadd.s32 %v5053_v23, %v2454_v31 }
 0x3f7   : > { %v2719_v38 = vadd.f32 %v2718_v27, %v2717_v50  ;;  %v2732_v54 = vsel %vm381_vm0, %v2676_v6, 0.0  ;;  %v2489_v32 = vadd.s32 %v5053_v23, %v2455_v43 }
 0x3f8   : > { %v2581_v18 = vmul.f32 %v2549_v30, %v2549_v30  ;;  %vm2520_vm6 = vcmp.lt.s32.totalorder %v2488_v15, 512 }
 0x3f9   : > { %v2368_v24 = vpop.f32.mrb[40].mxu1  ;;  %v2721_v7 = vadd.f32 %v2720_v1, %v2719_v38  ;;  %v3304_v38 = vld [vmem:[%s3529_s20 + $0xf0] sm:$0xff]  ;;  %vm2521_vm8 = vcmp.lt.s32.totalorder %v2489_v32, 512  ;;  %s2758_s20 = scalar_lea.sflag [#allocation3], %s3767_s22 }
 0x3fa   : > { %2419 = vst.msk [vmem:[%s5017_s23 + $0xd8] sm:$0xff] %vm381_vm0, %v2368_v24  ;;  %v2370_v41 = vpop.f32.mrb[41].mxu1  ;;  %v2550_v39 = vsub.f32 %v2368_v24, %v3301_v60  ;;  %v2677_v50 = vsel %vm2517_vm3, %v2581_v18, 0.0 }
 0x3fb   : > { %v2723_v58 = vadd.f32 %v2722_v29, %v2721_v7  ;;  %v2734_v52 = vsel %vm381_vm0, %v2677_v50, 0.0 }
 0x3fc   : > { %v2582_v20 = vmul.f32 %v2550_v39, %v2550_v39 }
 0x3fd   : > { %v2373_v36 = vpop.f32.mrb[42].mxu1  ;;  %v2725_v53 = vadd.f32 %v2724_v5, %v2723_v58  ;;  %v2490_v58 = vadd.s32 %v5053_v23, %v2456_v44 }
 0x3fe   : > { %2420 = vst.msk [vmem:[%s5017_s23 + $0xe0] sm:$0xff] %vm381_vm0, %v2373_v36  ;;  %v2375_v13 = vpop.f32.mrb[43].mxu1  ;;  %v2551_v33 = vsub.f32 %v2373_v36, %v3302_v26  ;;  %v2678_v9 = vsel %vm2518_vm4, %v2582_v20, 0.0 }
 0x3ff   : > { %v2727_v25 = vadd.f32 %v2726_v0, %v2725_v53  ;;  %v2736_v28 = vsel %vm381_vm0, %v2678_v9, 0.0  ;;  %vm2522_vm7 = vcmp.lt.s32.totalorder %v2490_v58, 512 }
 0x400   : > { %v2583_v21 = vmul.f32 %v2551_v33, %v2551_v33 }
 0x401   : > { %v2378_v48 = vpop.f32.mrb[44].mxu1  ;;  %v2729_v8 = vadd.f32 %v2728_v12, %v2727_v25 }
 0x402   : > { %2421 = vst.msk [vmem:[%s5017_s23 + $0xe8] sm:$0xff] %vm381_vm0, %v2378_v48  ;;  %v2552_v34 = vsub.f32 %v2378_v48, %v3303_v45  ;;  %v2380_v4 = vpop.f32.mrb[45].mxu1  ;;  %v2679_v1 = vsel %vm2519_vm5, %v2583_v21, 0.0 }
 0x403   : > { %v2731_v47 = vadd.f32 %v2730_v46, %v2729_v8  ;;  %v2738_v14 = vsel %vm381_vm0, %v2679_v1, 0.0 }
 0x404   : > { %v2584_v17 = vmul.f32 %v2552_v34, %v2552_v34 }
 0x405   : > { %v2383_v19 = vpop.f32.mrb[46].mxu1  ;;  %v2733_v27 = vadd.f32 %v2732_v54, %v2731_v47 }
 0x406   : > { %2422 = vst.msk [vmem:[%s5017_s23 + $0xf0] sm:$0xff] %vm381_vm0, %v2383_v19  ;;  %v2553_v57 = vsub.f32 %v2383_v19, %v3304_v38  ;;  %v2385_v62 = vpop.f32.mrb[47].mxu1  ;;  %v2680_v7 = vsel %vm2520_vm6, %v2584_v17, 0.0 }
 0x407   : > { %v2735_v49 = vadd.f32 %v2734_v52, %v2733_v27  ;;  %v2740_v16 = vsel %vm381_vm0, %v2680_v7, 0.0 }
 0x408   : > { %v2585_v11 = vmul.f32 %v2553_v57, %v2553_v57 }
 0x409   : > { %v2737_v24 = vadd.f32 %v2736_v28, %v2735_v49 }
 0x40a   : > { %v2681_v59 = vsel %vm2521_vm8, %v2585_v11, 0.0 }
 0x40b   : > { %v2739_v55 = vadd.f32 %v2738_v14, %v2737_v24  ;;  %v2742_v29 = vsel %vm381_vm0, %v2681_v59, 0.0 }
 0x40d   : > { %v2741_v41 = vadd.f32 %v2740_v16, %v2739_v55 }
 0x40f   : > { %v2743_v56 = vadd.f32 %v2742_v29, %v2741_v41 }
 0x450   : > { %v2388_v42 = vpop.f32.mrb[48].mxu1 }
 0x451   : > { %2423 = vst.msk [vmem:[%s5017_s23 + $0xf8] sm:$0xff] %vm381_vm0, %v2388_v42  ;;  %v2554_v35 = vsub.f32 %v2388_v42, %v3305_v61  ;;  %v2390_v30 = vpop.f32.mrb[49].mxu1 }
 0x453   : > { %v2586_v5 = vmul.f32 %v2554_v35, %v2554_v35 }
 0x455   : > { %v2682_v37 = vsel %vm2522_vm7, %v2586_v5, 0.0 }
 0x456   : > { %v2744_v36 = vsel %vm381_vm0, %v2682_v37, 0.0 }
 0x457   : > { %v2745_v51 = vadd.f32 %v2744_v36, %v2743_v56 }
 0x459   : > { %2746 = vadd.xlane.f32.xlu0 %v2745_v51 }
 0x45a   : > { %3319 = shalt.err (!%p3316_p3)
}
 0x45b   : > { %s3320_s29 = scalar_lea.hbm %s5290_s14, 8192  ;;  %s3324_s8 = scalar_lea.hbm %s5371_s4, 16384 }
 0x45c   : > { %p3321_p4 = scmp.ne.s32.totalorder %s5290_s14, %s3320_s29  ;;  %p3325_p9 = scmp.lt.u32.totalorder %s5290_s14, %s5371_s4 }
 0x45d   : > { %p3326_p10 = scmp.lt.u32.totalorder %s3324_s8, %s3320_s29  ;;  %p3328_p12 = scmp.lt.u32.totalorder %s3320_s29, %s5290_s14 }
 0x45e   : > { %p3322_p7 = pnand %p3321_p4, %p3487_p5 }
 0x45f   : > { %p3327_p11 = por %p3326_p10, %p3325_p9 }
 0x460   : > { %p3323_p8 = pneg %p3322_p7 }
 0x461   : > { %p3329_p13 = por %p3328_p12, %p3327_p11 }
 0x463   : > { %p3330_p0 = pnand %p3329_p13, %p3323_p8 }
 0x465   : > { %3333 = shalt.err (!%p3330_p0)
}
 0x466   : > { %s3406_s17 = smov 256   ;;  %s3407_s18 = smov 16  }
 0x467   : > { %3225 = dma.vmem_to_hbm [thread:$0]  (%p3487_p5), %s5293_s15, 8192, %s5290_s14, %s2758_s20, %s3406_s17, %s3406_s17, %s3407_s18  }
 0x468   : > { %s2957_s19 = sshll.u32 %s3767_s22, 3  ;;  %s3130_s23 = sshll.u32 %s3470_s28, 7 }
 0x469   : > { %s297_s21 = scalar_lea.vmem [#allocation4], %s2957_s19  ;;  %s5326_s16 = scalar_lea.hbm %s5374_s7, %s3130_s23 }
 0x46a   : > { %s2811_s29 = sshll.u32 %s297_s21, 4  ;;  %s2773_s8 = scalar_lea.sflag [#allocation5], %s3767_s22  ;;  %s5321_s29 = int_to_ptr.vmem [resolvable:$true] %s2811_s29 }
 0x46b   : > { %s3334_s9 = scalar_lea.vmem %s5321_s29, 128  ;;  %s3408_s28 = smov [#allocation4]  }
 0x46c   : > { %p3335_p1 = scmp.ne.s32.totalorder %s5321_s29, %s3334_s9  ;;  %s3338_s13 = sshll.u32 %s3408_s28, 4  ;;  %s3339_s13 = int_to_ptr.vmem [resolvable:$false] %s3338_s13 }
 0x46d   : > { %s3340_s17 = scalar_lea.vmem %s3339_s13, 256  ;;  %p3341_p4 = scmp.lt.s32.totalorder %s5321_s29, %s3339_s13 }
 0x46e   : > { %p3336_p2 = pnand %p3335_p1, %p3487_p5  ;;  %p3342_p7 = scmp.lt.s32.totalorder %s3340_s17, %s3334_s9 }
 0x470   : > { %p3337_p3 = pneg %p3336_p2  ;;  %p3343_p8 = por %p3342_p7, %p3341_p4 }
 0x472   : > { %p3344_p9 = pnand %p3343_p8, %p3337_p3 }
 0x4e6   : > { %v2747_v22 = vpop.xlane.xlu0 %2746 }
 0x4e7   : > { %v2748_v23 = vrot.slane %v2747_v22, 4 }
 0x4e9   : > { %v2749_v53 = vadd.f32 %v2748_v23, %v2747_v22 }
 0x4eb   : > { %v2750_v3 = vrot.slane %v2749_v53, 2 }
 0x4ed   : > { %v2751_v2 = vadd.f32 %v2750_v3, %v2749_v53 }
 0x4ef   : > { %v2752_v60 = vrot.slane %v2751_v2, 1 }
 0x4f1   : > { %v2753_v39 = vadd.f32 %v2752_v60, %v2751_v2 }
 0x4f3   : > { %3223 = vpush %v2753_v39 }
 0x524   : > { %s3224_s14 = spop %3223 }
 0x525   : > { %v2755_v13 = vstv %s3224_s14 }
 0x526   : > { %2756 = vst [vmem:[%s297_s21] sm:$0xff] %v2755_v13 }
 0x527   : > { %3347 = shalt.err (!%p3344_p9)
}
 0x528   : > { %s3348_s22 = scalar_lea.hbm %s5326_s16, 128  ;;  %s3352_s21 = scalar_lea.hbm %s5374_s7, 256 }
 0x529   : > { %p3349_p10 = scmp.ne.s32.totalorder %s5326_s16, %s3348_s22  ;;  %p3353_p13 = scmp.lt.u32.totalorder %s5326_s16, %s5374_s7 }
 0x52a   : > { %p3354_p0 = scmp.lt.u32.totalorder %s3352_s21, %s3348_s22  ;;  %p3356_p2 = scmp.lt.u32.totalorder %s3348_s22, %s5326_s16 }
 0x52b   : > { %p3350_p11 = pnand %p3349_p10, %p3487_p5 }
 0x52c   : > { %p3355_p1 = por %p3354_p0, %p3353_p13 }
 0x52d   : > { %p3351_p12 = pneg %p3350_p11 }
 0x52e   : > { %p3357_p3 = por %p3356_p2, %p3355_p1 }
 0x530   : > { %p3358_p4 = pnand %p3357_p3, %p3351_p12 }
 0x532   : > { %3361 = shalt.err (!%p3358_p4)
}
 0x533   : > { %3226 = dma.vmem_to_hbm [thread:$0]  (%p3487_p5), %s5321_s29, 128, %s5326_s16, %s2773_s8  }
 0x534 PF: > { %p3236_p7 = scmp.ge.s32.totalorder %s3400_s27, 2  ;;  %s2823_s15 = sand.u32 1, %s3388_s24  }
 0x535   : > { %s2824_s20 = scalar_lea.sflag [#allocation3], %s2823_s15 }
 0x536   : > { %p3230_p8 = pnand %p3236_p7, %p3491_p6 }
 0x538   : > { %3379 = dma.done.wait (!%p3230_p8), %s2824_s20, 8192  }
 0x539   : > { %3381 = vsyncadd (!%p3230_p8), %s2824_s20, 4294959104  ;;  %s2849_s9 = scalar_lea.sflag [#allocation5], %s2823_s15 }
 0x53a   : > { %3383 = dma.done.wait (!%p3230_p8), %s2849_s9, 128  }
 0x53b   : > { %3385 = vsyncadd (!%p3230_p8), %s2849_s9, 4294967168  ;;  %p21_p5 = scmp.ge.s32.totalorder %s3474_s30, 4   ;;  %s5461_s24 = smov %s3392_s25 }
 0x53c   : > { %s5462_s25 = smov %s3396_s26  ;;  %s5463_s26 = smov %s3485_s10 }
 0x53d   : > { %s5464_s27 = smov %s3474_s30  ;;  %23 = sbr.rel (!%p21_p5) target bundleno = 5 (0x5), region = 112 }
 0x544   :  { %2854 = vsyncpa [#allocation3], 1 }
 0x545   :  { %2856 = vsyncpa [#allocation3 + $0x1], 1 }
 0x546   :  { %2857 = vsyncpa [#allocation5], 1 }
 0x547   :  { %2859 = vsyncpa [#allocation5 + $0x1], 1 }

</bundles_post_ra>
